<compile_context>
chip_gen: v7x
topology: tpu7x:2x2x1
jax: 0.10.0
libtpu: 0.0.40
codegen_flags: <defaults>
</compile_context>

<pallas_src>
import functools

import jax
import jax.numpy as jnp
import numpy as np
from jax.experimental import pallas as pl
from jax.experimental.pallas import tpu as pltpu


def _cortical_loss_kernel(p_ref, t_ref, th_ref, out_ref, *,
                          C, inv_seg, bnd_scale, ant_scale,
                          smooth_nr, smooth_dr):
    i = pl.program_id(0)                        # row index == b * C + c

    p = p_ref[...].astype(jnp.float32)          # logits
    t = t_ref[...].astype(jnp.float32)
    th = th_ref[...].astype(jnp.float32)
    e = p - t                                   # gradient is linear: grad(p)-grad(t) == grad(e)
    D, H, W = p.shape

    bnd = jnp.float32(0.0)                      # sum_axes sum_elems |grad(p) - grad(t)|
    ant = jnp.float32(0.0)                      # sum_axes sum_elems |grad(p) * grad(th)|

    # ---- axis 0 (D, major axis): contiguous slab slices, scales hoisted -----
    e_lo, e_hi = e[1:2] - e[0:1], e[D - 1:D] - e[D - 2:D - 1]
    p_lo, p_hi = p[1:2] - p[0:1], p[D - 1:D] - p[D - 2:D - 1]
    th_lo, th_hi = th[1:2] - th[0:1], th[D - 1:D] - th[D - 2:D - 1]
    bnd += jnp.sum(jnp.abs(e_lo)) + jnp.sum(jnp.abs(e_hi))
    ant += jnp.sum(jnp.abs(p_lo * th_lo)) + jnp.sum(jnp.abs(p_hi * th_hi))
    if D >= 3:
        # Interior central differences; the 0.5 (and 0.25 for the product) are
        # applied once after the reduction instead of per element.
        bnd += 0.5 * jnp.sum(jnp.abs(e[2:] - e[:D - 2]))
        ant += 0.25 * jnp.sum(jnp.abs((p[2:] - p[:D - 2]) * (th[2:] - th[:D - 2])))

    # ---- axes 1 (sublane) & 2 (lane): XLU rolls + positional weights --------
    # bwd[k] = x[k] - x[k-1] (wrap at k=0 zeroed by mb); fwd = roll(bwd, -1) so
    # fwd[n-1] is already zero.  g2 = fwd + bwd equals twice the central diff
    # in the interior and the exact one-sided diff at both edges, hence
    # torch.gradient(edge_order=1) == w * g2 with w = 0.5 interior / 1.0 edges.
    idx_h = jax.lax.broadcasted_iota(jnp.int32, (H, W), 0)
    idx_w = jax.lax.broadcasted_iota(jnp.int32, (H, W), 1)
    for ax, n, idx in ((1, H, idx_h), (2, W, idx_w)):
        mb = (idx != 0).astype(jnp.float32)                             # kill the wrap term
        w = jnp.where(jnp.logical_and(idx != 0, idx != n - 1),
                      0.5, 1.0).astype(jnp.float32)                     # grad weight
        w2 = w * w                                                      # product carries w twice

        def grad2(x, ax=ax, n=n, mb=mb):
            bwd = (x - pltpu.roll(x, 1, ax)) * mb
            return bwd + pltpu.roll(bwd, n - 1, ax)                     # n-1 == roll by -1

        g2e, g2p, g2th = grad2(e), grad2(p), grad2(th)
        bnd += jnp.sum(w * jnp.abs(g2e))
        ant += jnp.sum(w2 * jnp.abs(g2p * g2th))

    # Per-row contribution of the boundary / anatomical terms (alpha, beta and
    # the 1/(3*B*C*S) means are folded into the static scales).
    out_ref[...] = jnp.zeros((1, 1), jnp.float32) + (bnd_scale * bnd + ant_scale * ant)

    # ---- Dice (MONAI DiceLoss: include_background=False, sigmoid=True) ------
    # Background-channel rows skip the sigmoid and both reductions entirely.
    @pl.when(i % C != 0)
    def _dice():
        ps = 0.5 * jnp.tanh(0.5 * p) + 0.5        # sigmoid via EUP tanh, no VPU divide
        inter = jnp.sum(ps * t)
        denom = jnp.sum(ps + t)                   # fused single reduction
        f = 1.0 - (2.0 * inter + smooth_nr) / (denom + smooth_dr)
        out_ref[...] += f * inv_seg


def cortical_aware_loss(pred, target, thickness, alpha=0.5, beta=0.3,
                        compact_inputs=False):
    B, C, D, H, W = pred.shape
    if C < 2:
        raise ValueError("include_background=False Dice requires C >= 2")
    if min(D, H, W) < 2:
        raise ValueError("torch.gradient (edge_order=1) requires spatial dims >= 2")

    # Rows ordered as b*C + c; the in-kernel background gate (i % C == 0)
    # relies on this ordering.
    p = pred.reshape(B * C, D, H, W)
    t = target.reshape(B * C, D, H, W)
    th = thickness.reshape(B * C, D, H, W)
    if compact_inputs:
        # Cuts the HBM stream from 12 to 8 B/elem (v5e is bandwidth-bound).
        # Exact for one-hot targets; thickness loses ~3 decimal digits.
        t = t.astype(jnp.bfloat16)
        th = th.astype(jnp.bfloat16)

    S = D * H * W
    kernel = functools.partial(
        _cortical_loss_kernel,
        C=C,
        inv_seg=1.0 / float(B * (C - 1)),
        bnd_scale=float(beta) / float(3 * B * C * S),
        ant_scale=float(alpha) / float(3 * B * C * S),
        smooth_nr=1e-5, smooth_dr=1e-5,
    )

    # One (D, H, W) volume per grid step (leading dim squeezed); Pallas
    # double-buffers the three input tiles.  Each step owns its own output
    # block, so the grid axis is "parallel" (shards across TensorCores on
    # multi-TC chips).
    # NOTE: for very small W (< 128 lanes) fold several rows per step, and for
    # volumes whose per-step footprint exceeds the VMEM budget below, tile
    # over D with the halo carried in a small persistent scratch — neither is
    # needed at the shapes exercised here.
    vol_spec = pl.BlockSpec((None, D, H, W), lambda i: (i, 0, 0, 0))

    block_bytes = (p.dtype.itemsize + t.dtype.itemsize + th.dtype.itemsize) * S
    needed = 2 * block_bytes + 10 * S * 4 + (2 << 20)    # 2x pipeline bufs + f32 temps + slack
    try:
        vmem_cap = int(pltpu.get_tpu_info().vmem_capacity_bytes)
    except Exception:
        vmem_cap = 64 << 20                              # conservative (v7x per-TC VMEM)
    vmem_limit = int(min(max(needed, 32 << 20), (3 * vmem_cap) // 4))

    partials = pl.pallas_call(
        kernel,
        out_shape=jax.ShapeDtypeStruct((B * C, 1, 1), jnp.float32),
        grid=(B * C,),
        in_specs=[vol_spec, vol_spec, vol_spec],
        out_specs=pl.BlockSpec((None, 1, 1), lambda i: (i, 0, 0)),
        compiler_params=pltpu.CompilerParams(
            dimension_semantics=("parallel",),
            vmem_limit_bytes=vmem_limit),
    )(p, t, th)
    return jnp.sum(partials)


# ---------------------- pure-JAX reference (torch semantics) ----------------------
def _ref_gradient(x, axis):
    n = x.shape[axis]
    left = jax.lax.slice_in_dim(x, 0, n - 2, axis=axis)
    right = jax.lax.slice_in_dim(x, 2, n, axis=axis)
    central = (right - left) * 0.5
    first = (jax.lax.slice_in_dim(x, 1, 2, axis=axis)
             - jax.lax.slice_in_dim(x, 0, 1, axis=axis))
    last = (jax.lax.slice_in_dim(x, n - 1, n, axis=axis)
            - jax.lax.slice_in_dim(x, n - 2, n - 1, axis=axis))
    return jnp.concatenate([first, central, last], axis=axis)


def cortical_aware_loss_ref(pred, target, thickness, alpha=0.5, beta=0.3):
    axes = (2, 3, 4)
    ps = jax.nn.sigmoid(pred)[:, 1:]
    tf = target[:, 1:]
    inter = jnp.sum(ps * tf, axis=axes)
    denom = jnp.sum(tf, axis=axes) + jnp.sum(ps, axis=axes)
    seg = jnp.mean(1.0 - (2.0 * inter + 1e-5) / (denom + 1e-5))
    boundary = 0.0
    anat = 0.0
    for ax in axes:
        pg = _ref_gradient(pred, ax)
        tg = _ref_gradient(target, ax)
        thg = _ref_gradient(thickness, ax)
        boundary = boundary + jnp.mean(jnp.abs(pg - tg))
        anat = anat + jnp.mean(jnp.abs(pg * thg))
    return seg + alpha * anat / 3.0 + beta * boundary / 3.0


if __name__ == "__main__":
    # Lane-dense spatial shape (W = 128) so the test exercises the kernel the
    # way realistic volumes do; still small and fast.
    B, C, D, H, W = 2, 4, 8, 16, 128
    key = jax.random.PRNGKey(0)
    k1, k2, k3 = jax.random.split(key, 3)

    pred = jax.random.normal(k1, (B, C, D, H, W), dtype=jnp.float32)            # logits
    target = jax.random.bernoulli(k2, 0.5, (B, C, D, H, W)).astype(jnp.float32)
    thickness = jax.random.uniform(k3, (B, C, D, H, W), dtype=jnp.float32,
                                   minval=0.0, maxval=4.0)

    loss = jax.block_until_ready(
        cortical_aware_loss(pred, target, thickness, alpha=0.5, beta=0.3))
    ref = jax.block_until_ready(
        cortical_aware_loss_ref(pred, target, thickness, alpha=0.5, beta=0.3))

    assert np.allclose(np.asarray(loss), np.asarray(ref), rtol=1e-3, atol=1e-4), (
        f"mismatch: pallas={float(loss)} ref={float(ref)}")

    print("KERNEL_OK")
</pallas_src>

<mosaic_0001>
module attributes {stable_mosaic.version = 11 : i64} {
  func.func @_cortical_loss_kernel(%arg0: i32, %arg1: memref<1x8x16x128xf32, #tpu.memory_space<vmem>>, %arg2: memref<1x8x16x128xf32, #tpu.memory_space<vmem>>, %arg3: memref<1x8x16x128xf32, #tpu.memory_space<vmem>>, %arg4: memref<1x1x1xf32, #tpu.memory_space<vmem>>) attributes {dimension_semantics = [#tpu.dimension_semantics<parallel>], iteration_bounds = array<i64: 8>, scalar_prefetch = 0 : i64, scratch_operands = 0 : i64, tpu.core_type = #tpu.core_type<tc>, window_params = [{transform_indices = @transform_0, window_bounds = array<i64: 1, 8, 16, 128>}, {transform_indices = @transform_1, window_bounds = array<i64: 1, 8, 16, 128>}, {transform_indices = @transform_2, window_bounds = array<i64: 1, 8, 16, 128>}, {transform_indices = @transform_3, window_bounds = array<i64: 1, 1, 1>}]} {
    %c0 = arith.constant 0 : index
    %c0_0 = arith.constant 0 : index
    %c0_1 = arith.constant 0 : index
    %c0_2 = arith.constant 0 : index
    %0 = vector.load %arg1[%c0, %c0_0, %c0_1, %c0_2] : memref<1x8x16x128xf32, #tpu.memory_space<vmem>>, vector<1x8x16x128xf32>
    %1 = vector.shape_cast %0 : vector<1x8x16x128xf32> to vector<8x16x128xf32>
    %c0_3 = arith.constant 0 : index
    %c0_4 = arith.constant 0 : index
    %c0_5 = arith.constant 0 : index
    %c0_6 = arith.constant 0 : index
    %2 = vector.load %arg2[%c0_3, %c0_4, %c0_5, %c0_6] : memref<1x8x16x128xf32, #tpu.memory_space<vmem>>, vector<1x8x16x128xf32>
    %3 = vector.shape_cast %2 : vector<1x8x16x128xf32> to vector<8x16x128xf32>
    %c0_7 = arith.constant 0 : index
    %c0_8 = arith.constant 0 : index
    %c0_9 = arith.constant 0 : index
    %c0_10 = arith.constant 0 : index
    %4 = vector.load %arg3[%c0_7, %c0_8, %c0_9, %c0_10] : memref<1x8x16x128xf32, #tpu.memory_space<vmem>>, vector<1x8x16x128xf32>
    %5 = vector.shape_cast %4 : vector<1x8x16x128xf32> to vector<8x16x128xf32>
    %6 = arith.subf %1, %3 : vector<8x16x128xf32>
    %7 = vector.extract_strided_slice %6 {offsets = [1, 0, 0], sizes = [1, 16, 128], strides = [1, 1, 1]} : vector<8x16x128xf32> to vector<1x16x128xf32>
    %8 = vector.extract_strided_slice %6 {offsets = [0, 0, 0], sizes = [1, 16, 128], strides = [1, 1, 1]} : vector<8x16x128xf32> to vector<1x16x128xf32>
    %9 = arith.subf %7, %8 : vector<1x16x128xf32>
    %10 = vector.extract_strided_slice %6 {offsets = [7, 0, 0], sizes = [1, 16, 128], strides = [1, 1, 1]} : vector<8x16x128xf32> to vector<1x16x128xf32>
    %11 = vector.extract_strided_slice %6 {offsets = [6, 0, 0], sizes = [1, 16, 128], strides = [1, 1, 1]} : vector<8x16x128xf32> to vector<1x16x128xf32>
    %12 = arith.subf %10, %11 : vector<1x16x128xf32>
    %13 = vector.extract_strided_slice %1 {offsets = [1, 0, 0], sizes = [1, 16, 128], strides = [1, 1, 1]} : vector<8x16x128xf32> to vector<1x16x128xf32>
    %14 = vector.extract_strided_slice %1 {offsets = [0, 0, 0], sizes = [1, 16, 128], strides = [1, 1, 1]} : vector<8x16x128xf32> to vector<1x16x128xf32>
    %15 = arith.subf %13, %14 : vector<1x16x128xf32>
    %16 = vector.extract_strided_slice %1 {offsets = [7, 0, 0], sizes = [1, 16, 128], strides = [1, 1, 1]} : vector<8x16x128xf32> to vector<1x16x128xf32>
    %17 = vector.extract_strided_slice %1 {offsets = [6, 0, 0], sizes = [1, 16, 128], strides = [1, 1, 1]} : vector<8x16x128xf32> to vector<1x16x128xf32>
    %18 = arith.subf %16, %17 : vector<1x16x128xf32>
    %19 = vector.extract_strided_slice %5 {offsets = [1, 0, 0], sizes = [1, 16, 128], strides = [1, 1, 1]} : vector<8x16x128xf32> to vector<1x16x128xf32>
    %20 = vector.extract_strided_slice %5 {offsets = [0, 0, 0], sizes = [1, 16, 128], strides = [1, 1, 1]} : vector<8x16x128xf32> to vector<1x16x128xf32>
    %21 = arith.subf %19, %20 : vector<1x16x128xf32>
    %22 = vector.extract_strided_slice %5 {offsets = [7, 0, 0], sizes = [1, 16, 128], strides = [1, 1, 1]} : vector<8x16x128xf32> to vector<1x16x128xf32>
    %23 = vector.extract_strided_slice %5 {offsets = [6, 0, 0], sizes = [1, 16, 128], strides = [1, 1, 1]} : vector<8x16x128xf32> to vector<1x16x128xf32>
    %24 = arith.subf %22, %23 : vector<1x16x128xf32>
    %25 = math.absf %9 : vector<1x16x128xf32>
    %26 = vector.shape_cast %25 : vector<1x16x128xf32> to vector<1x1x16x128xf32>
    %cst = arith.constant dense<0.000000e+00> : vector<1xf32>
    %27 = vector.multi_reduction <add>, %26, %cst [1, 2, 3] : vector<1x1x16x128xf32> to vector<1xf32>
    %28 = vector.shape_cast %27 : vector<1xf32> to vector<1x1x1x1xf32>
    %29 = vector.extract %28[0, 0, 0, 0] : f32 from vector<1x1x1x1xf32>
    %30 = math.absf %12 : vector<1x16x128xf32>
    %31 = vector.shape_cast %30 : vector<1x16x128xf32> to vector<1x1x16x128xf32>
    %cst_11 = arith.constant dense<0.000000e+00> : vector<1xf32>
    %32 = vector.multi_reduction <add>, %31, %cst_11 [1, 2, 3] : vector<1x1x16x128xf32> to vector<1xf32>
    %33 = vector.shape_cast %32 : vector<1xf32> to vector<1x1x1x1xf32>
    %34 = vector.extract %33[0, 0, 0, 0] : f32 from vector<1x1x1x1xf32>
    %35 = arith.addf %29, %34 : f32
    %cst_12 = arith.constant 0.000000e+00 : f32
    %36 = arith.addf %cst_12, %35 : f32
    %37 = arith.mulf %15, %21 : vector<1x16x128xf32>
    %38 = math.absf %37 : vector<1x16x128xf32>
    %39 = vector.shape_cast %38 : vector<1x16x128xf32> to vector<1x1x16x128xf32>
    %cst_13 = arith.constant dense<0.000000e+00> : vector<1xf32>
    %40 = vector.multi_reduction <add>, %39, %cst_13 [1, 2, 3] : vector<1x1x16x128xf32> to vector<1xf32>
    %41 = vector.shape_cast %40 : vector<1xf32> to vector<1x1x1x1xf32>
    %42 = vector.extract %41[0, 0, 0, 0] : f32 from vector<1x1x1x1xf32>
    %43 = arith.mulf %18, %24 : vector<1x16x128xf32>
    %44 = math.absf %43 : vector<1x16x128xf32>
    %45 = vector.shape_cast %44 : vector<1x16x128xf32> to vector<1x1x16x128xf32>
    %cst_14 = arith.constant dense<0.000000e+00> : vector<1xf32>
    %46 = vector.multi_reduction <add>, %45, %cst_14 [1, 2, 3] : vector<1x1x16x128xf32> to vector<1xf32>
    %47 = vector.shape_cast %46 : vector<1xf32> to vector<1x1x1x1xf32>
    %48 = vector.extract %47[0, 0, 0, 0] : f32 from vector<1x1x1x1xf32>
    %49 = arith.addf %42, %48 : f32
    %cst_15 = arith.constant 0.000000e+00 : f32
    %50 = arith.addf %cst_15, %49 : f32
    %51 = vector.extract_strided_slice %6 {offsets = [2, 0, 0], sizes = [6, 16, 128], strides = [1, 1, 1]} : vector<8x16x128xf32> to vector<6x16x128xf32>
    %52 = vector.extract_strided_slice %6 {offsets = [0, 0, 0], sizes = [6, 16, 128], strides = [1, 1, 1]} : vector<8x16x128xf32> to vector<6x16x128xf32>
    %53 = arith.subf %51, %52 : vector<6x16x128xf32>
    %54 = math.absf %53 : vector<6x16x128xf32>
    %55 = vector.shape_cast %54 : vector<6x16x128xf32> to vector<1x6x16x128xf32>
    %cst_16 = arith.constant dense<0.000000e+00> : vector<1xf32>
    %56 = vector.multi_reduction <add>, %55, %cst_16 [1, 2, 3] : vector<1x6x16x128xf32> to vector<1xf32>
    %57 = vector.shape_cast %56 : vector<1xf32> to vector<1x1x1x1xf32>
    %58 = vector.extract %57[0, 0, 0, 0] : f32 from vector<1x1x1x1xf32>
    %cst_17 = arith.constant 5.000000e-01 : f32
    %59 = arith.mulf %cst_17, %58 : f32
    %60 = arith.addf %36, %59 : f32
    %61 = vector.extract_strided_slice %1 {offsets = [2, 0, 0], sizes = [6, 16, 128], strides = [1, 1, 1]} : vector<8x16x128xf32> to vector<6x16x128xf32>
    %62 = vector.extract_strided_slice %1 {offsets = [0, 0, 0], sizes = [6, 16, 128], strides = [1, 1, 1]} : vector<8x16x128xf32> to vector<6x16x128xf32>
    %63 = arith.subf %61, %62 : vector<6x16x128xf32>
    %64 = vector.extract_strided_slice %5 {offsets = [2, 0, 0], sizes = [6, 16, 128], strides = [1, 1, 1]} : vector<8x16x128xf32> to vector<6x16x128xf32>
    %65 = vector.extract_strided_slice %5 {offsets = [0, 0, 0], sizes = [6, 16, 128], strides = [1, 1, 1]} : vector<8x16x128xf32> to vector<6x16x128xf32>
    %66 = arith.subf %64, %65 : vector<6x16x128xf32>
    %67 = arith.mulf %63, %66 : vector<6x16x128xf32>
    %68 = math.absf %67 : vector<6x16x128xf32>
    %69 = vector.shape_cast %68 : vector<6x16x128xf32> to vector<1x6x16x128xf32>
    %cst_18 = arith.constant dense<0.000000e+00> : vector<1xf32>
    %70 = vector.multi_reduction <add>, %69, %cst_18 [1, 2, 3] : vector<1x6x16x128xf32> to vector<1xf32>
    %71 = vector.shape_cast %70 : vector<1xf32> to vector<1x1x1x1xf32>
    %72 = vector.extract %71[0, 0, 0, 0] : f32 from vector<1x1x1x1xf32>
    %cst_19 = arith.constant 2.500000e-01 : f32
    %73 = arith.mulf %cst_19, %72 : f32
    %74 = arith.addf %50, %73 : f32
    %75 = tpu.iota {dimensions = array<i32: 0>} : vector<16x128xi32>
    %76 = tpu.iota {dimensions = array<i32: 1>} : vector<16x128xi32>
    %c0_i32 = arith.constant 0 : i32
    %77 = vector.broadcast %c0_i32 : i32 to vector<16x128xi32>
    %78 = arith.cmpi ne, %75, %77 : vector<16x128xi32>
    %79 = arith.extui %78 : vector<16x128xi1> to vector<16x128xi32>
    %80 = arith.sitofp %79 : vector<16x128xi32> to vector<16x128xf32>
    %c0_i32_20 = arith.constant 0 : i32
    %81 = vector.broadcast %c0_i32_20 : i32 to vector<16x128xi32>
    %82 = arith.cmpi ne, %75, %81 : vector<16x128xi32>
    %c15_i32 = arith.constant 15 : i32
    %83 = vector.broadcast %c15_i32 : i32 to vector<16x128xi32>
    %84 = arith.cmpi ne, %75, %83 : vector<16x128xi32>
    %85 = arith.andi %82, %84 : vector<16x128xi1>
    %cst_21 = arith.constant 5.000000e-01 : f32
    %cst_22 = arith.constant 1.000000e+00 : f32
    %86 = vector.broadcast %cst_21 : f32 to vector<16x128xf32>
    %87 = vector.broadcast %cst_22 : f32 to vector<16x128xf32>
    %88 = arith.select %85, %86, %87 : vector<16x128xi1>, vector<16x128xf32>
    %89 = arith.mulf %88, %88 : vector<16x128xf32>
    %c1_i32 = arith.constant 1 : i32
    %90 = tpu.dynamic_rotate %6 by %c1_i32 dim 1 : vector<8x16x128xf32>, i32 -> vector<8x16x128xf32>
    %91 = arith.subf %6, %90 : vector<8x16x128xf32>
    %92 = vector.shape_cast %80 : vector<16x128xf32> to vector<1x16x128xf32>
    %93 = vector.broadcast %92 : vector<1x16x128xf32> to vector<8x16x128xf32>
    %94 = arith.mulf %91, %93 : vector<8x16x128xf32>
    %c15_i32_23 = arith.constant 15 : i32
    %95 = tpu.dynamic_rotate %94 by %c15_i32_23 dim 1 : vector<8x16x128xf32>, i32 -> vector<8x16x128xf32>
    %96 = arith.addf %94, %95 : vector<8x16x128xf32>
    %c1_i32_24 = arith.constant 1 : i32
    %97 = tpu.dynamic_rotate %1 by %c1_i32_24 dim 1 : vector<8x16x128xf32>, i32 -> vector<8x16x128xf32>
    %98 = arith.subf %1, %97 : vector<8x16x128xf32>
    %99 = vector.shape_cast %80 : vector<16x128xf32> to vector<1x16x128xf32>
    %100 = vector.broadcast %99 : vector<1x16x128xf32> to vector<8x16x128xf32>
    %101 = arith.mulf %98, %100 : vector<8x16x128xf32>
    %c15_i32_25 = arith.constant 15 : i32
    %102 = tpu.dynamic_rotate %101 by %c15_i32_25 dim 1 : vector<8x16x128xf32>, i32 -> vector<8x16x128xf32>
    %103 = arith.addf %101, %102 : vector<8x16x128xf32>
    %c1_i32_26 = arith.constant 1 : i32
    %104 = tpu.dynamic_rotate %5 by %c1_i32_26 dim 1 : vector<8x16x128xf32>, i32 -> vector<8x16x128xf32>
    %105 = arith.subf %5, %104 : vector<8x16x128xf32>
    %106 = vector.shape_cast %80 : vector<16x128xf32> to vector<1x16x128xf32>
    %107 = vector.broadcast %106 : vector<1x16x128xf32> to vector<8x16x128xf32>
    %108 = arith.mulf %105, %107 : vector<8x16x128xf32>
    %c15_i32_27 = arith.constant 15 : i32
    %109 = tpu.dynamic_rotate %108 by %c15_i32_27 dim 1 : vector<8x16x128xf32>, i32 -> vector<8x16x128xf32>
    %110 = arith.addf %108, %109 : vector<8x16x128xf32>
    %111 = math.absf %96 : vector<8x16x128xf32>
    %112 = vector.shape_cast %88 : vector<16x128xf32> to vector<1x16x128xf32>
    %113 = vector.broadcast %112 : vector<1x16x128xf32> to vector<8x16x128xf32>
    %114 = arith.mulf %113, %111 : vector<8x16x128xf32>
    %115 = vector.shape_cast %114 : vector<8x16x128xf32> to vector<1x8x16x128xf32>
    %cst_28 = arith.constant dense<0.000000e+00> : vector<1xf32>
    %116 = vector.multi_reduction <add>, %115, %cst_28 [1, 2, 3] : vector<1x8x16x128xf32> to vector<1xf32>
    %117 = vector.shape_cast %116 : vector<1xf32> to vector<1x1x1x1xf32>
    %118 = vector.extract %117[0, 0, 0, 0] : f32 from vector<1x1x1x1xf32>
    %119 = arith.addf %60, %118 : f32
    %120 = arith.mulf %103, %110 : vector<8x16x128xf32>
    %121 = math.absf %120 : vector<8x16x128xf32>
    %122 = vector.shape_cast %89 : vector<16x128xf32> to vector<1x16x128xf32>
    %123 = vector.broadcast %122 : vector<1x16x128xf32> to vector<8x16x128xf32>
    %124 = arith.mulf %123, %121 : vector<8x16x128xf32>
    %125 = vector.shape_cast %124 : vector<8x16x128xf32> to vector<1x8x16x128xf32>
    %cst_29 = arith.constant dense<0.000000e+00> : vector<1xf32>
    %126 = vector.multi_reduction <add>, %125, %cst_29 [1, 2, 3] : vector<1x8x16x128xf32> to vector<1xf32>
    %127 = vector.shape_cast %126 : vector<1xf32> to vector<1x1x1x1xf32>
    %128 = vector.extract %127[0, 0, 0, 0] : f32 from vector<1x1x1x1xf32>
    %129 = arith.addf %74, %128 : f32
    %c0_i32_30 = arith.constant 0 : i32
    %130 = vector.broadcast %c0_i32_30 : i32 to vector<16x128xi32>
    %131 = arith.cmpi ne, %76, %130 : vector<16x128xi32>
    %132 = arith.extui %131 : vector<16x128xi1> to vector<16x128xi32>
    %133 = arith.sitofp %132 : vector<16x128xi32> to vector<16x128xf32>
    %c0_i32_31 = arith.constant 0 : i32
    %134 = vector.broadcast %c0_i32_31 : i32 to vector<16x128xi32>
    %135 = arith.cmpi ne, %76, %134 : vector<16x128xi32>
    %c127_i32 = arith.constant 127 : i32
    %136 = vector.broadcast %c127_i32 : i32 to vector<16x128xi32>
    %137 = arith.cmpi ne, %76, %136 : vector<16x128xi32>
    %138 = arith.andi %135, %137 : vector<16x128xi1>
    %cst_32 = arith.constant 5.000000e-01 : f32
    %cst_33 = arith.constant 1.000000e+00 : f32
    %139 = vector.broadcast %cst_32 : f32 to vector<16x128xf32>
    %140 = vector.broadcast %cst_33 : f32 to vector<16x128xf32>
    %141 = arith.select %138, %139, %140 : vector<16x128xi1>, vector<16x128xf32>
    %142 = arith.mulf %141, %141 : vector<16x128xf32>
    %c1_i32_34 = arith.constant 1 : i32
    %143 = tpu.dynamic_rotate %6 by %c1_i32_34 dim 2 : vector<8x16x128xf32>, i32 -> vector<8x16x128xf32>
    %144 = arith.subf %6, %143 : vector<8x16x128xf32>
    %145 = vector.shape_cast %133 : vector<16x128xf32> to vector<1x16x128xf32>
    %146 = vector.broadcast %145 : vector<1x16x128xf32> to vector<8x16x128xf32>
    %147 = arith.mulf %144, %146 : vector<8x16x128xf32>
    %c127_i32_35 = arith.constant 127 : i32
    %148 = tpu.dynamic_rotate %147 by %c127_i32_35 dim 2 : vector<8x16x128xf32>, i32 -> vector<8x16x128xf32>
    %149 = arith.addf %147, %148 : vector<8x16x128xf32>
    %c1_i32_36 = arith.constant 1 : i32
    %150 = tpu.dynamic_rotate %1 by %c1_i32_36 dim 2 : vector<8x16x128xf32>, i32 -> vector<8x16x128xf32>
    %151 = arith.subf %1, %150 : vector<8x16x128xf32>
    %152 = vector.shape_cast %133 : vector<16x128xf32> to vector<1x16x128xf32>
    %153 = vector.broadcast %152 : vector<1x16x128xf32> to vector<8x16x128xf32>
    %154 = arith.mulf %151, %153 : vector<8x16x128xf32>
    %c127_i32_37 = arith.constant 127 : i32
    %155 = tpu.dynamic_rotate %154 by %c127_i32_37 dim 2 : vector<8x16x128xf32>, i32 -> vector<8x16x128xf32>
    %156 = arith.addf %154, %155 : vector<8x16x128xf32>
    %c1_i32_38 = arith.constant 1 : i32
    %157 = tpu.dynamic_rotate %5 by %c1_i32_38 dim 2 : vector<8x16x128xf32>, i32 -> vector<8x16x128xf32>
    %158 = arith.subf %5, %157 : vector<8x16x128xf32>
    %159 = vector.shape_cast %133 : vector<16x128xf32> to vector<1x16x128xf32>
    %160 = vector.broadcast %159 : vector<1x16x128xf32> to vector<8x16x128xf32>
    %161 = arith.mulf %158, %160 : vector<8x16x128xf32>
    %c127_i32_39 = arith.constant 127 : i32
    %162 = tpu.dynamic_rotate %161 by %c127_i32_39 dim 2 : vector<8x16x128xf32>, i32 -> vector<8x16x128xf32>
    %163 = arith.addf %161, %162 : vector<8x16x128xf32>
    %164 = math.absf %149 : vector<8x16x128xf32>
    %165 = vector.shape_cast %141 : vector<16x128xf32> to vector<1x16x128xf32>
    %166 = vector.broadcast %165 : vector<1x16x128xf32> to vector<8x16x128xf32>
    %167 = arith.mulf %166, %164 : vector<8x16x128xf32>
    %168 = vector.shape_cast %167 : vector<8x16x128xf32> to vector<1x8x16x128xf32>
    %cst_40 = arith.constant dense<0.000000e+00> : vector<1xf32>
    %169 = vector.multi_reduction <add>, %168, %cst_40 [1, 2, 3] : vector<1x8x16x128xf32> to vector<1xf32>
    %170 = vector.shape_cast %169 : vector<1xf32> to vector<1x1x1x1xf32>
    %171 = vector.extract %170[0, 0, 0, 0] : f32 from vector<1x1x1x1xf32>
    %172 = arith.addf %119, %171 : f32
    %173 = arith.mulf %156, %163 : vector<8x16x128xf32>
    %174 = math.absf %173 : vector<8x16x128xf32>
    %175 = vector.shape_cast %142 : vector<16x128xf32> to vector<1x16x128xf32>
    %176 = vector.broadcast %175 : vector<1x16x128xf32> to vector<8x16x128xf32>
    %177 = arith.mulf %176, %174 : vector<8x16x128xf32>
    %178 = vector.shape_cast %177 : vector<8x16x128xf32> to vector<1x8x16x128xf32>
    %cst_41 = arith.constant dense<0.000000e+00> : vector<1xf32>
    %179 = vector.multi_reduction <add>, %178, %cst_41 [1, 2, 3] : vector<1x8x16x128xf32> to vector<1xf32>
    %180 = vector.shape_cast %179 : vector<1xf32> to vector<1x1x1x1xf32>
    %181 = vector.extract %180[0, 0, 0, 0] : f32 from vector<1x1x1x1xf32>
    %182 = arith.addf %129, %181 : f32
    %cst_42 = arith.constant 0.000000e+00 : f32
    %183 = vector.broadcast %cst_42 : f32 to vector<1x1xf32>
    %cst_43 = arith.constant 7.62939464E-7 : f32
    %184 = arith.mulf %cst_43, %172 : f32
    %cst_44 = arith.constant 1.27156579E-6 : f32
    %185 = arith.mulf %cst_44, %182 : f32
    %186 = arith.addf %184, %185 : f32
    %187 = vector.broadcast %186 : f32 to vector<1x1xf32>
    %188 = arith.addf %183, %187 : vector<1x1xf32>
    %c0_45 = arith.constant 0 : index
    %c0_46 = arith.constant 0 : index
    %c0_47 = arith.constant 0 : index
    %189 = vector.load %arg4[%c0_45, %c0_46, %c0_47] : memref<1x1x1xf32, #tpu.memory_space<vmem>>, vector<1x1x1xf32>
    %190 = vector.shape_cast %189 : vector<1x1x1xf32> to vector<1x1xf32>
    %191 = vector.shape_cast %188 : vector<1x1xf32> to vector<1x1x1xf32>
    tpu.vector_store %arg4[%c0_45, %c0_46, %c0_47], %191 {strides = array<i32>} : memref<1x1x1xf32, #tpu.memory_space<vmem>>, vector<1x1x1xf32>,
    %c4_i32 = arith.constant 4 : i32
    %c0_i32_48 = arith.constant 0 : i32
    %192 = arith.cmpi eq, %c4_i32, %c0_i32_48 : i32
    %c1_i32_49 = arith.constant 1 : i32
    %193 = arith.select %192, %c1_i32_49, %c4_i32 : i32
    %194 = arith.remsi %arg0, %193 : i32
    %c0_i32_50 = arith.constant 0 : i32
    %195 = arith.cmpi ne, %194, %c0_i32_50 : i32
    %c0_i32_51 = arith.constant 0 : i32
    %196 = arith.cmpi slt, %194, %c0_i32_51 : i32
    %c0_i32_52 = arith.constant 0 : i32
    %197 = arith.cmpi slt, %193, %c0_i32_52 : i32
    %198 = arith.xori %196, %197 : i1
    %199 = arith.andi %198, %195 : i1
    %200 = arith.addi %194, %193 : i32
    %201 = arith.select %199, %200, %194 : i32
    %c0_i32_53 = arith.constant 0 : i32
    %202 = arith.cmpi ne, %201, %c0_i32_53 : i32
    %203 = arith.extui %202 : i1 to i32
    %c0_i32_54 = arith.constant 0 : i32
    %204 = arith.cmpi ne, %203, %c0_i32_54 : i32
    scf.if %204 {
      %cst_55 = arith.constant 5.000000e-01 : f32
      %205 = vector.broadcast %cst_55 : f32 to vector<8x16x128xf32>
      %206 = arith.mulf %205, %1 : vector<8x16x128xf32>
      %207 = math.tanh %206 : vector<8x16x128xf32>
      %cst_56 = arith.constant 5.000000e-01 : f32
      %208 = vector.broadcast %cst_56 : f32 to vector<8x16x128xf32>
      %209 = arith.mulf %208, %207 : vector<8x16x128xf32>
      %cst_57 = arith.constant 5.000000e-01 : f32
      %210 = vector.broadcast %cst_57 : f32 to vector<8x16x128xf32>
      %211 = arith.addf %209, %210 : vector<8x16x128xf32>
      %212 = arith.mulf %211, %3 : vector<8x16x128xf32>
      %213 = vector.shape_cast %212 : vector<8x16x128xf32> to vector<1x8x16x128xf32>
      %cst_58 = arith.constant dense<0.000000e+00> : vector<1xf32>
      %214 = vector.multi_reduction <add>, %213, %cst_58 [1, 2, 3] : vector<1x8x16x128xf32> to vector<1xf32>
      %215 = vector.shape_cast %214 : vector<1xf32> to vector<1x1x1x1xf32>
      %216 = vector.extract %215[0, 0, 0, 0] : f32 from vector<1x1x1x1xf32>
      %217 = arith.addf %211, %3 : vector<8x16x128xf32>
      %218 = vector.shape_cast %217 : vector<8x16x128xf32> to vector<1x8x16x128xf32>
      %cst_59 = arith.constant dense<0.000000e+00> : vector<1xf32>
      %219 = vector.multi_reduction <add>, %218, %cst_59 [1, 2, 3] : vector<1x8x16x128xf32> to vector<1xf32>
      %220 = vector.shape_cast %219 : vector<1xf32> to vector<1x1x1x1xf32>
      %221 = vector.extract %220[0, 0, 0, 0] : f32 from vector<1x1x1x1xf32>
      %cst_60 = arith.constant 2.000000e+00 : f32
      %222 = arith.mulf %cst_60, %216 : f32
      %cst_61 = arith.constant 9.99999974E-6 : f32
      %223 = arith.addf %222, %cst_61 : f32
      %cst_62 = arith.constant 9.99999974E-6 : f32
      %224 = arith.addf %221, %cst_62 : f32
      %225 = arith.divf %223, %224 : f32
      %cst_63 = arith.constant 1.000000e+00 : f32
      %226 = arith.subf %cst_63, %225 : f32
      %c0_64 = arith.constant 0 : index
      %c0_65 = arith.constant 0 : index
      %c0_66 = arith.constant 0 : index
      %227 = vector.load %arg4[%c0_64, %c0_65, %c0_66] : memref<1x1x1xf32, #tpu.memory_space<vmem>>, vector<1x1x1xf32>
      %228 = vector.shape_cast %227 : vector<1x1x1xf32> to vector<1x1xf32>
      %cst_67 = arith.constant 0.166666672 : f32
      %229 = arith.mulf %226, %cst_67 : f32
      %230 = vector.broadcast %229 : f32 to vector<1x1xf32>
      %231 = arith.addf %228, %230 : vector<1x1xf32>
      %c0_68 = arith.constant 0 : index
      %c0_69 = arith.constant 0 : index
      %c0_70 = arith.constant 0 : index
      %232 = vector.load %arg4[%c0_68, %c0_69, %c0_70] : memref<1x1x1xf32, #tpu.memory_space<vmem>>, vector<1x1x1xf32>
      %233 = vector.shape_cast %232 : vector<1x1x1xf32> to vector<1x1xf32>
      %234 = vector.shape_cast %231 : vector<1x1xf32> to vector<1x1x1xf32>
      tpu.vector_store %arg4[%c0_68, %c0_69, %c0_70], %234 {strides = array<i32>} : memref<1x1x1xf32, #tpu.memory_space<vmem>>, vector<1x1x1xf32>,
    } else {
    }
    return
  }
  func.func @transform_0(%arg0: i32) -> (i32, i32, i32, i32) {
    %c0_i32 = arith.constant 0 : i32
    %c0_i32_0 = arith.constant 0 : i32
    %c0_i32_1 = arith.constant 0 : i32
    %c0_i32_2 = arith.constant 0 : i32
    return %arg0, %c0_i32, %c0_i32_0, %c0_i32_1 : i32, i32, i32, i32
  }
  func.func @transform_1(%arg0: i32) -> (i32, i32, i32, i32) {
    %c0_i32 = arith.constant 0 : i32
    %c0_i32_0 = arith.constant 0 : i32
    %c0_i32_1 = arith.constant 0 : i32
    %c0_i32_2 = arith.constant 0 : i32
    return %arg0, %c0_i32, %c0_i32_0, %c0_i32_1 : i32, i32, i32, i32
  }
  func.func @transform_2(%arg0: i32) -> (i32, i32, i32, i32) {
    %c0_i32 = arith.constant 0 : i32
    %c0_i32_0 = arith.constant 0 : i32
    %c0_i32_1 = arith.constant 0 : i32
    %c0_i32_2 = arith.constant 0 : i32
    return %arg0, %c0_i32, %c0_i32_0, %c0_i32_1 : i32, i32, i32, i32
  }
  func.func @transform_3(%arg0: i32) -> (i32, i32, i32) {
    %c0_i32 = arith.constant 0 : i32
    %c0_i32_0 = arith.constant 0 : i32
    %c0_i32_1 = arith.constant 0 : i32
    return %arg0, %c0_i32, %c0_i32_0 : i32, i32, i32
  }
}

</mosaic_0001>

<bundles_post_ra>
// kernel: tpu_custom_call.1
= control target key start
LH: loop header
LB: loop body
LE: loop exit
PB: predicated region body
PF: predicated region fallthrough
CT: control target
= control target key end

     0   :  { %s3869_s0 = inlined_call_operand.hbm [shape: f32[8,8,16,128], index: 0, kind: input, shape index: {}]   ;;  %s3870_s1 = inlined_call_operand.hbm [shape: f32[8,8,16,128], index: 1, kind: input, shape index: {}]   ;;  %s3871_s2 = inlined_call_operand.hbm [shape: f32[8,8,16,128], index: 2, kind: input, shape index: {}]   ;;  %s3872_s3 = inlined_call_operand.vmem [shape: f32[8,1,1], index: 3, kind: output, shape index: {}]  }
   0x1   :  { %4023 = sst [smem:[#allocation121_spill]] %s3869_s0 }
   0x2   :  { %4024 = sst [smem:[#allocation122_spill]] %s3870_s1 }
   0x3   :  { %8 = vsyncpa [#allocation3], 0 }
   0x4   :  { %10 = vsyncpa [#allocation3 + $0x1], 0 }
   0x5   :  { %11 = vsyncpa [#allocation5], 0 }
   0x6   :  { %13 = vsyncpa [#allocation5 + $0x1], 0  ;;  %s2071_s12 = smov 0   ;;  %s2073_s13 = smov 0  }
   0x7   :  { %s2075_s14 = smov 0   ;;  %s2077_s15 = smov 0  }
   0x8 LB: > { %s2090_s16 = sadd.s32 4294967295, %s2040_s15   ;;  %s2093_s17 = sadd.s32 1, %s2040_s15   ;;  %s2040_s15 = sphi %s2077_s15, %s4332_s15   ;;  %s2036_s14 = sphi %s2075_s14, %s4331_s14   ;;  %s2032_s13 = sphi %s2073_s13, %s4330_s13   ;;  %s2028_s12 = sphi %s2071_s12, %s4329_s12  }
   0x9   : > { %s23_s18 = ssub.s32 %s2040_s15, %s2093_s17  ;;  %s26_s19 = sadd.s32 1, %s2036_s14 }
   0xa   : > { %p24_p0 = scmp.eq.s32.totalorder %s23_s18, 0  ;;  %p33_p1 = scmp.ne.s32.totalorder %s2036_s14, %s2032_s13 }
   0xb   : > { %p34_p2 = scmp.eq.s32.totalorder %s2040_s15, 0  ;;  %p39_p3 = scmp.ne.s32.totalorder %s2032_s13, %s2028_s12 }
   0xc   : > { %s2103_s20 = scalar_select %p24_p0, %s2036_s14, %s26_s19  }
   0xd   : > { %p35_p4 = por %p34_p2, %p33_p1  ;;  %p40_p5 = scmp.eq.s32.totalorder %s2090_s16, 0 }
   0xe   : > { %p1823_p6 = scmp.lt.s32.totalorder %s2040_s15, 8  ;;  %s141_s22 = sand.u32 1, %s2036_s14  }
   0xf   : > { %p2107_p7 = por %p40_p5, %p39_p3  ;;  %s2114_s23 = sshll.u32 %s141_s22, 7 }
  0x10   : > { %s2117_s24 = sshll.u32 %s2040_s15, 11  ;;  %p2119_p8 = pnand %p1823_p6, %p35_p4 }
  0x11   : > { %s4025_s21 = scalar_select %p2107_p7, 1, 0 }
  0x12   : > { %s162_s26 = sand.u32 1, %s2040_s15   ;;  %s4027_s1 = sld [smem:[#allocation122_spill]] }
  0x13   : > { %s166_s30 = scalar_lea.vmem [#allocation4], %s2114_s23  ;;  %s2135_s5 = scalar_lea.sflag [#allocation5], %s162_s26 }
  0x14   : > { %s173_s4 = sshll.u32 %s166_s30, 4  ;;  %p2141_p12 = pneg %p2119_p8  ;;  %s2132_s4 = int_to_ptr.vmem [resolvable:$true] %s173_s4 }
  0x18   : > { %s2128_s29 = scalar_lea.hbm %s4027_s1, %s2117_s24  ;;  %s1917_s10 = scalar_lea.hbm %s4027_s1, 16384 }
  0x19   : > { %s1912_s6 = scalar_lea.hbm %s2128_s29, 2048  ;;  %p1918_p1 = scmp.lt.u32.totalorder %s2128_s29, %s4027_s1 }
  0x1a   : > { %p1913_p11 = scmp.ne.s32.totalorder %s2128_s29, %s1912_s6  ;;  %p1919_p2 = scmp.lt.u32.totalorder %s1917_s10, %s1912_s6 }
  0x1b   : > { %p1921_p4 = scmp.lt.u32.totalorder %s1912_s6, %s2128_s29 }
  0x1c   : > { %p1915_p13 = pnand %p2141_p12, %p1913_p11  ;;  %p1920_p3 = por %p1919_p2, %p1918_p1 }
  0x1e   : > { %p1916_p0 = pneg %p1915_p13  ;;  %p1922_p5 = por %p1921_p4, %p1920_p3 }
  0x20   : > { %p1923_p6 = pnand %p1922_p5, %p1916_p0 }
  0x22   : > { %1926 = shalt.err (!%p1923_p6)
}
  0x23   : > { %s1927_s18 = scalar_lea.vmem %s2132_s4, 2048  ;;  %s2042_s19 = smov [#allocation4]  }
  0x24   : > { %p1928_p11 = scmp.ne.s32.totalorder %s2132_s4, %s1927_s18  ;;  %s1932_s26 = sshll.u32 %s2042_s19, 4  ;;  %s1933_s26 = int_to_ptr.vmem [resolvable:$false] %s1932_s26 }
  0x25   : > { %s1934_s27 = scalar_lea.vmem %s1933_s26, 4096  ;;  %p1935_p10 = scmp.lt.s32.totalorder %s2132_s4, %s1933_s26 }
  0x26   : > { %p1930_p13 = pnand %p1928_p11, %p2141_p12  ;;  %p1936_p7 = scmp.lt.s32.totalorder %s1934_s27, %s1927_s18 }
  0x28   : > { %p1931_p9 = pneg %p1930_p13  ;;  %p1937_p1 = por %p1936_p7, %p1935_p10 }
  0x2a   : > { %p1938_p2 = pnand %p1937_p1, %p1931_p9 }
  0x2c   : > { %1941 = shalt.err (!%p1938_p2)
}
  0x2d   : > { %s2043_s28 = smov 128   ;;  %s2044_s30 = smov 8  }
  0x2e   : > { %1819 = dma.hbm_to_vmem [thread:$0]  (!%p2119_p8), %s2128_s29, 2048, %s2132_s4, %s2135_s5, %s2043_s28, %s2043_s28, %s2044_s30  }
  0x2f   : > { %p4029_p7 = scmp.lt.s32.totalorder %s2040_s15, 9  ;;  %p4030_p9 = scmp.ge.s32.totalorder %s2040_s15, 1 }
  0x30   : > { %s4032_s0 = sld [smem:[#allocation121_spill]]  ;;  %s145_s11 = scalar_lea.vmem [#allocation2], %s2114_s23 }
  0x31   : > { %p2172_p10 = pnand %p4030_p9, %p4029_p7  ;;  %s152_s12 = sshll.u32 %s145_s11, 4  ;;  %s2183_s12 = int_to_ptr.vmem [resolvable:$true] %s152_s12 }
  0x32   : > { %s2189_s15 = scalar_lea.hbm %s3871_s2, %s2117_s24  ;;  %s2193_s18 = scalar_lea.sflag [#allocation3], %s141_s22 }
  0x33   : > { %s4031_s6 = scalar_select %p2172_p10, 1, 0 }
  0x36   : > { %s2180_s10 = scalar_lea.hbm %s4032_s0, %s2117_s24  ;;  %s1947_s8 = scalar_lea.hbm %s4032_s0, 16384 }
  0x37   : > { %s1942_s19 = scalar_lea.hbm %s2180_s10, 2048  ;;  %p1948_p5 = scmp.lt.u32.totalorder %s2180_s10, %s4032_s0 }
  0x38   : > { %p1943_p0 = scmp.ne.s32.totalorder %s2180_s10, %s1942_s19  ;;  %p1949_p6 = scmp.lt.u32.totalorder %s1947_s8, %s1942_s19 }
  0x39   : > { %p1951_p13 = scmp.lt.u32.totalorder %s1942_s19, %s2180_s10 }
  0x3a   : > { %p1945_p3 = pnand %p1943_p0, %p2141_p12  ;;  %p1950_p11 = por %p1949_p6, %p1948_p5 }
  0x3c   : > { %p1946_p4 = pneg %p1945_p3  ;;  %p1952_p1 = por %p1951_p13, %p1950_p11 }
  0x3e   : > { %p1953_p2 = pnand %p1952_p1, %p1946_p4 }
  0x40   : > { %1956 = shalt.err (!%p1953_p2)
}
  0x41   : > { %s1957_s22 = scalar_lea.vmem %s2183_s12, 2048  ;;  %s2045_s24 = smov [#allocation2]  }
  0x42   : > { %p1958_p7 = scmp.ne.s32.totalorder %s2183_s12, %s1957_s22  ;;  %s1962_s29 = sshll.u32 %s2045_s24, 4  ;;  %s1963_s29 = int_to_ptr.vmem [resolvable:$false] %s1962_s29 }
  0x43   : > { %s1964_s4 = scalar_lea.vmem %s1963_s29, 4096  ;;  %p1965_p3 = scmp.lt.s32.totalorder %s2183_s12, %s1963_s29 }
  0x44   : > { %p1960_p9 = pnand %p1958_p7, %p2141_p12  ;;  %p1966_p10 = scmp.lt.s32.totalorder %s1964_s4, %s1957_s22 }
  0x46   : > { %p1961_p0 = pneg %p1960_p9  ;;  %p1967_p5 = por %p1966_p10, %p1965_p3 }
  0x48   : > { %p1968_p6 = pnand %p1967_p5, %p1961_p0 }
  0x4a   : > { %1971 = shalt.err (!%p1968_p6)
}
  0x4b   : > { %1816 = dma.hbm_to_vmem [thread:$0]  (!%p2119_p8), %s2180_s10, 2048, %s2183_s12, %s2193_s18, %s2043_s28, %s2043_s28, %s2044_s30  }
  0x4c   : > { %s187_s19 = scalar_lea.vmem [#allocation6], %s2114_s23  ;;  %s1972_s27 = scalar_lea.hbm %s2189_s15, 2048 }
  0x4d   : > { %s194_s26 = sshll.u32 %s187_s19, 4  ;;  %p1973_p10 = scmp.ne.s32.totalorder %s2189_s15, %s1972_s27  ;;  %s2221_s26 = int_to_ptr.vmem [resolvable:$true] %s194_s26 }
  0x4e   : > { %s1977_s11 = scalar_lea.hbm %s3871_s2, 16384  ;;  %p1978_p13 = scmp.lt.u32.totalorder %s2189_s15, %s3871_s2 }
  0x4f   : > { %p1975_p4 = pnand %p1973_p10, %p2141_p12  ;;  %p1979_p1 = scmp.lt.u32.totalorder %s1977_s11, %s1972_s27 }
  0x50   : > { %p1981_p7 = scmp.lt.u32.totalorder %s1972_s27, %s2189_s15 }
  0x51   : > { %p1976_p11 = pneg %p1975_p4  ;;  %p1980_p2 = por %p1979_p1, %p1978_p13 }
  0x53   : > { %p1982_p9 = por %p1981_p7, %p1980_p2 }
  0x55   : > { %p1983_p0 = pnand %p1982_p9, %p1976_p11 }
  0x57   : > { %1986 = shalt.err (!%p1983_p0)
}
  0x58   : > { %s1987_s23 = scalar_lea.vmem %s2221_s26, 2048  ;;  %s2046_s10 = smov [#allocation6]  }
  0x59   : > { %p1988_p3 = scmp.ne.s32.totalorder %s2221_s26, %s1987_s23  ;;  %s1992_s12 = sshll.u32 %s2046_s10, 4  ;;  %s1993_s12 = int_to_ptr.vmem [resolvable:$false] %s1992_s12 }
  0x5a   : > { %s1994_s18 = scalar_lea.vmem %s1993_s12, 4096  ;;  %p1995_p10 = scmp.lt.s32.totalorder %s2221_s26, %s1993_s12 }
  0x5b   : > { %p1990_p5 = pnand %p1988_p3, %p2141_p12  ;;  %p1996_p4 = scmp.lt.s32.totalorder %s1994_s18, %s1987_s23 }
  0x5d   : > { %p1991_p6 = pneg %p1990_p5  ;;  %p1997_p13 = por %p1996_p4, %p1995_p10 }
  0x5f   : > { %p1998_p1 = pnand %p1997_p13, %p1991_p6 }
  0x61   : > { %2001 = shalt.err (!%p1998_p1)
}
  0x62   : > { %1822 = dma.hbm_to_vmem [thread:$0]  (!%p2119_p8), %s2189_s15, 2048, %s2221_s26, %s2135_s5, %s2043_s28, %s2043_s28, %s2044_s30  }
  0x63   : > { %p4033_p12 = scmp.ne.s32.totalorder %s4031_s6, 0 }
  0x65   : > { %206 = sbr.rel (%p4033_p12) target bundleno = 980 (0x3d4), region = 32 }
  0x6c   : > { %s208_s7 = sand.u32 1, %s2032_s13   ;;  %p4034_p11 = scmp.ne.s32.totalorder %s4025_s21, 0 }
  0x6d   : > { %s1767_s29 = sshll.u32 %s208_s7, 7  ;;  %s209_s4 = scalar_lea.sflag [#allocation3], %s208_s7 }
  0x6e   : > { %s2251_s19 = scalar_lea.vmem [#allocation2], %s1767_s29 }
  0x6f   : > { %2019 = dma.done.wait (%p4034_p11), %s209_s4, 2048  }
  0x70   : > { %2021 = vsyncadd (%p4034_p11), %s209_s4, 4294965248  ;;  %s217_s25 = sand.u32 1, %s2090_s16   ;;  %s2258_s5 = scalar_lea.vmem [#allocation4], %s1767_s29 }
  0x71   : > { %s218_s27 = scalar_lea.sflag [#allocation5], %s217_s25 }
  0x72   : > { %2023 = dma.done.wait (%p4034_p11), %s218_s27, 4096  }
  0x73   : > { %2025 = vsyncadd (%p4034_p11), %s218_s27, 4294963200  ;;  %v512_v0 = vlaneseq  ;;  %v3880_v3 = vmov 0.0   ;;  %s2278_s21 = scalar_lea.vmem [#allocation6], %s1767_s29  ;;  %v2284_v6 = vld [vmem:[%s2251_s19] sm:$0xff]  ;;  %v2048_v8 = vmov 1.0   ;;  %s2049_s28 = smov 1  }
  0x74   : > { %v2281_v5 = vld [vmem:[%s2278_s21] sm:$0xff]  ;;  %4036 = vst [vmem:[#allocation10_spill] sm:$0xff] %v2284_v6  ;;  %v2287_v7 = vld [vmem:[%s2278_s21 + $0x8] sm:$0xff]  ;;  %1118 = vrot.lane.b32.xlu0 %v2284_v6, %s2049_s28  ;;  %v645_v11 = vrot.slane %v2284_v6, 7  ;;  %v2337_v30 = vld [vmem:[%s2251_s19 + $0x10] sm:$0xff]  ;;  %s2050_s30 = smov 127  }
  0x75   : > { %v2264_v1 = vshrl.u32 %v512_v0, 7  ;;  %v2266_v2 = vand.u32 127, %v512_v0  ;;  %1230 = vrot.lane.b32.xlu1 %v2281_v5, %s2049_s28  ;;  %v757_v10 = vrot.slane %v2281_v5, 7  ;;  %v765_v12 = vrot.slane %v2287_v7, 7  ;;  %v2299_v13 = vld [vmem:[%s2251_s19 + $0x8] sm:$0xff]  ;;  %v2308_v17 = vld [vmem:[%s2258_s5] sm:$0xff] }
  0x76   : > { %4038 = vst [vmem:[#allocation12_spill] sm:$0xff] %v2299_v13  ;;  %v2302_v14 = vld [vmem:[%s2258_s5 + $0x8] sm:$0xff]  ;;  %v653_v16 = vrot.slane %v2299_v13, 7  ;;  %4040 = vst [vmem:[#allocation14_spill] sm:$0xff] %v2308_v17  ;;  %v2320_v21 = vsub.f32 %v2284_v6, %v2308_v17  ;;  %v2340_v31 = vld [vmem:[%s2251_s19 + $0x18] sm:$0xff]  ;;  %v646_v34 = vrot.slane %v2337_v30, 7 }
  0x77   : > { %vm517_vm0 = vcmp.ne.s32.totalorder %v2264_v1, 0  ;;  %vm999_vm1 = vcmp.ne.s32.totalorder %v2266_v2, 0  ;;  %vm1002_vm2 = vcmp.ne.s32.totalorder %v2266_v2, 127  ;;  %4039 = vst [vmem:[#allocation13_spill] sm:$0xff] %v2302_v14  ;;  %vm547_vm4 = vcmp.lt.s32.totalorder %v2264_v1, 1  ;;  %4041 = vst [vmem:[#allocation15_spill] sm:$0xff] %v2337_v30 }
  0x78   : > { %v2272_v4 = vsel %vm517_vm0, 1.0, %v3880_v3  ;;  %vm1003_vm3 = vmand %vm999_vm1, %vm1002_vm2  ;;  %v514_v15 = vadd.s32 8, %v2264_v1  ;;  %v773_v18 = vsel %vm547_vm4, %v757_v10, %v765_v12  ;;  %v781_v19 = vsel %vm547_vm4, %v765_v12, %v757_v10  ;;  %1120 = vrot.lane.b32.xlu0 %v2299_v13, %s2049_s28  ;;  %4042 = vst [vmem:[#allocation16_spill] sm:$0xff] %v2340_v31  ;;  %v2363_v44 = vld [vmem:[%s2278_s21 + $0x10] sm:$0xff]  ;;  %v2386_v59 = vld [vmem:[%s2278_s21 + $0x18] sm:$0xff]  ;;  %s1480_s6 = ssub.s32 0, %s2090_s16 }
  0x79   : > { %4035 = vst [vmem:[#allocation9_spill] sm:$0xff] %v2272_v4  ;;  %v2289_v9 = vsel %vm1003_vm3, 0.5, %v2048_v8  ;;  %v2316_v20 = vsub.f32 %v2299_v13, %v2302_v14  ;;  %v789_v22 = vsub.f32 %v2281_v5, %v781_v19  ;;  %v790_v23 = vsub.f32 %v2287_v7, %v773_v18  ;;  %1232 = vrot.lane.b32.xlu1 %v2287_v7, %s2049_s28  ;;  %v2376_v51 = vld [vmem:[%s2258_s5 + $0x10] sm:$0xff]  ;;  %v2407_v12 = vld [vmem:[%s2258_s5 + $0x18] sm:$0xff]  ;;  %v2732_v17 = vld [vmem:[%s2278_s21 + $0x68] sm:$0xff]  ;;  %p1479_p8 = scmp.lt.s32.totalorder %s2090_s16, 0  ;;  %s1772_s15 = smin.u32 %s2090_s16, %s1480_s6 }
  0x7a   : > { %4037 = vst [vmem:[#allocation11_spill] sm:$0xff] %v2289_v9  ;;  %v661_v24 = vsel %vm547_vm4, %v645_v11, %v653_v16  ;;  %v669_v25 = vsel %vm547_vm4, %v653_v16, %v645_v11  ;;  %v3874_v29 = vrot.slane %v2320_v21, 7  ;;  %v654_v35 = vrot.slane %v2340_v31, 7  ;;  %4043 = vst [vmem:[#allocation17_spill] sm:$0xff] %v2363_v44  ;;  %v2414_v16 = vld [vmem:[%s2251_s19 + $0x20] sm:$0xff]  ;;  %s1482_s26 = sand.u32 3, %s1772_s15  }
  0x7b   : > { %v677_v26 = vsub.f32 %v2284_v6, %v669_v25  ;;  %v678_v27 = vsub.f32 %v2299_v13, %v661_v24  ;;  %v3877_v28 = vrot.slane %v2316_v20, 7  ;;  %v805_v32 = vmul.f32 %v2272_v4, %v789_v22  ;;  %4044 = vst [vmem:[#allocation18_spill] sm:$0xff] %v2376_v51  ;;  %4046 = vst [vmem:[#allocation20_spill] sm:$0xff] %v2386_v59  ;;  %s1483_s8 = ssub.s32 0, %s1482_s26  ;;  %p261_p7 = scmp.lt.s32.totalorder %s2090_s16, 7 }
  0x7c   : > { %v829_v33 = vrot.slane %v790_v23, 1  ;;  %vm612_vm5 = vcmp.lt.s32.totalorder %v2264_v1, 7  ;;  %v662_v41 = vsel %vm547_vm4, %v646_v34, %v654_v35  ;;  %v670_v42 = vsel %vm547_vm4, %v654_v35, %v646_v34  ;;  %1006 = vrot.lane.b32.xlu0 %v2320_v21, %s2049_s28  ;;  %4049 = vst [vmem:[#allocation23_spill] sm:$0xff] %v2407_v12  ;;  %4051 = vst [vmem:[#allocation25_spill] sm:$0xff] %v2414_v16  ;;  %s4334_s8 = smov (!%p1479_p8, %s1483_s8), %s1482_s26 }
  0x7d   : > { %v693_v36 = vmul.f32 %v2272_v4, %v677_v26  ;;  %v717_v37 = vrot.slane %v678_v27, 1  ;;  %v556_v38 = vsel %vm547_vm4, %v3877_v28, %v3874_v29  ;;  %v821_v39 = vrot.slane %v805_v32, 1  ;;  %1008 = vrot.lane.b32.xlu1 %v2316_v20, %s2049_s28  ;;  %p1774_p2 = scmp.lt.s32.totalorder %s4334_s8, 0  ;;  %s1489_s9 = sadd.s32 4, %s4334_s8 }
  0x7e   : > { %v564_v40 = vsub.f32 %v2320_v21, %v556_v38  ;;  %vm524_vm6 = vcmp.ne.s32.totalorder %v514_v15, 15  ;;  %v679_v45 = vsub.f32 %v2337_v30, %v670_v42  ;;  %v680_v46 = vsub.f32 %v2340_v31, %v662_v41  ;;  %s4338_s16 = smov (!%p261_p7, %s2090_s16), 7 }
  0x7f   : > { %v709_v43 = vrot.slane %v693_v36, 1  ;;  %v837_v47 = vsel %vm612_vm5, %v821_v39, %v829_v33  ;;  %v845_v48 = vsel %vm612_vm5, %v829_v33, %v821_v39  ;;  %v758_v50 = vrot.slane %v2363_v44, 7  ;;  %s4336_s9 = smov (!%p1774_p2, %s1489_s9), %s4334_s8 }
  0x80   : > { %v2372_v49 = vmul.f32 %v2272_v4, %v564_v40  ;;  %v853_v52 = vadd.f32 %v837_v47, %v805_v32  ;;  %v854_v53 = vadd.f32 %v845_v48, %v790_v23  ;;  %v2383_v56 = vsel %vm524_vm6, 0.5, %v2048_v8  ;;  %1122 = vrot.lane.b32.xlu0 %v2337_v30, %s2049_s28  ;;  %v2424_v32 = vld [vmem:[%s2251_s19 + $0x28] sm:$0xff]  ;;  %p1775_p9 = scmp.eq.s32.totalorder %s4336_s9, 0 }
  0x81   : > { %v725_v54 = vsel %vm612_vm5, %v709_v43, %v717_v37  ;;  %v733_v55 = vsel %vm612_vm5, %v717_v37, %v709_v43  ;;  %4045 = vst [vmem:[#allocation19_spill] sm:$0xff] %v2383_v56  ;;  %v2390_v60 = vsel %vm517_vm0, 0.5, %v2048_v8  ;;  %1234 = vrot.lane.b32.xlu1 %v2363_v44, %s2049_s28  ;;  %v718_v61 = vrot.slane %v680_v46, 1  ;;  %4052 = vst [vmem:[#allocation26_spill] sm:$0xff] %v2424_v32  ;;  %v2443_v43 = vld [vmem:[%s2278_s21 + $0x20] sm:$0xff] }
  0x82   : > { %v741_v57 = vadd.f32 %v725_v54, %v693_v36  ;;  %v742_v58 = vadd.f32 %v733_v55, %v678_v27  ;;  %4047 = vst [vmem:[#allocation21_spill] sm:$0xff] %v2390_v60  ;;  %v2398_v62 = vsub.f32 %v2337_v30, %v2376_v51  ;;  %v695_v63 = vmul.f32 %v2272_v4, %v679_v45  ;;  %v2721_v51 = vld [vmem:[%s2258_s5 + $0x68] sm:$0xff] }
  0x83   : > { %v766_v0 = vrot.slane %v2386_v59, 7  ;;  %v2404_v8 = vmul.f32 %v2383_v56, %v2383_v56  ;;  %v2411_v15 = vmul.f32 %v2390_v60, %v2390_v60  ;;  %v647_v23 = vrot.slane %v2414_v16, 7  ;;  %4053 = vst [vmem:[#allocation27_spill] sm:$0xff] %v2443_v43  ;;  %4086 = vst [vmem:[#allocation60_spill] sm:$0xff] %v2721_v51 }
  0x84   : > { %v926_v10 = vmul.f32 %v853_v52, %v741_v57  ;;  %v927_v11 = vmul.f32 %v854_v53, %v742_v58  ;;  %v710_v18 = vrot.slane %v695_v63, 1  ;;  %1010 = vrot.lane.b32.xlu0 %v2398_v62, %s2049_s28  ;;  %v2432_v33 = vsub.f32 %v2340_v31, %v2407_v12  ;;  %v2453_v53 = vld [vmem:[%s2278_s21 + $0x28] sm:$0xff] }
  0x85   : > { %4048 = vst [vmem:[#allocation22_spill] sm:$0xff] %v2404_v8  ;;  %4050 = vst [vmem:[#allocation24_spill] sm:$0xff] %v2411_v15  ;;  %v774_v19 = vsel %vm547_vm4, %v758_v50, %v766_v0  ;;  %v782_v22 = vsel %vm547_vm4, %v766_v0, %v758_v50  ;;  %1124 = vrot.lane.b32.xlu1 %v2340_v31, %s2049_s28  ;;  %v655_v36 = vrot.slane %v2424_v32, 7  ;;  %v759_v50 = vrot.slane %v2443_v43, 7  ;;  %v2718_v12 = vld [vmem:[%s2251_s19 + $0x68] sm:$0xff] }
  0x86   : > { %v943_v24 = vand.u32 2147483647, %v927_v11  ;;  %v791_v25 = vsub.f32 %v2363_v44, %v782_v22  ;;  %v792_v26 = vsub.f32 %v2386_v59, %v774_v19  ;;  %v942_v27 = vand.u32 2147483647, %v926_v10  ;;  %4054 = vst [vmem:[#allocation28_spill] sm:$0xff] %v2453_v53  ;;  %4085 = vst [vmem:[#allocation59_spill] sm:$0xff] %v2718_v12 }
  0x87   : > { %v726_v34 = vsel %vm612_vm5, %v710_v18, %v718_v61  ;;  %v734_v35 = vsel %vm612_vm5, %v718_v61, %v710_v18  ;;  %v663_v45 = vsel %vm547_vm4, %v647_v23, %v655_v36  ;;  %v671_v47 = vsel %vm547_vm4, %v655_v36, %v647_v23  ;;  %v2465_v61 = vld [vmem:[%s2258_s5 + $0x20] sm:$0xff] }
  0x88   : > { %v959_v37 = vmul.f32 %v943_v24, %v2404_v8  ;;  %v743_v38 = vadd.f32 %v726_v34, %v695_v63  ;;  %v744_v39 = vadd.f32 %v734_v35, %v680_v46  ;;  %v807_v40 = vmul.f32 %v2272_v4, %v791_v25  ;;  %1236 = vrot.lane.b32.xlu0 %v2386_v59, %s2049_s28  ;;  %v2483_v34 = vld [vmem:[%s2258_s5 + $0x28] sm:$0xff] }
  0x89   : > { %v830_v41 = vrot.slane %v792_v26, 1  ;;  %v958_v42 = vmul.f32 %v942_v27, %v2411_v15  ;;  %v681_v52 = vsub.f32 %v2414_v16, %v671_v47  ;;  %v682_v46 = vsub.f32 %v2424_v32, %v663_v45  ;;  %1012 = vrot.lane.b32.xlu1 %v2432_v33, %s2049_s28  ;;  %4055 = vst [vmem:[#allocation29_spill] sm:$0xff] %v2465_v61  ;;  %v2491_v45 = vld [vmem:[%s2251_s19 + $0x38] sm:$0xff] }
  0x8a   : > { %v822_v48 = vrot.slane %v807_v40, 1  ;;  %v767_v55 = vrot.slane %v2453_v53, 7  ;;  %v2478_v24 = vsub.f32 %v2414_v16, %v2465_v61  ;;  %4056 = vst [vmem:[#allocation30_spill] sm:$0xff] %v2483_v34  ;;  %4057 = vst [vmem:[#allocation31_spill] sm:$0xff] %v2491_v45  ;;  %v2727_v14 = vsub.f32 %v2718_v12, %v2721_v51 }
  0x8b   : > { %v974_v54 = vadd.f32 %v959_v37, %v958_v42  ;;  %v719_v10 = vrot.slane %v682_v46, 1  ;;  %v697_v11 = vmul.f32 %v2272_v4, %v681_v52  ;;  %v656_v52 = vrot.slane %v2491_v45, 7 }
  0x8c   : > { %v838_v57 = vsel %vm612_vm5, %v822_v48, %v830_v41  ;;  %v846_v58 = vsel %vm612_vm5, %v830_v41, %v822_v48  ;;  %v775_v18 = vsel %vm547_vm4, %v759_v50, %v767_v55  ;;  %v783_v19 = vsel %vm547_vm4, %v767_v55, %v759_v50  ;;  %1126 = vrot.lane.b32.xlu0 %v2414_v16, %s2049_s28 }
  0x8d   : > { %v855_v63 = vadd.f32 %v838_v57, %v807_v40  ;;  %v856_v0 = vadd.f32 %v846_v58, %v792_v26  ;;  %1238 = vrot.lane.b32.xlu1 %v2443_v43, %s2049_s28  ;;  %v711_v25 = vrot.slane %v697_v11, 1  ;;  %v793_v26 = vsub.f32 %v2443_v43, %v783_v19  ;;  %v2519_v19 = vld [vmem:[%s2278_s21 + $0x38] sm:$0xff]  ;;  %4087 = vst [vmem:[#allocation61_spill] sm:$0xff] %v2727_v14 }
  0x8e   : > { %v794_v27 = vsub.f32 %v2453_v53, %v775_v18  ;;  %v2501_v50 = vsub.f32 %v2424_v32, %v2483_v34  ;;  %v2704_v34 = vld [vmem:[%s2251_s19 + $0x60] sm:$0xff]  ;;  %vm1477_vm7 = vcmask 0  }
  0x8f   : > { %v928_v22 = vmul.f32 %v855_v63, %v743_v38  ;;  %v929_v23 = vmul.f32 %v856_v0, %v744_v39  ;;  %v727_v37 = vsel %vm612_vm5, %v711_v25, %v719_v10  ;;  %v735_v38 = vsel %vm612_vm5, %v719_v10, %v711_v25  ;;  %v2509_v63 = vld [vmem:[%s2278_s21 + $0x30] sm:$0xff]  ;;  %4083 = vst [vmem:[#allocation57_spill] sm:$0xff] %v2704_v34 }
  0x90   : > { %v745_v39 = vadd.f32 %v727_v37, %v697_v11  ;;  %v746_v40 = vadd.f32 %v735_v38, %v682_v46  ;;  %v809_v41 = vmul.f32 %v2272_v4, %v793_v26  ;;  %v831_v42 = vrot.slane %v794_v27, 1  ;;  %1014 = vrot.lane.b32.xlu0 %v2478_v24, %s2049_s28  ;;  %v2505_v46 = vld [vmem:[%s2251_s19 + $0x30] sm:$0xff]  ;;  %4059 = vst [vmem:[#allocation33_spill] sm:$0xff] %v2509_v63 }
  0x91   : > { %v944_v35 = vand.u32 2147483647, %v928_v22  ;;  %v945_v36 = vand.u32 2147483647, %v929_v23  ;;  %1128 = vrot.lane.b32.xlu1 %v2424_v32, %s2049_s28  ;;  %4058 = vst [vmem:[#allocation32_spill] sm:$0xff] %v2505_v46  ;;  %v648_v57 = vrot.slane %v2505_v46, 7 }
  0x92   : > { %v823_v55 = vrot.slane %v809_v41, 1  ;;  %v760_v11 = vrot.slane %v2509_v63, 7  ;;  %v768_v25 = vrot.slane %v2519_v19, 7 }
  0x93   : > { %v960_v47 = vmul.f32 %v944_v35, %v2411_v15  ;;  %v961_v48 = vmul.f32 %v945_v36, %v2404_v8  ;;  %v672_v18 = vsel %vm547_vm4, %v656_v52, %v648_v57  ;;  %v2530_v35 = vld [vmem:[%s2258_s5 + $0x30] sm:$0xff]  ;;  %v664_v36 = vsel %vm547_vm4, %v648_v57, %v656_v52  ;;  %v2759_v15 = vld [vmem:[%s2258_s5 + $0x78] sm:$0xff] }
  0x94   : > { %v839_v0 = vsel %vm612_vm5, %v823_v55, %v831_v42  ;;  %v847_v10 = vsel %vm612_vm5, %v831_v42, %v823_v55  ;;  %1240 = vrot.lane.b32.xlu0 %v2453_v53, %s2049_s28  ;;  %v683_v26 = vsub.f32 %v2505_v46, %v672_v18  ;;  %4061 = vst [vmem:[#allocation35_spill] sm:$0xff] %v2530_v35  ;;  %v2542_v42 = vld [vmem:[%s2251_s19 + $0x48] sm:$0xff]  ;;  %v2556_v55 = vld [vmem:[%s2258_s5 + $0x38] sm:$0xff]  ;;  %4092 = vst [vmem:[#allocation66_spill] sm:$0xff] %v2759_v15 }
  0x95   : > { %v975_v58 = vadd.f32 %v974_v54, %v960_v47  ;;  %v857_v23 = vadd.f32 %v839_v0, %v809_v41  ;;  %v858_v54 = vadd.f32 %v847_v10, %v794_v27  ;;  %1016 = vrot.lane.b32.xlu1 %v2501_v50, %s2049_s28  ;;  %v2537_v38 = vsub.f32 %v2491_v45, %v664_v36  ;;  %v2564_v0 = vld [vmem:[%s2251_s19 + $0x40] sm:$0xff] }
  0x96   : > { %v776_v41 = vsel %vm547_vm4, %v760_v11, %v768_v25  ;;  %4064 = vst [vmem:[#allocation38_spill] sm:$0xff] %v2542_v42  ;;  %v2545_v47 = vmul.f32 %v2272_v4, %v683_v26  ;;  %4066 = vst [vmem:[#allocation40_spill] sm:$0xff] %v2556_v55  ;;  %v2560_v57 = vsub.f32 %v2505_v46, %v2530_v35  ;;  %v3878_v18 = vrot.slane %v2564_v0, 7 }
  0x97   : > { %v2521_v22 = vadd.f32 %v975_v58, %v961_v48  ;;  %v2534_v37 = vmul.f32 %v857_v23, %v745_v39  ;;  %v931_v27 = vmul.f32 %v858_v54, %v746_v40  ;;  %4063 = vst [vmem:[#allocation37_spill] sm:$0xff] %v2537_v38  ;;  %v784_v48 = vsel %vm547_vm4, %v768_v25, %v760_v11  ;;  %v2573_v54 = vld [vmem:[%s2278_s21 + $0x40] sm:$0xff] }
  0x98   : > { %4065 = vst [vmem:[#allocation39_spill] sm:$0xff] %v2545_v47  ;;  %v796_v52 = vsub.f32 %v2519_v19, %v776_v41  ;;  %v3879_v39 = vrot.slane %v2542_v42, 7  ;;  %1130 = vrot.lane.b32.xlu0 %v2505_v46, %s2049_s28  ;;  %v795_v58 = vsub.f32 %v2509_v63, %v784_v48  ;;  %v3875_v10 = vrot.slane %v2545_v47, 1  ;;  %4068 = vst [vmem:[#allocation42_spill] sm:$0xff] %v2573_v54 }
  0x99   : > { %4060 = vst [vmem:[#allocation34_spill] sm:$0xff] %v2521_v22  ;;  %4062 = vst [vmem:[#allocation36_spill] sm:$0xff] %v2534_v37  ;;  %v947_v40 = vand.u32 2147483647, %v931_v27  ;;  %1242 = vrot.lane.b32.xlu1 %v2509_v63, %s2049_s28  ;;  %v3876_v11 = vrot.slane %v2537_v38, 1  ;;  %v2578_v36 = vsub.f32 %v2491_v45, %v2556_v55  ;;  %v761_v27 = vrot.slane %v2573_v54, 7 }
  0x9a   : > { %v811_v25 = vmul.f32 %v2272_v4, %v795_v58  ;;  %v832_v26 = vrot.slane %v796_v52, 1  ;;  %v673_v48 = vsel %vm547_vm4, %v3879_v39, %v3878_v18  ;;  %v2745_v22 = vld [vmem:[%s2258_s5 + $0x70] sm:$0xff]  ;;  %v4137_v37 = vrot.slane %v2501_v50, 7 }
  0x9b   : > { %v2570_v23 = vmul.f32 %v947_v40, %v2404_v8  ;;  %v736_v41 = vsel %vm612_vm5, %v3876_v11, %v3875_v10  ;;  %v2594_v40 = vld [vmem:[%s2278_s21 + $0x48] sm:$0xff]  ;;  %v685_v10 = vsub.f32 %v2564_v0, %v673_v48  ;;  %4089 = vst [vmem:[#allocation63_spill] sm:$0xff] %v2745_v22  ;;  %v2756_v8 = vld [vmem:[%s2251_s19 + $0x78] sm:$0xff] }
  0x9c   : > { %4069 = vst [vmem:[#allocation43_spill] sm:$0xff] %v2594_v40  ;;  %1018 = vrot.lane.b32.xlu0 %v2560_v57, %s2049_s28  ;;  %v748_v58 = vadd.f32 %v736_v41, %v2537_v38  ;;  %v824_v29 = vrot.slane %v811_v25, 1  ;;  %v769_v11 = vrot.slane %v2594_v40, 7  ;;  %4091 = vst [vmem:[#allocation65_spill] sm:$0xff] %v2756_v8 }
  0x9d   : > { %4067 = vst [vmem:[#allocation41_spill] sm:$0xff] %v2570_v23  ;;  %1132 = vrot.lane.b32.xlu1 %v2491_v45, %s2049_s28  ;;  %v2608_v39 = vmul.f32 %v2272_v4, %v685_v10  ;;  %v2742_v23 = vld [vmem:[%s2251_s19 + $0x70] sm:$0xff] }
  0x9e   : > { %v840_v28 = vsel %vm612_vm5, %v824_v29, %v832_v26  ;;  %v848_v18 = vsel %vm612_vm5, %v832_v26, %v824_v29  ;;  %v777_v3 = vsel %vm547_vm4, %v761_v27, %v769_v11  ;;  %v785_v48 = vsel %vm547_vm4, %v769_v11, %v761_v27  ;;  %v2625_v26 = vld [vmem:[%s2258_s5 + $0x40] sm:$0xff]  ;;  %v2640_v11 = vld [vmem:[%s2258_s5 + $0x48] sm:$0xff]  ;;  %4088 = vst [vmem:[#allocation62_spill] sm:$0xff] %v2742_v23 }
  0x9f   : > { %4070 = vst [vmem:[#allocation44_spill] sm:$0xff] %v2608_v39  ;;  %v2612_v41 = vadd.f32 %v840_v28, %v811_v25  ;;  %v860_v55 = vadd.f32 %v848_v18, %v796_v52  ;;  %v798_v35 = vsub.f32 %v2594_v40, %v777_v3  ;;  %v797_v29 = vsub.f32 %v2573_v54, %v785_v48  ;;  %v2666_v48 = vld [vmem:[%s2251_s19 + $0x50] sm:$0xff] }
  0xa0   : > { %1244 = vrot.lane.b32.xlu0 %v2519_v19, %s2049_s28  ;;  %4073 = vst [vmem:[#allocation47_spill] sm:$0xff] %v2625_v26  ;;  %v2636_v3 = vsub.f32 %v2564_v0, %v2625_v26  ;;  %4075 = vst [vmem:[#allocation49_spill] sm:$0xff] %v2640_v11  ;;  %v2694_v26 = vld [vmem:[%s2278_s21 + $0x58] sm:$0xff]  ;;  %v2753_v51 = vsub.f32 %v2742_v23, %v2745_v22  ;;  %v4094_v22 = vmov 0.0  }
  0xa1   : > { %4071 = vst [vmem:[#allocation45_spill] sm:$0xff] %v2612_v41  ;;  %1020 = vrot.lane.b32.xlu1 %v2578_v36, %s2049_s28  ;;  %v2622_v10 = vmul.f32 %v860_v55, %v748_v58  ;;  %v2628_v28 = vmul.f32 %v2272_v4, %v797_v29  ;;  %v833_v52 = vrot.slane %v798_v35, 1  ;;  %v2654_v58 = vsub.f32 %v2542_v42, %v2640_v11  ;;  %v2669_v29 = vld [vmem:[%s2258_s5 + $0x50] sm:$0xff]  ;;  %v2770_v41 = vld [vmem:[%s2278_s21 + $0x78] sm:$0xff] }
  0xa2   : > { %4079 = vst [vmem:[#allocation53_spill] sm:$0xff] %v2666_v48  ;;  %4080 = vst [vmem:[#allocation54_spill] sm:$0xff] %v2669_v29 }
  0xa3   : > { %4072 = vst [vmem:[#allocation46_spill] sm:$0xff] %v2622_v10  ;;  %4074 = vst [vmem:[#allocation48_spill] sm:$0xff] %v2628_v28  ;;  %v825_v55 = vrot.slane %v2628_v28, 1 }
  0xa4   : > { %1134 = vrot.lane.b32.xlu0 %v2564_v0, %s2049_s28  ;;  %4082 = vst [vmem:[#allocation56_spill] sm:$0xff] %v2694_v26  ;;  %4090 = vst [vmem:[#allocation64_spill] sm:$0xff] %v2753_v51 }
  0xa5   : > { %1246 = vrot.lane.b32.xlu1 %v2573_v54, %s2049_s28  ;;  %v2644_v18 = vsel %vm612_vm5, %v825_v55, %v833_v52  ;;  %v849_v25 = vsel %vm612_vm5, %v833_v52, %v825_v55  ;;  %v2677_v52 = vsub.f32 %v2666_v48, %v2669_v29  ;;  %v2680_v55 = vld [vmem:[%s2251_s19 + $0x58] sm:$0xff]  ;;  %v2701_v29 = vld [vmem:[%s2278_s21 + $0x60] sm:$0xff] }
  0xa6   : > { %4076 = vst [vmem:[#allocation50_spill] sm:$0xff] %v2644_v18  ;;  %v2648_v27 = vadd.f32 %v849_v25, %v798_v35  ;;  %v2663_v35 = vld [vmem:[%s2278_s21 + $0x50] sm:$0xff]  ;;  %v2683_v25 = vld [vmem:[%s2258_s5 + $0x58] sm:$0xff]  ;;  %v2779_v18 = vsel %vm999_vm1, 1.0, %v4094_v22 }
  0xa7   : > { %4078 = vst [vmem:[#allocation52_spill] sm:$0xff] %v2663_v35  ;;  %4081 = vst [vmem:[#allocation55_spill] sm:$0xff] %v2683_v25  ;;  %v2689_v11 = vsub.f32 %v2680_v55, %v2683_v25  ;;  %v2707_v25 = vld [vmem:[%s2258_s5 + $0x60] sm:$0xff] }
  0xa8   : > { %4077 = vst [vmem:[#allocation51_spill] sm:$0xff] %v2648_v27  ;;  %1022 = vrot.lane.b32.xlu0 %v2636_v3, %s2049_s28  ;;  %4084 = vst [vmem:[#allocation58_spill] sm:$0xff] %v2707_v25  ;;  %v2715_v61 = vsub.f32 %v2704_v34, %v2707_v25  ;;  %v2739_v25 = vld [vmem:[%s2278_s21 + $0x70] sm:$0xff]  ;;  %v2765_v27 = vsub.f32 %v2756_v8, %v2759_v15 }
  0xa9   : > { %1136 = vrot.lane.b32.xlu1 %v2542_v42, %s2049_s28 }
  0xaa   : > { %4093 = vst [vmem:[#allocation67_spill] sm:$0xff] %v2765_v27 }
  0xac   : > { %1248 = vrot.lane.b32.xlu0 %v2594_v40, %s2049_s28 }
  0xad   : > { %1024 = vrot.lane.b32.xlu1 %v2654_v58, %s2049_s28 }
  0xb0   : > { %1138 = vrot.lane.b32.xlu0 %v2666_v48, %s2049_s28 }
  0xb1   : > { %1250 = vrot.lane.b32.xlu1 %v2663_v35, %s2049_s28 }
  0xb4   : > { %1026 = vrot.lane.b32.xlu0 %v2677_v52, %s2049_s28 }
  0xb5   : > { %1140 = vrot.lane.b32.xlu1 %v2680_v55, %s2049_s28 }
  0xb8   : > { %1252 = vrot.lane.b32.xlu0 %v2694_v26, %s2049_s28 }
  0xb9   : > { %1028 = vrot.lane.b32.xlu1 %v2689_v11, %s2049_s28 }
  0xbc   : > { %1142 = vrot.lane.b32.xlu0 %v2704_v34, %s2049_s28 }
  0xbd   : > { %1254 = vrot.lane.b32.xlu1 %v2701_v29, %s2049_s28 }
  0xc0   : > { %1030 = vrot.lane.b32.xlu0 %v2715_v61, %s2049_s28 }
  0xc1   : > { %1144 = vrot.lane.b32.xlu1 %v2718_v12, %s2049_s28 }
  0xc4   : > { %1256 = vrot.lane.b32.xlu0 %v2732_v17, %s2049_s28 }
  0xc5   : > { %1032 = vrot.lane.b32.xlu1 %v2727_v14, %s2049_s28 }
  0xc8   : > { %1146 = vrot.lane.b32.xlu0 %v2742_v23, %s2049_s28 }
  0xc9   : > { %1258 = vrot.lane.b32.xlu1 %v2739_v25, %s2049_s28 }
  0xcc   : > { %1034 = vrot.lane.b32.xlu0 %v2753_v51, %s2049_s28 }
  0xcd   : > { %1148 = vrot.lane.b32.xlu1 %v2756_v8, %s2049_s28 }
  0xd0   : > { %1260 = vrot.lane.b32.xlu0 %v2770_v41, %s2049_s28 }
  0xd1   : > { %1036 = vrot.lane.b32.xlu1 %v2765_v27, %s2049_s28 }
  0xe6   : > { %v1119_v47 = vpop.permute.xlu0 %1118 }
  0xe7   : > { %v1231_v28 = vpop.permute.xlu1 %1230  ;;  %v1150_v38 = vsub.f32 %v2284_v6, %v1119_v47 }
  0xe8   : > { %v1262_v15 = vsub.f32 %v2281_v5, %v1231_v28 }
  0xe9   : > { %v2784_v39 = vmul.f32 %v2779_v18, %v1150_v38 }
  0xea   : > { %v1121_v60 = vpop.permute.xlu0 %1120  ;;  %v2787_v8 = vmul.f32 %v2779_v18, %v1262_v15 }
  0xeb   : > { %4095 = vst [vmem:[#allocation68_spill] sm:$0xff] %v2784_v39  ;;  %v1233_v56 = vpop.permute.xlu1 %1232  ;;  %v1151_v2 = vsub.f32 %v2299_v13, %v1121_v60  ;;  %1182 = vrot.lane.b32.xlu0 %v2784_v39, %s2050_s30 }
  0xec   : > { %4096 = vst [vmem:[#allocation69_spill] sm:$0xff] %v2787_v8  ;;  %v1263_v23 = vsub.f32 %v2287_v7, %v1233_v56 }
  0xed   : > { %v2794_v22 = vmul.f32 %v2779_v18, %v1151_v2 }
  0xee   : > { %v2796_v28 = vpop.permute.xlu0 %1006  ;;  %v2799_v38 = vmul.f32 %v2779_v18, %v1263_v23 }
  0xef   : > { %4097 = vst [vmem:[#allocation70_spill] sm:$0xff] %v2794_v22  ;;  %v1009_v47 = vpop.permute.xlu1 %1008  ;;  %1184 = vrot.lane.b32.xlu1 %v2794_v22, %s2050_s30  ;;  %1294 = vrot.lane.b32.xlu0 %v2787_v8, %s2050_s30 }
  0xf0   : > { %4098 = vst [vmem:[#allocation71_spill] sm:$0xff] %v2799_v38 }
  0xf2   : > { %v1123_v60 = vpop.permute.xlu0 %1122 }
  0xf3   : > { %v1235_v56 = vpop.permute.xlu1 %1234  ;;  %v1152_v39 = vsub.f32 %v2337_v30, %v1123_v60  ;;  %1296 = vrot.lane.b32.xlu1 %v2799_v38, %s2050_s30 }
  0xf4   : > { %v1264_v15 = vsub.f32 %v2363_v44, %v1235_v56 }
  0xf5   : > { %v2813_v23 = vmul.f32 %v2779_v18, %v1152_v39 }
  0xf6   : > { %v2810_v2 = vmul.f32 %v2779_v18, %v1264_v15  ;;  %v2815_v22 = vpop.permute.xlu0 %1010 }
  0xf7   : > { %4100 = vst [vmem:[#allocation73_spill] sm:$0xff] %v2813_v23  ;;  %v1125_v12 = vpop.permute.xlu1 %1124  ;;  %1186 = vrot.lane.b32.xlu0 %v2813_v23, %s2050_s30 }
  0xf8   : > { %4099 = vst [vmem:[#allocation72_spill] sm:$0xff] %v2810_v2  ;;  %v1153_v8 = vsub.f32 %v2340_v31, %v1125_v12  ;;  %1298 = vrot.lane.b32.xlu1 %v2810_v2, %s2050_s30 }
  0xfa   : > { %v2823_v56 = vmul.f32 %v2779_v18, %v1153_v8  ;;  %v1237_v15 = vpop.permute.xlu0 %1236 }
  0xfb   : > { %v2825_v60 = vpop.permute.xlu1 %1012  ;;  %v1265_v39 = vsub.f32 %v2386_v59, %v1237_v15 }
  0xfc   : > { %4101 = vst [vmem:[#allocation74_spill] sm:$0xff] %v2823_v56  ;;  %1188 = vrot.lane.b32.xlu1 %v2823_v56, %s2050_s30  ;;  %v443_v56 = vsub.f32 %v2424_v32, %v2299_v13 }
  0xfd   : > { %v2831_v38 = vmul.f32 %v2779_v18, %v1265_v39  ;;  %v455_v39 = vsub.f32 %v2453_v53, %v2287_v7  ;;  %v454_v7 = vsub.f32 %v2443_v43, %v2281_v5  ;;  %v770_v5 = vrot.slane %v2694_v26, 7 }
  0xfe   : > { %v1127_v34 = vpop.permute.xlu0 %1126 }
  0xff   : > { %4102 = vst [vmem:[#allocation75_spill] sm:$0xff] %v2831_v38  ;;  %v1239_v12 = vpop.permute.xlu1 %1238  ;;  %v1154_v23 = vsub.f32 %v2414_v16, %v1127_v34  ;;  %1300 = vrot.lane.b32.xlu0 %v2831_v38, %s2050_s30  ;;  %v445_v34 = vsub.f32 %v2491_v45, %v2340_v31 }
 0x100   : > { %v1266_v2 = vsub.f32 %v2443_v43, %v1239_v12  ;;  %v457_v12 = vsub.f32 %v2519_v19, %v2386_v59  ;;  %v1039_v59 = vsub.f32 %v2316_v20, %v1009_v47 }
 0x101   : > { %v2841_v15 = vmul.f32 %v2779_v18, %v1154_v23  ;;  %v442_v23 = vsub.f32 %v2414_v16, %v2284_v6 }
 0x102   : > { %v2838_v8 = vmul.f32 %v2779_v18, %v1266_v2  ;;  %v2847_v51 = vpop.permute.xlu0 %1014  ;;  %v2873_v16 = vmul.f32 %v457_v12, %v445_v34  ;;  %v2888_v12 = vmul.f32 %v2779_v18, %v1039_v59 }
 0x103   : > { %4104 = vst [vmem:[#allocation77_spill] sm:$0xff] %v2841_v15  ;;  %v1129_v27 = vpop.permute.xlu1 %1128  ;;  %1190 = vrot.lane.b32.xlu0 %v2841_v15, %s2050_s30  ;;  %v762_v15 = vrot.slane %v2663_v35, 7 }
 0x104   : > { %4103 = vst [vmem:[#allocation76_spill] sm:$0xff] %v2838_v8  ;;  %v1155_v2 = vsub.f32 %v2424_v32, %v1129_v27  ;;  %1302 = vrot.lane.b32.xlu1 %v2838_v8, %s2050_s30  ;;  %v2869_v8 = vmul.f32 %v455_v39, %v443_v56  ;;  %4107 = vst [vmem:[#allocation80_spill] sm:$0xff] %v2873_v16  ;;  %v1038_v32 = vsub.f32 %v2320_v21, %v2796_v28 }
 0x105   : > { %v778_v34 = vsel %vm547_vm4, %v762_v15, %v770_v5  ;;  %4109 = vst [vmem:[#allocation82_spill] sm:$0xff] %v2888_v12  ;;  %v2922_v6 = vsel %vm547_vm4, %v770_v5, %v762_v15  ;;  %v2962_v56 = vmul.f32 %v2289_v9, %v2289_v9  ;;  %v4122_v5 = vrot.slane %v2320_v21, 7 }
 0x106   : > { %v2866_v27 = vmul.f32 %v2779_v18, %v1155_v2  ;;  %4106 = vst [vmem:[#allocation79_spill] sm:$0xff] %v2869_v8  ;;  %v1241_v13 = vpop.permute.xlu0 %1240  ;;  %v2880_v2 = vmul.f32 %v454_v7, %v442_v23  ;;  %4114 = vst [vmem:[#allocation85_spill] sm:$0xff] %v2922_v6  ;;  %v2925_v39 = vsub.f32 %v2694_v26, %v778_v34  ;;  %v4138_v6 = vrot.slane %v2478_v24, 7 }
 0x107   : > { %v1017_v14 = vpop.permute.xlu1 %1016  ;;  %v1267_v47 = vsub.f32 %v2453_v53, %v1241_v13  ;;  %v1041_v13 = vsub.f32 %v2432_v33, %v2825_v60  ;;  %v4111_v60 = vrot.slane %v2666_v48, 7  ;;  %v1042_v34 = vsub.f32 %v2478_v24, %v2847_v51  ;;  %4120 = vst [vmem:[#allocation91_spill] sm:$0xff] %v2962_v56 }
 0x108   : > { %4105 = vst [vmem:[#allocation78_spill] sm:$0xff] %v2866_v27  ;;  %1192 = vrot.lane.b32.xlu1 %v2866_v27, %s2050_s30  ;;  %4108 = vst [vmem:[#allocation81_spill] sm:$0xff] %v2880_v2  ;;  %v1043_v59 = vsub.f32 %v2501_v50, %v1017_v14  ;;  %v2933_v14 = vmul.f32 %v2779_v18, %v1038_v32 }
 0x109   : > { %v2895_v7 = vmul.f32 %v2779_v18, %v1267_v47  ;;  %v4112_v47 = vrot.slane %v2680_v55, 7  ;;  %4115 = vst [vmem:[#allocation86_spill] sm:$0xff] %v2925_v39  ;;  %v2936_v28 = vmul.f32 %v2779_v18, %v1041_v13  ;;  %v4121_v13 = vrot.slane %v2316_v20, 7 }
 0x10a   : > { %v1131_v31 = vpop.permute.xlu0 %1130  ;;  %4116 = vst [vmem:[#allocation87_spill] sm:$0xff] %v2933_v14  ;;  %v2979_v9 = vmul.f32 %v2779_v18, %v1042_v34  ;;  %v542_v39 = vrot.slane %v2578_v36, 7 }
 0x10b   : > { %4110 = vst [vmem:[#allocation83_spill] sm:$0xff] %v2895_v7  ;;  %v1243_v38 = vpop.permute.xlu1 %1242  ;;  %v2911_v23 = vsel %vm547_vm4, %v4112_v47, %v4111_v60  ;;  %1304 = vrot.lane.b32.xlu0 %v2895_v7, %s2050_s30  ;;  %v1040_v60 = vsub.f32 %v2398_v62, %v2815_v22  ;;  %4117 = vst [vmem:[#allocation88_spill] sm:$0xff] %v2936_v28  ;;  %v2949_v7 = vmul.f32 %v2779_v18, %v1043_v59 }
 0x10c   : > { %4113 = vst [vmem:[#allocation84_spill] sm:$0xff] %v2911_v23  ;;  %1072 = vrot.lane.b32.xlu1 %v2888_v12, %s2050_s30  ;;  %v1268_v22 = vsub.f32 %v2509_v63, %v1243_v38  ;;  %v1156_v15 = vsub.f32 %v2505_v46, %v1131_v31  ;;  %v548_v51 = vsel %vm547_vm4, %v4122_v5, %v4121_v13  ;;  %4125 = vst [vmem:[#allocation92_spill] sm:$0xff] %v2979_v9 }
 0x10d   : > { %4118 = vst [vmem:[#allocation89_spill] sm:$0xff] %v2949_v7  ;;  %v2957_v38 = vmul.f32 %v2779_v18, %v1040_v60  ;;  %v4123_v60 = vrot.slane %v2398_v62, 7 }
 0x10e   : > { %v1019_v47 = vpop.permute.xlu0 %1018 }
 0x10f   : > { %v1133_v12 = vpop.permute.xlu1 %1132  ;;  %1070 = vrot.lane.b32.xlu0 %v2933_v14, %s2050_s30  ;;  %4119 = vst [vmem:[#allocation90_spill] sm:$0xff] %v2957_v38  ;;  %v1044_v32 = vsub.f32 %v2560_v57, %v1019_v47  ;;  %v565_v14 = vsub.f32 %v2316_v20, %v548_v51  ;;  %v4128_v13 = vmov %v4123_v60 }
 0x110   : > { %1076 = vrot.lane.b32.xlu1 %v2936_v28, %s2050_s30  ;;  %v1157_v59 = vsub.f32 %v2491_v45, %v1133_v12  ;;  %v4124_v28 = vrot.slane %v2432_v33, 7  ;;  %v2982_v12 = vmul.f32 %v2779_v18, %v1268_v22  ;;  %v4127_v22 = vrot.slane %v2432_v33, 7 }
 0x112   : > { %v557_v31 = vsel %vm547_vm4, %v4124_v28, %v4123_v60  ;;  %4126 = vst [vmem:[#allocation93_spill] sm:$0xff] %v2982_v12  ;;  %v1245_v45 = vpop.permute.xlu0 %1244  ;;  %v549_v51 = vsel %vm547_vm4, %v4128_v13, %v4127_v22  ;;  %v3000_v60 = vmul.f32 %v2779_v18, %v1156_v15  ;;  %v4133_v22 = vrot.slane %v2478_v24, 7 }
 0x113   : > { %v1021_v47 = vpop.permute.xlu1 %1020  ;;  %v566_v27 = vsub.f32 %v2398_v62, %v557_v31  ;;  %1074 = vrot.lane.b32.xlu0 %v2957_v38, %s2050_s30  ;;  %v1269_v34 = vsub.f32 %v2519_v19, %v1245_v45  ;;  %v3003_v31 = vsub.f32 %v2432_v33, %v549_v51  ;;  %v3015_v19 = vmul.f32 %v2779_v18, %v1044_v32 }
 0x114   : > { %1080 = vrot.lane.b32.xlu1 %v2949_v7, %s2050_s30  ;;  %v1045_v28 = vsub.f32 %v2578_v36, %v1021_v47  ;;  %4129 = vst [vmem:[#allocation94_spill] sm:$0xff] %v3000_v60  ;;  %v604_v7 = vrot.slane %v565_v14, 1  ;;  %v3009_v47 = vmul.f32 %v2779_v18, %v1157_v59  ;;  %v4134_v15 = vrot.slane %v2501_v50, 7 }
 0x115   : > { %v3006_v5 = vmul.f32 %v2272_v4, %v566_v27  ;;  %4132 = vst [vmem:[#allocation97_spill] sm:$0xff] %v3015_v19  ;;  %v605_v10 = vrot.slane %v3003_v31, 1 }
 0x116   : > { %4130 = vst [vmem:[#allocation95_spill] sm:$0xff] %v3009_v47  ;;  %v3012_v45 = vmul.f32 %v2779_v18, %v1045_v28  ;;  %v558_v13 = vsel %vm547_vm4, %v4134_v15, %v4133_v22  ;;  %v1135_v27 = vpop.permute.xlu0 %1134  ;;  %v4135_v28 = vrot.slane %v2372_v49, 1  ;;  %v3036_v15 = vmul.f32 %v2779_v18, %v1269_v34 }
 0x117   : > { %v1247_v51 = vpop.permute.xlu1 %1246  ;;  %v568_v38 = vsub.f32 %v2478_v24, %v558_v13  ;;  %v597_v59 = vrot.slane %v3006_v5, 1  ;;  %1078 = vrot.lane.b32.xlu0 %v2979_v9, %s2050_s30  ;;  %v534_v13 = vrot.slane %v2560_v57, 7  ;;  %v4139_v34 = vrot.slane %v2372_v49, 1 }
 0x118   : > { %4131 = vst [vmem:[#allocation96_spill] sm:$0xff] %v3012_v45  ;;  %v613_v32 = vsel %vm612_vm5, %v4135_v28, %v604_v7  ;;  %1306 = vrot.lane.b32.xlu1 %v2982_v12, %s2050_s30  ;;  %v1270_v22 = vsub.f32 %v2573_v54, %v1247_v51  ;;  %4136 = vst [vmem:[#allocation98_spill] sm:$0xff] %v3036_v15  ;;  %v550_v28 = vsel %vm547_vm4, %v4138_v6, %v4137_v37 }
 0x119   : > { %v3047_v12 = vmul.f32 %v2272_v4, %v568_v38  ;;  %v3051_v51 = vsel %vm612_vm5, %v597_v59, %v605_v10  ;;  %v621_v9 = vsel %vm612_vm5, %v604_v7, %v4139_v34  ;;  %v1158_v23 = vsub.f32 %v2564_v0, %v1135_v27 }
 0x11a   : > { %v3058_v56 = vmul.f32 %v2779_v18, %v1270_v22  ;;  %v559_v6 = vsel %vm547_vm4, %v542_v39, %v534_v13  ;;  %v3064_v37 = vsub.f32 %v2501_v50, %v550_v28  ;;  %v1023_v16 = vpop.permute.xlu0 %1022  ;;  %v3070_v7 = vsel %vm612_vm5, %v605_v10, %v597_v59 }
 0x11b   : > { %v1137_v38 = vpop.permute.xlu1 %1136  ;;  %v570_v8 = vsub.f32 %v2560_v57, %v559_v6  ;;  %v3073_v22 = vadd.f32 %v613_v32, %v2372_v49  ;;  %1194 = vrot.lane.b32.xlu0 %v3000_v60, %s2050_s30  ;;  %v1046_v28 = vsub.f32 %v2636_v3, %v1023_v16  ;;  %v535_v34 = vrot.slane %v2636_v3, 7 }
 0x11c   : > { %4140 = vst [vmem:[#allocation99_spill] sm:$0xff] %v3058_v56  ;;  %1196 = vrot.lane.b32.xlu1 %v3009_v47, %s2050_s30  ;;  %v1159_v27 = vsub.f32 %v2542_v42, %v1137_v38  ;;  %v543_v6 = vrot.slane %v2654_v58, 7  ;;  %v551_v10 = vsel %vm547_vm4, %v534_v13, %v542_v39  ;;  %v3983_v59 = vrot.slane %v3064_v37, 1 }
 0x11d   : > { %v3086_v49 = vmul.f32 %v2272_v4, %v570_v8  ;;  %v3089_v32 = vadd.f32 %v621_v9, %v565_v14  ;;  %v3095_v38 = vmul.f32 %v2779_v18, %v1158_v23  ;;  %v396_v16 = vsub.f32 %v2478_v24, %v2320_v21 }
 0x11e   : > { %v3092_v53 = vmul.f32 %v2779_v18, %v1159_v27  ;;  %v397_v47 = vsub.f32 %v2501_v50, %v2316_v20  ;;  %v3102_v8 = vmul.f32 %v2779_v18, %v1046_v28  ;;  %v1249_v13 = vpop.permute.xlu0 %1248  ;;  %v3106_v9 = vsel %vm547_vm4, %v543_v6, %v535_v34 }
 0x11f   : > { %4142 = vst [vmem:[#allocation101_spill] sm:$0xff] %v3095_v38  ;;  %v1025_v39 = vpop.permute.xlu1 %1024  ;;  %v3109_v14 = vsub.f32 %v2578_v36, %v551_v10  ;;  %v4144_v23 = vrot.slane %v3047_v12, 1  ;;  %1082 = vrot.lane.b32.xlu0 %v3015_v19, %s2050_s30  ;;  %v1271_v60 = vsub.f32 %v2594_v40, %v1249_v13  ;;  %v398_v10 = vsub.f32 %v2560_v57, %v2398_v62 }
 0x120   : > { %4141 = vst [vmem:[#allocation100_spill] sm:$0xff] %v3092_v53  ;;  %4143 = vst [vmem:[#allocation102_spill] sm:$0xff] %v3102_v8  ;;  %1084 = vrot.lane.b32.xlu1 %v3012_v45, %s2050_s30  ;;  %v1047_v28 = vsub.f32 %v2654_v58, %v1025_v39  ;;  %v408_v42 = vand.u32 2147483647, %v396_v16  ;;  %v409_v43 = vand.u32 2147483647, %v397_v47  ;;  %v399_v19 = vsub.f32 %v2578_v36, %v2432_v33 }
 0x121   : > { %v3117_v27 = vsel %vm612_vm5, %v4144_v23, %v3983_v59  ;;  %v536_v54 = vrot.slane %v2677_v52, 7  ;;  %v544_v23 = vrot.slane %v2689_v11, 7  ;;  %v410_v39 = vand.u32 2147483647, %v398_v10  ;;  %v4147_v59 = vld [vmem:[#allocation61_spill] sm:$0xff] }
 0x122   : > { %v3131_v45 = vmul.f32 %v2779_v18, %v1047_v28  ;;  %v552_v13 = vsel %vm547_vm4, %v535_v34, %v543_v6  ;;  %v3138_v16 = vmul.f32 %v2779_v18, %v1271_v60  ;;  %v1139_v47 = vpop.permute.xlu0 %1138  ;;  %v420_v46 = vadd.f32 %v409_v43, %v408_v42 }
 0x123   : > { %v1251_v63 = vpop.permute.xlu1 %1250  ;;  %v3142_v40 = vsel %vm547_vm4, %v544_v23, %v536_v54  ;;  %1308 = vrot.lane.b32.xlu0 %v3036_v15, %s2050_s30  ;;  %v1160_v60 = vsub.f32 %v2666_v48, %v1139_v47  ;;  %v400_v43 = vsub.f32 %v2636_v3, %v2478_v24  ;;  %v411_v42 = vand.u32 2147483647, %v399_v19 }
 0x124   : > { %4145 = vst [vmem:[#allocation103_spill] sm:$0xff] %v3131_v45  ;;  %4146 = vst [vmem:[#allocation104_spill] sm:$0xff] %v3138_v16  ;;  %1310 = vrot.lane.b32.xlu1 %v3058_v56, %s2050_s30  ;;  %v1272_v34 = vsub.f32 %v2663_v35, %v1251_v63  ;;  %v421_v6 = vadd.f32 %v420_v46, %v410_v39  ;;  %v537_v10 = vrot.slane %v2715_v61, 7  ;;  %v545_v2 = vrot.slane %v4147_v59, 7  ;;  %v4151_v35 = vld [vmem:[#allocation67_spill] sm:$0xff] }
 0x125   : > { %v3157_v28 = vsub.f32 %v2654_v58, %v552_v13  ;;  %v401_v63 = vsub.f32 %v2654_v58, %v2501_v50  ;;  %v412_v15 = vand.u32 2147483647, %v400_v43  ;;  %v553_v47 = vsel %vm547_vm4, %v536_v54, %v544_v23 }
 0x126   : > { %v3160_v56 = vmul.f32 %v2779_v18, %v1272_v34  ;;  %v3167_v46 = vmul.f32 %v2779_v18, %v1160_v60  ;;  %v1027_v19 = vpop.permute.xlu0 %1026  ;;  %v422_v39 = vadd.f32 %v421_v6, %v411_v42  ;;  %v3171_v13 = vsel %vm547_vm4, %v545_v2, %v537_v10  ;;  %v4150_v42 = vld [vmem:[#allocation64_spill] sm:$0xff] }
 0x127   : > { %v1141_v24 = vpop.permute.xlu1 %1140  ;;  %1198 = vrot.lane.b32.xlu0 %v3095_v38, %s2050_s30  ;;  %v1048_v54 = vsub.f32 %v2677_v52, %v1027_v19  ;;  %v402_v23 = vsub.f32 %v2677_v52, %v2560_v57  ;;  %v413_v60 = vand.u32 2147483647, %v401_v63  ;;  %v4001_v6 = vrot.slane %v4150_v42, 7 }
 0x128   : > { %4148 = vst [vmem:[#allocation61_spill] sm:$0xff] %v3160_v56  ;;  %4149 = vst [vmem:[#allocation105_spill] sm:$0xff] %v3167_v46  ;;  %1200 = vrot.lane.b32.xlu1 %v3092_v53, %s2050_s30  ;;  %v1161_v50 = vsub.f32 %v2680_v55, %v1141_v24  ;;  %v423_v43 = vadd.f32 %v422_v39, %v412_v15  ;;  %v3186_v34 = vsub.f32 %v2689_v11, %v553_v47 }
 0x129   : > { %v328_v24 = vsub.f32 %v2398_v62, %v2320_v21  ;;  %v329_v19 = vsub.f32 %v2432_v33, %v2316_v20  ;;  %v3197_v57 = vsel %vm547_vm4, %v537_v10, %v545_v2  ;;  %v3200_v63 = vmul.f32 %v2779_v18, %v1048_v54  ;;  %v1862_v2 = vld [vmem:[%s2251_s19] sm:$0xff]  ;;  %v4155_v54 = vld [vmem:[#allocation12_spill] sm:$0xff] }
 0x12a   : > { %v3189_v53 = vmul.f32 %v2779_v18, %v1161_v50  ;;  %v1253_v47 = vpop.permute.xlu0 %1252  ;;  %v403_v39 = vsub.f32 %v2689_v11, %v2578_v36  ;;  %v414_v50 = vand.u32 2147483647, %v402_v23  ;;  %v424_v48 = vadd.f32 %v423_v43, %v413_v60  ;;  %v4156_v23 = vld [vmem:[#allocation16_spill] sm:$0xff]  ;;  %v1863_v43 = vld [vmem:[%s2278_s21] sm:$0xff] }
 0x12b   : > { %v1029_v15 = vpop.permute.xlu1 %1028  ;;  %4153 = vst [vmem:[#allocation67_spill] sm:$0xff] %v3200_v63  ;;  %1086 = vrot.lane.b32.xlu0 %v3102_v8, %s2050_s30  ;;  %v1273_v21 = vsub.f32 %v2694_v26, %v1253_v47  ;;  %v340_v62 = vand.u32 2147483647, %v328_v24  ;;  %v4154_v33 = vrot.slane %v4151_v35, 7  ;;  %v332_v10 = vsub.f32 %v2337_v30, %v1862_v2  ;;  %v4157_v47 = vld [vmem:[#allocation20_spill] sm:$0xff] }
 0x12c   : > { %4152 = vst [vmem:[#allocation64_spill] sm:$0xff] %v3189_v53  ;;  %1088 = vrot.lane.b32.xlu1 %v3131_v45, %s2050_s30  ;;  %v1049_v20 = vsub.f32 %v2689_v11, %v1029_v15  ;;  %v333_v60 = vsub.f32 %v4156_v23, %v4155_v54  ;;  %v336_v15 = vsub.f32 %v2363_v44, %v1863_v43  ;;  %v1864_v45 = vld [vmem:[%s2278_s21 + $0x8] sm:$0xff] }
 0x12d   : > { %v3216_v36 = vsel %vm547_vm4, %v4154_v33, %v4001_v6  ;;  %v337_v24 = vsub.f32 %v4157_v47, %v1864_v45  ;;  %v3230_v38 = vmul.f32 %v2779_v18, %v1273_v21  ;;  %v341_v33 = vand.u32 2147483647, %v329_v19 }
 0x12e   : > { %v3227_v8 = vmul.f32 %v2779_v18, %v1049_v20  ;;  %v330_v6 = vsub.f32 %v4150_v42, %v2715_v61  ;;  %v1143_v30 = vpop.permute.xlu0 %1142  ;;  %v331_v54 = vsub.f32 %v4151_v35, %v4147_v59  ;;  %v366_v23 = vmul.f32 %v336_v15, %v332_v10  ;;  %v4160_v20 = vld [vmem:[#allocation57_spill] sm:$0xff] }
 0x12f   : > { %4159 = vst [vmem:[#allocation106_spill] sm:$0xff] %v3230_v38  ;;  %v1255_v2 = vpop.permute.xlu1 %1254  ;;  %v367_v43 = vmul.f32 %v337_v24, %v333_v60  ;;  %v404_v45 = vsub.f32 %v2715_v61, %v2636_v3  ;;  %1312 = vrot.lane.b32.xlu0 %v3138_v16, %s2050_s30  ;;  %v1162_v21 = vsub.f32 %v4160_v20, %v1143_v30 }
 0x130   : > { %4158 = vst [vmem:[#allocation20_spill] sm:$0xff] %v3227_v8  ;;  %1314 = vrot.lane.b32.xlu1 %v3160_v56, %s2050_s30  ;;  %v1274_v19 = vsub.f32 %v2701_v29, %v1255_v2  ;;  %v352_v47 = vand.u32 2147483647, %v330_v6  ;;  %v405_v44 = vsub.f32 %v4147_v59, %v2654_v58  ;;  %v353_v26 = vand.u32 2147483647, %v331_v54 }
 0x131   : > { %v368_v10 = vand.u32 2147483647, %v366_v23  ;;  %v369_v60 = vand.u32 2147483647, %v367_v43  ;;  %v406_v15 = vsub.f32 %v4150_v42, %v2677_v52  ;;  %v3252_v56 = vmul.f32 %v2779_v18, %v1162_v21 }
 0x132   : > { %v3249_v24 = vmul.f32 %v2779_v18, %v1274_v19  ;;  %v3254_v16 = vadd.f32 %v341_v33, %v340_v62  ;;  %v407_v30 = vsub.f32 %v4151_v35, %v2689_v11  ;;  %v1031_v2 = vpop.permute.xlu0 %1030  ;;  %v3258_v58 = vadd.f32 %v353_v26, %v352_v47  ;;  %v4166_v19 = vld [vmem:[#allocation59_spill] sm:$0xff]  ;;  %v4167_v26 = vld [vmem:[#allocation62_spill] sm:$0xff] }
 0x133   : > { %4162 = vst [vmem:[#allocation108_spill] sm:$0xff] %v3252_v56  ;;  %v1145_v6 = vpop.permute.xlu1 %1144  ;;  %v3260_v54 = vadd.f32 %v369_v60, %v368_v10  ;;  %v415_v23 = vand.u32 2147483647, %v403_v39  ;;  %v416_v43 = vand.u32 2147483647, %v404_v45  ;;  %1202 = vrot.lane.b32.xlu0 %v3167_v46, %s2050_s30  ;;  %v1050_v33 = vsub.f32 %v2715_v61, %v1031_v2  ;;  %v4168_v10 = vld [vmem:[#allocation65_spill] sm:$0xff] }
 0x134   : > { %4161 = vst [vmem:[#allocation107_spill] sm:$0xff] %v3249_v24  ;;  %4163 = vst [vmem:[#allocation109_spill] sm:$0xff] %v3254_v16  ;;  %1204 = vrot.lane.b32.xlu1 %v3189_v53, %s2050_s30  ;;  %v1163_v62 = vsub.f32 %v4166_v19, %v1145_v6  ;;  %v417_v21 = vand.u32 2147483647, %v405_v44  ;;  %v418_v11 = vand.u32 2147483647, %v406_v15  ;;  %v425_v16 = vadd.f32 %v424_v48, %v414_v50 }
 0x135   : > { %4164 = vst [vmem:[#allocation110_spill] sm:$0xff] %v3258_v58  ;;  %4165 = vst [vmem:[#allocation111_spill] sm:$0xff] %v3260_v54  ;;  %v334_v47 = vsub.f32 %v4167_v26, %v4160_v20  ;;  %v335_v39 = vsub.f32 %v4168_v10, %v4166_v19  ;;  %v338_v45 = vsub.f32 %v2739_v25, %v2701_v29  ;;  %v4170_v48 = vrot.slane %v4151_v35, 7 }
 0x136   : > { %v3275_v60 = vmul.f32 %v2779_v18, %v1163_v62  ;;  %v3278_v53 = vmul.f32 %v2779_v18, %v1050_v33  ;;  %v339_v44 = vsub.f32 %v2770_v41, %v2732_v17  ;;  %v4171_v50 = vrot.slane %v4150_v42, 7  ;;  %v1257_v2 = vpop.permute.xlu0 %1256 }
 0x137   : > { %v1033_v6 = vpop.permute.xlu1 %1032  ;;  %v426_v46 = vadd.f32 %v425_v16, %v415_v23  ;;  %v380_v54 = vmul.f32 %v338_v45, %v334_v47  ;;  %v576_v62 = vsub.f32 %v2715_v61, %v3171_v13  ;;  %v3292_v33 = vsub.f32 %v4147_v59, %v3197_v57  ;;  %1090 = vrot.lane.b32.xlu0 %v3200_v63, %s2050_s30 }
 0x138   : > { %4169 = vst [vmem:[#allocation112_spill] sm:$0xff] %v3275_v60  ;;  %v555_v15 = vsel %vm547_vm4, %v4171_v50, %v4170_v48  ;;  %1092 = vrot.lane.b32.xlu1 %v3227_v8, %s2050_s30  ;;  %v1051_v58 = vsub.f32 %v4147_v59, %v1033_v6  ;;  %v1275_v48 = vsub.f32 %v2732_v17, %v1257_v2  ;;  %v3300_v50 = vand.u32 2147483647, %v407_v30 }
 0x139   : > { %v381_v16 = vmul.f32 %v339_v44, %v335_v39  ;;  %v427_v23 = vadd.f32 %v426_v46, %v416_v43  ;;  %v382_v47 = vand.u32 2147483647, %v380_v54  ;;  %v578_v61 = vsub.f32 %v4150_v42, %v3216_v36 }
 0x13a   : > { %4172 = vst [vmem:[#allocation113_spill] sm:$0xff] %v3300_v50  ;;  %v607_v13 = vrot.slane %v3109_v14, 1  ;;  %v3306_v57 = vmul.f32 %v2779_v18, %v1051_v58  ;;  %v3309_v8 = vsub.f32 %v4151_v35, %v555_v15  ;;  %v4173_v59 = vsub.f32 %v2636_v3, %v3106_v9  ;;  %v1147_v46 = vpop.permute.xlu0 %1146 }
 0x13b   : > { %v383_v45 = vand.u32 2147483647, %v381_v16  ;;  %v1259_v39 = vpop.permute.xlu1 %1258  ;;  %v428_v54 = vadd.f32 %v427_v23, %v417_v21  ;;  %v4174_v36 = vsub.f32 %v2677_v52, %v3142_v40  ;;  %v592_v58 = vmul.f32 %v2272_v4, %v576_v62  ;;  %1316 = vrot.lane.b32.xlu0 %v3230_v38, %s2050_s30 }
 0x13c   : > { %v588_v30 = vmul.f32 %v2272_v4, %v4173_v59  ;;  %v594_v44 = vmul.f32 %v2272_v4, %v578_v61  ;;  %1318 = vrot.lane.b32.xlu1 %v3249_v24, %s2050_s30  ;;  %v1276_v3 = vsub.f32 %v2739_v25, %v1259_v39  ;;  %v3327_v9 = vmul.f32 %v2779_v18, %v1275_v48 }
 0x13d   : > { %v590_v43 = vmul.f32 %v2272_v4, %v4174_v36  ;;  %v1164_v21 = vsub.f32 %v4167_v26, %v1147_v46  ;;  %v3330_v52 = vadd.f32 %v383_v45, %v382_v47  ;;  %v602_v6 = vrot.slane %v592_v58, 1 }
 0x13e   : > { %v600_v40 = vrot.slane %v588_v30, 1  ;;  %v603_v2 = vrot.slane %v594_v44, 1  ;;  %v3333_v62 = vmul.f32 %v2779_v18, %v1276_v3  ;;  %v3335_v16 = vadd.f32 %v428_v54, %v418_v11  ;;  %v1035_v39 = vpop.permute.xlu0 %1034 }
 0x13f   : > { %4175 = vst [vmem:[#allocation114_spill] sm:$0xff] %v3330_v52  ;;  %v601_v15 = vrot.slane %v590_v43, 1  ;;  %v608_v23 = vrot.slane %v3157_v28, 1  ;;  %v609_v61 = vrot.slane %v3186_v34, 1  ;;  %v1149_v59 = vpop.permute.xlu1 %1148  ;;  %v3340_v48 = vmul.f32 %v2779_v18, %v1164_v21  ;;  %1206 = vrot.lane.b32.xlu0 %v3252_v56, %s2050_s30 }
 0x140   : > { %4176 = vst [vmem:[#allocation115_spill] sm:$0xff] %v3335_v16  ;;  %v610_v47 = vrot.slane %v3292_v33, 1  ;;  %v611_v45 = vrot.slane %v3309_v8, 1  ;;  %v4178_v46 = vrot.slane %v3086_v49, 1  ;;  %1208 = vrot.lane.b32.xlu1 %v3275_v60, %s2050_s30  ;;  %v1165_v11 = vsub.f32 %v4168_v10, %v1149_v59 }
 0x141   : > { %4177 = vst [vmem:[#allocation116_spill] sm:$0xff] %v3340_v48  ;;  %v1052_v54 = vsub.f32 %v4150_v42, %v1035_v39  ;;  %v617_v3 = vsel %vm612_vm5, %v600_v40, %v608_v23  ;;  %v869_v21 = vand.u32 2147483647, %v3073_v22  ;;  %v618_v24 = vsel %vm612_vm5, %v601_v15, %v609_v61 }
 0x142   : > { %v616_v36 = vsel %vm612_vm5, %v4178_v46, %v607_v13  ;;  %v619_v46 = vsel %vm612_vm5, %v602_v6, %v610_v47  ;;  %v620_v60 = vsel %vm612_vm5, %v603_v2, %v611_v45  ;;  %v4179_v56 = vrot.slane %v3047_v12, 1  ;;  %v1261_v16 = vpop.permute.xlu0 %1260 }
 0x143   : > { %v4180_v59 = vrot.slane %v3064_v37, 1  ;;  %v3370_v39 = vmul.f32 %v2779_v18, %v1165_v11  ;;  %v3373_v22 = vmul.f32 %v2779_v18, %v1052_v54  ;;  %v4183_v63 = vrot.slane %v3086_v49, 1  ;;  %v1037_v4 = vpop.permute.xlu1 %1036  ;;  %1094 = vrot.lane.b32.xlu0 %v3278_v53, %s2050_s30 }
 0x144   : > { %v625_v52 = vsel %vm612_vm5, %v608_v23, %v600_v40  ;;  %v626_v50 = vsel %vm612_vm5, %v609_v61, %v601_v15  ;;  %v628_v11 = vsel %vm612_vm5, %v611_v45, %v603_v2  ;;  %v631_v54 = vadd.f32 %v3051_v51, %v3006_v5  ;;  %1096 = vrot.lane.b32.xlu1 %v3306_v57, %s2050_s30 }
 0x145   : > { %v623_v42 = vsel %vm612_vm5, %v4180_v59, %v4179_v56  ;;  %4181 = vst [vmem:[#allocation117_spill] sm:$0xff] %v3370_v39  ;;  %4182 = vst [vmem:[#allocation118_spill] sm:$0xff] %v3373_v22  ;;  %v624_v38 = vsel %vm612_vm5, %v607_v13, %v4183_v63  ;;  %v627_v56 = vsel %vm612_vm5, %v610_v47, %v602_v6  ;;  %v870_v15 = vand.u32 2147483647, %v3089_v32 }
 0x146   : > { %v1053_v63 = vsub.f32 %v4151_v35, %v1037_v4  ;;  %v1277_v13 = vsub.f32 %v2770_v41, %v1261_v16  ;;  %v632_v40 = vadd.f32 %v3070_v7, %v3003_v31  ;;  %v633_v6 = vadd.f32 %v3117_v27, %v3047_v12 }
 0x147   : > { %v634_v5 = vadd.f32 %v623_v42, %v3064_v37  ;;  %v635_v51 = vadd.f32 %v616_v36, %v3086_v49  ;;  %v636_v2 = vadd.f32 %v624_v38, %v3109_v14  ;;  %v637_v35 = vadd.f32 %v617_v3, %v588_v30  ;;  %1320 = vrot.lane.b32.xlu0 %v3327_v9, %s2050_s30 }
 0x148   : > { %v3404_v23 = vmul.f32 %v2779_v18, %v1053_v63  ;;  %v3407_v4 = vmul.f32 %v2779_v18, %v1277_v13  ;;  %v638_v31 = vadd.f32 %v625_v52, %v3157_v28  ;;  %v639_v7 = vadd.f32 %v618_v24, %v590_v43  ;;  %1322 = vrot.lane.b32.xlu1 %v3333_v62, %s2050_s30  ;;  %v4186_v24 = vld [vmem:[#allocation21_spill] sm:$0xff] }
 0x149   : > { %v640_v32 = vadd.f32 %v626_v50, %v3186_v34  ;;  %v641_v16 = vadd.f32 %v619_v46, %v592_v58  ;;  %v642_v12 = vadd.f32 %v627_v56, %v3292_v33  ;;  %v643_v37 = vadd.f32 %v620_v60, %v594_v44  ;;  %v4187_v33 = vld [vmem:[#allocation19_spill] sm:$0xff] }
 0x14a   : > { %4184 = vst [vmem:[#allocation119_spill] sm:$0xff] %v3404_v23  ;;  %4185 = vst [vmem:[#allocation120_spill] sm:$0xff] %v3407_v4  ;;  %v644_v49 = vadd.f32 %v628_v11, %v3309_v8  ;;  %v871_v18 = vand.u32 2147483647, %v631_v54  ;;  %v872_v38 = vand.u32 2147483647, %v632_v40  ;;  %v885_v30 = vmul.f32 %v869_v21, %v4186_v24 }
 0x14b   : > { %v873_v14 = vand.u32 2147483647, %v633_v6  ;;  %v874_v27 = vand.u32 2147483647, %v634_v5  ;;  %v875_v28 = vand.u32 2147483647, %v635_v51  ;;  %v886_v58 = vmul.f32 %v870_v15, %v4187_v33  ;;  %1210 = vrot.lane.b32.xlu0 %v3340_v48, %s2050_s30 }
 0x14c   : > { %v876_v34 = vand.u32 2147483647, %v636_v2  ;;  %v877_v50 = vand.u32 2147483647, %v637_v35  ;;  %v878_v43 = vand.u32 2147483647, %v638_v31  ;;  %v887_v45 = vmul.f32 %v871_v18, %v4186_v24  ;;  %1212 = vrot.lane.b32.xlu1 %v3370_v39, %s2050_s30 }
 0x14d   : > { %v879_v52 = vand.u32 2147483647, %v639_v7  ;;  %v880_v61 = vand.u32 2147483647, %v640_v32  ;;  %v881_v47 = vand.u32 2147483647, %v641_v16  ;;  %v888_v36 = vmul.f32 %v872_v38, %v4187_v33 }
 0x14e   : > { %v882_v8 = vand.u32 2147483647, %v642_v12  ;;  %v883_v60 = vand.u32 2147483647, %v643_v37  ;;  %v884_v44 = vand.u32 2147483647, %v644_v49  ;;  %v889_v3 = vmul.f32 %v873_v14, %v4186_v24 }
 0x14f   : > { %v890_v21 = vmul.f32 %v874_v27, %v4187_v33  ;;  %v891_v46 = vmul.f32 %v875_v28, %v4186_v24  ;;  %v3429_v59 = vmul.f32 %v876_v34, %v4187_v33  ;;  %v3432_v42 = vmul.f32 %v877_v50, %v4186_v24  ;;  %1098 = vrot.lane.b32.xlu0 %v3373_v22, %s2050_s30  ;;  %v1865_v5 = vld [vmem:[%s2251_s19 + $0x20] sm:$0xff]  ;;  %v1866_v2 = vld [vmem:[%s2251_s19 + $0x28] sm:$0xff]  ;;  %v1868_v16 = vld [vmem:[%s2251_s19 + $0x30] sm:$0xff] }
 0x150   : > { %v3435_v56 = vmul.f32 %v878_v43, %v4187_v33  ;;  %v3438_v11 = vmul.f32 %v879_v52, %v4186_v24  ;;  %v3441_v54 = vmul.f32 %v880_v61, %v4187_v33  ;;  %v3444_v63 = vmul.f32 %v881_v47, %v4186_v24  ;;  %1100 = vrot.lane.b32.xlu1 %v3404_v23, %s2050_s30  ;;  %v1867_v35 = vld [vmem:[%s2251_s19 + $0x48] sm:$0xff]  ;;  %v4188_v7 = vld [vmem:[#allocation81_spill] sm:$0xff]  ;;  %v1869_v49 = vld [vmem:[%s2251_s19 + $0x38] sm:$0xff] }
 0x151   : > { %v3447_v13 = vmul.f32 %v882_v8, %v4187_v33  ;;  %v3450_v40 = vmul.f32 %v883_v60, %v4186_v24  ;;  %v3453_v15 = vmul.f32 %v884_v44, %v4187_v33  ;;  %v901_v6 = vadd.f32 %v886_v58, %v885_v30  ;;  %v4189_v12 = vld [vmem:[#allocation53_spill] sm:$0xff]  ;;  %v1871_v34 = vld [vmem:[%s2278_s21 + $0x38] sm:$0xff]  ;;  %v4191_v52 = vld [vmem:[#allocation43_spill] sm:$0xff] }
 0x152   : > { %v446_v51 = vsub.f32 %v2564_v0, %v1865_v5  ;;  %v447_v31 = vsub.f32 %v1867_v35, %v1866_v2  ;;  %v478_v32 = vand.u32 2147483647, %v4188_v7  ;;  %v448_v37 = vsub.f32 %v4189_v12, %v1868_v16  ;;  %v1870_v38 = vld [vmem:[%s2251_s19 + $0x40] sm:$0xff]  ;;  %v4190_v50 = vld [vmem:[#allocation56_spill] sm:$0xff] }
 0x153   : > { %v449_v18 = vsub.f32 %v2680_v55, %v1869_v49  ;;  %v450_v14 = vsub.f32 %v4160_v20, %v1870_v38  ;;  %v451_v27 = vsub.f32 %v4166_v19, %v1867_v35  ;;  %v902_v28 = vadd.f32 %v901_v6, %v887_v45  ;;  %v1872_v33 = vld [vmem:[%s2278_s21 + $0x40] sm:$0xff]  ;;  %v4192_v47 = vld [vmem:[#allocation52_spill] sm:$0xff]  ;;  %1324 = vrot.lane.b32.xlu0 %v3407_v4, %s2050_s30  ;;  %v4194_v6 = vld [vmem:[#allocation15_spill] sm:$0xff] }
 0x154   : > { %v452_v24 = vsub.f32 %v4167_v26, %v4189_v12  ;;  %v453_v30 = vsub.f32 %v4168_v10, %v2680_v55  ;;  %v461_v43 = vsub.f32 %v4190_v50, %v1871_v34  ;;  %v462_v58 = vsub.f32 %v2701_v29, %v1872_v33  ;;  %v4193_v44 = vld [vmem:[#allocation32_spill] sm:$0xff]  ;;  %v4196_v2 = vld [vmem:[#allocation33_spill] sm:$0xff]  ;;  %v4199_v38 = vld [vmem:[#allocation42_spill] sm:$0xff] }
 0x155   : > { %v463_v61 = vsub.f32 %v2732_v17, %v4191_v52  ;;  %v464_v8 = vsub.f32 %v2739_v25, %v4192_v47  ;;  %v465_v45 = vsub.f32 %v2770_v41, %v4190_v50  ;;  %v903_v60 = vadd.f32 %v902_v28, %v888_v36  ;;  %v4197_v7 = vld [vmem:[#allocation17_spill] sm:$0xff]  ;;  %v4200_v34 = vld [vmem:[#allocation27_spill] sm:$0xff]  ;;  %v4202_v22 = vld [vmem:[#allocation28_spill] sm:$0xff] }
 0x156   : > { %v4195_v5 = vsub.f32 %v4193_v44, %v4194_v6  ;;  %v4198_v16 = vsub.f32 %v4196_v2, %v4197_v7  ;;  %v4201_v33 = vsub.f32 %v4199_v38, %v4200_v34  ;;  %v4203_v23 = vsub.f32 %v4191_v52, %v4202_v22  ;;  %v4205_v6 = vld [vmem:[#allocation113_spill] sm:$0xff]  ;;  %v4206_v7 = vld [vmem:[#allocation115_spill] sm:$0xff] }
 0x157   : > { %v4204_v50 = vsub.f32 %v4192_v47, %v4196_v2  ;;  %v473_v36 = vmul.f32 %v461_v43, %v449_v18  ;;  %v3502_v28 = vmul.f32 %v462_v58, %v450_v14  ;;  %v3504_v44 = vmul.f32 %v463_v61, %v451_v27 }
 0x158   : > { %v468_v49 = vmul.f32 %v4198_v16, %v4195_v5  ;;  %v470_v39 = vmul.f32 %v4201_v33, %v446_v51  ;;  %v471_v48 = vmul.f32 %v4203_v23, %v447_v31  ;;  %v3508_v5 = vadd.f32 %v4206_v7, %v4205_v6  ;;  %v4207_v31 = vld [vmem:[#allocation79_spill] sm:$0xff]  ;;  %v4218_v6 = vld [vmem:[#allocation9_spill] sm:$0xff] }
 0x159   : > { %v472_v4 = vmul.f32 %v4204_v50, %v448_v37  ;;  %v904_v16 = vadd.f32 %v903_v60, %v889_v3  ;;  %v3510_v38 = vmul.f32 %v464_v8, %v452_v24  ;;  %v3512_v34 = vmul.f32 %v465_v45, %v453_v30  ;;  %v4211_v45 = vld [vmem:[#allocation38_spill] sm:$0xff] }
 0x15a   : > { %v480_v51 = vand.u32 2147483647, %v468_v49  ;;  %v482_v22 = vand.u32 2147483647, %v470_v39  ;;  %v483_v23 = vand.u32 2147483647, %v471_v48 }
 0x15b   : > { %v4208_v52 = vand.u32 2147483647, %v4207_v31  ;;  %v905_v18 = vadd.f32 %v904_v16, %v890_v21  ;;  %v484_v14 = vand.u32 2147483647, %v472_v4  ;;  %v485_v43 = vand.u32 2147483647, %v473_v36 }
 0x15c   : > { %v486_v27 = vand.u32 2147483647, %v3502_v28  ;;  %v487_v58 = vand.u32 2147483647, %v3504_v44  ;;  %v488_v61 = vand.u32 2147483647, %v3510_v38 }
 0x15d   : > { %v490_v37 = vadd.f32 %v4208_v52, %v478_v32  ;;  %v651_v24 = vrot.slane %v4160_v20, 7  ;;  %v906_v30 = vadd.f32 %v905_v18, %v891_v46  ;;  %v652_v39 = vrot.slane %v4167_v26, 7  ;;  %v4209_v21 = vld [vmem:[#allocation80_spill] sm:$0xff] }
 0x15e   : > { %v659_v48 = vrot.slane %v4166_v19, 7  ;;  %v660_v32 = vrot.slane %v4168_v10, 7  ;;  %v4210_v4 = vand.u32 2147483647, %v4209_v21  ;;  %v4212_v60 = vrot.slane %v4211_v45, 7  ;;  %v4216_v36 = vld [vmem:[#allocation84_spill] sm:$0xff] }
 0x15f   : > { %v491_v3 = vadd.f32 %v490_v37, %v480_v51  ;;  %v4213_v2 = vrot.slane %v2564_v0, 7  ;;  %v4214_v33 = vrot.slane %v2680_v55, 7  ;;  %v4215_v46 = vrot.slane %v4189_v12, 7  ;;  %v1873_v21 = vld [vmem:[%s2251_s19 + $0x58] sm:$0xff] }
 0x160   : > { %v4217_v28 = vsub.f32 %v4189_v12, %v4216_v36  ;;  %v907_v16 = vadd.f32 %v906_v30, %v3429_v59  ;;  %v667_v51 = vsel %vm547_vm4, %v651_v24, %v659_v48  ;;  %v668_v31 = vsel %vm547_vm4, %v652_v39, %v660_v32 }
 0x161   : > { %v492_v8 = vadd.f32 %v491_v3, %v4210_v4  ;;  %v665_v49 = vsel %vm547_vm4, %v4213_v2, %v4212_v60  ;;  %v666_v50 = vsel %vm547_vm4, %v4215_v46, %v4214_v33  ;;  %v675_v52 = vsel %vm547_vm4, %v659_v48, %v651_v24  ;;  %v1183_v4 = vpop.permute.xlu0 %1182  ;;  %v4219_v2 = vld [vmem:[#allocation68_spill] sm:$0xff] }
 0x162   : > { %v703_v7 = vmul.f32 %v4218_v6, %v4217_v28  ;;  %v676_v18 = vsel %vm547_vm4, %v660_v32, %v652_v39  ;;  %v686_v3 = vsub.f32 %v1867_v35, %v665_v49  ;;  %v688_v12 = vsub.f32 %v1873_v21, %v666_v50  ;;  %v4220_v24 = vld [vmem:[#allocation44_spill] sm:$0xff]  ;;  %v1185_v50 = vpop.permute.xlu1 %1184  ;;  %v4225_v21 = vld [vmem:[#allocation39_spill] sm:$0xff] }
 0x163   : > { %v493_v37 = vadd.f32 %v492_v8, %v482_v22  ;;  %v908_v45 = vadd.f32 %v907_v16, %v3432_v42  ;;  %v689_v59 = vsub.f32 %v4160_v20, %v675_v52  ;;  %v690_v30 = vsub.f32 %v4166_v19, %v667_v51  ;;  %v4221_v16 = vld [vmem:[#allocation70_spill] sm:$0xff] }
 0x164   : > { %v691_v60 = vsub.f32 %v4167_v26, %v676_v18  ;;  %v1214_v33 = vadd.f32 %v1183_v4, %v4219_v2  ;;  %v692_v22 = vsub.f32 %v4168_v10, %v668_v31  ;;  %v713_v48 = vrot.slane %v4220_v24, 1  ;;  %v4222_v31 = vld [vmem:[#allocation69_spill] sm:$0xff] }
 0x165   : > { %v494_v46 = vadd.f32 %v493_v37, %v483_v23  ;;  %v909_v35 = vadd.f32 %v908_v45, %v3435_v56  ;;  %v705_v39 = vmul.f32 %v4218_v6, %v689_v59  ;;  %v714_v42 = vrot.slane %v703_v7, 1  ;;  %v1295_v26 = vpop.permute.xlu0 %1294  ;;  %v4223_v37 = vld [vmem:[#allocation37_spill] sm:$0xff] }
 0x166   : > { %v707_v32 = vmul.f32 %v4218_v6, %v691_v60  ;;  %v721_v20 = vrot.slane %v686_v3, 1  ;;  %v722_v49 = vrot.slane %v688_v12, 1  ;;  %v723_v19 = vrot.slane %v690_v30, 1 }
 0x167   : > { %v495_v8 = vadd.f32 %v494_v46, %v484_v14  ;;  %v910_v36 = vadd.f32 %v909_v35, %v3438_v11  ;;  %v715_v23 = vrot.slane %v705_v39, 1  ;;  %v724_v10 = vrot.slane %v692_v22, 1 }
 0x168   : > { %v716_v28 = vrot.slane %v707_v32, 1  ;;  %v1215_v51 = vadd.f32 %v1185_v50, %v4221_v16  ;;  %v1326_v56 = vadd.f32 %v1295_v26, %v4222_v31  ;;  %v4224_v18 = vrot.slane %v4223_v37, 1 }
 0x169   : > { %v496_v52 = vadd.f32 %v495_v8, %v485_v43  ;;  %v4226_v4 = vrot.slane %v4225_v21, 1  ;;  %v911_v45 = vadd.f32 %v910_v36, %v3441_v54  ;;  %v729_v11 = vsel %vm612_vm5, %v713_v48, %v721_v20  ;;  %v1297_v8 = vpop.permute.xlu1 %1296  ;;  %v1187_v44 = vpop.permute.xlu0 %1186 }
 0x16a   : > { %v730_v59 = vsel %vm612_vm5, %v714_v42, %v722_v49  ;;  %v731_v60 = vsel %vm612_vm5, %v715_v23, %v723_v19  ;;  %v1399_v2 = vmul.f32 %v1326_v56, %v1214_v33  ;;  %v732_v46 = vsel %vm612_vm5, %v716_v28, %v724_v10 }
 0x16b   : > { %v728_v14 = vsel %vm612_vm5, %v4226_v4, %v4224_v18  ;;  %v497_v43 = vadd.f32 %v496_v52, %v486_v27  ;;  %v737_v35 = vsel %vm612_vm5, %v721_v20, %v713_v48  ;;  %v912_v54 = vadd.f32 %v911_v45, %v3444_v63  ;;  %v4227_v27 = vld [vmem:[#allocation71_spill] sm:$0xff] }
 0x16c   : > { %v738_v50 = vsel %vm612_vm5, %v722_v49, %v714_v42  ;;  %v739_v26 = vsel %vm612_vm5, %v723_v19, %v715_v23  ;;  %v740_v36 = vsel %vm612_vm5, %v724_v10, %v716_v28  ;;  %v1415_v33 = vand.u32 2147483647, %v1399_v2  ;;  %v4228_v19 = vld [vmem:[#allocation91_spill] sm:$0xff] }
 0x16d   : > { %v1327_v16 = vadd.f32 %v1297_v8, %v4227_v27  ;;  %v498_v31 = vadd.f32 %v497_v43, %v487_v58  ;;  %v747_v48 = vadd.f32 %v728_v14, %v4225_v21  ;;  %v913_v20 = vadd.f32 %v912_v54, %v3447_v13  ;;  %v1299_v52 = vpop.permute.xlu1 %1298  ;;  %v1875_v54 = vld [vmem:[%s2278_s21 + $0x68] sm:$0xff] }
 0x16e   : > { %v3594_v63 = vadd.f32 %v729_v11, %v4220_v24  ;;  %v750_v42 = vadd.f32 %v737_v35, %v686_v3  ;;  %v3596_v49 = vadd.f32 %v730_v59, %v703_v7  ;;  %v1431_v23 = vmul.f32 %v1415_v33, %v4228_v19  ;;  %v4229_v3 = vld [vmem:[#allocation72_spill] sm:$0xff]  ;;  %v1874_v35 = vld [vmem:[%s2278_s21 + $0x60] sm:$0xff] }
 0x16f   : > { %v1400_v56 = vmul.f32 %v1327_v16, %v1215_v51  ;;  %v489_v28 = vand.u32 2147483647, %v3512_v34  ;;  %v3600_v10 = vadd.f32 %v738_v50, %v688_v12  ;;  %v914_v58 = vadd.f32 %v913_v20, %v3450_v40  ;;  %v4230_v51 = vld [vmem:[#allocation73_spill] sm:$0xff]  ;;  %v4239_v16 = vld [vmem:[#allocation74_spill] sm:$0xff] }
 0x170   : > { %v3603_v37 = vadd.f32 %v731_v60, %v705_v39  ;;  %v3605_v13 = vadd.f32 %v739_v26, %v690_v30  ;;  %v3607_v24 = vadd.f32 %v732_v46, %v707_v32  ;;  %v1328_v18 = vadd.f32 %v1299_v52, %v4229_v3  ;;  %v1876_v26 = vld [vmem:[%s2278_s21 + $0x70] sm:$0xff] }
 0x171   : > { %v1416_v7 = vand.u32 2147483647, %v1400_v56  ;;  %v1216_v21 = vadd.f32 %v1187_v44, %v4230_v51  ;;  %v3613_v12 = vadd.f32 %v498_v31, %v488_v61  ;;  %v3616_v40 = vadd.f32 %v914_v58, %v3453_v15  ;;  %v1189_v46 = vpop.permute.xlu1 %1188  ;;  %v4243_v51 = vld [vmem:[#allocation50_spill] sm:$0xff] }
 0x172   : > { %v3618_v39 = vadd.f32 %v740_v36, %v692_v22  ;;  %v4231_v30 = vrot.slane %v2732_v17, 7  ;;  %v4232_v32 = vrot.slane %v2701_v29, 7  ;;  %v4233_v14 = vrot.slane %v2770_v41, 7  ;;  %v1877_v29 = vld [vmem:[%s2278_s21 + $0x78] sm:$0xff] }
 0x173   : > { %v4234_v45 = vrot.slane %v2739_v25, 7  ;;  %v1432_v61 = vmul.f32 %v1416_v7, %v4228_v19  ;;  %v1401_v15 = vmul.f32 %v1328_v18, %v1216_v21  ;;  %v1217_v31 = vadd.f32 %v1189_v46, %v4239_v16  ;;  %v4240_v25 = vld [vmem:[#allocation85_spill] sm:$0xff]  ;;  %v4242_v18 = vld [vmem:[#allocation48_spill] sm:$0xff] }
 0x174   : > { %v779_v4 = vsel %vm547_vm4, %v4232_v32, %v4231_v30  ;;  %v4235_v22 = vmov %v4232_v32  ;;  %v4236_v11 = vmov %v4231_v30  ;;  %v4238_v2 = vmov %v4233_v14  ;;  %v4244_v21 = vld [vmem:[#allocation45_spill] sm:$0xff]  ;;  %v1301_v32 = vpop.permute.xlu0 %1300 }
 0x175   : > { %v780_v38 = vsel %vm547_vm4, %v4234_v45, %v4233_v14  ;;  %v787_v59 = vsel %vm547_vm4, %v4236_v11, %v4235_v22  ;;  %v4237_v60 = vmov %v4234_v45  ;;  %v802_v50 = vsub.f32 %v1875_v54, %v779_v4  ;;  %v4249_v11 = vld [vmem:[#allocation75_spill] sm:$0xff] }
 0x176   : > { %v788_v43 = vsel %vm547_vm4, %v4238_v2, %v4237_v60  ;;  %v801_v8 = vsub.f32 %v1874_v35, %v787_v59  ;;  %v804_v33 = vsub.f32 %v1877_v29, %v780_v38  ;;  %v1447_v17 = vadd.f32 %v1432_v61, %v1431_v23  ;;  %v4246_v38 = vld [vmem:[#allocation24_spill] sm:$0xff]  ;;  %v4250_v60 = vld [vmem:[#allocation109_spill] sm:$0xff]  ;;  %v4251_v2 = vld [vmem:[#allocation86_spill] sm:$0xff] }
 0x177   : > { %v803_v36 = vsub.f32 %v1876_v26, %v788_v43  ;;  %v1417_v27 = vand.u32 2147483647, %v1401_v15  ;;  %v4241_v20 = vsub.f32 %v4192_v47, %v4240_v25  ;;  %v835_v44 = vrot.slane %v802_v50, 1  ;;  %v4245_v47 = vld [vmem:[#allocation51_spill] sm:$0xff]  ;;  %v4247_v61 = vld [vmem:[#allocation36_spill] sm:$0xff]  ;;  %343 = vadd.xlane.f32.xlu0 %v4250_v60  ;;  %v4254_v35 = vld [vmem:[#allocation110_spill] sm:$0xff]  ;;  %v1303_v25 = vpop.permute.xlu1 %1302 }
 0x178   : > { %v817_v56 = vmul.f32 %v4218_v6, %v801_v8  ;;  %v836_v58 = vrot.slane %v804_v33, 1  ;;  %v861_v23 = vadd.f32 %v4243_v51, %v4242_v18  ;;  %v932_v30 = vmul.f32 %v4244_v21, %v747_v48  ;;  %355 = vadd.xlane.f32.xlu1 %v4254_v35 }
 0x179   : > { %v815_v41 = vmul.f32 %v4218_v6, %v4241_v20  ;;  %v819_v52 = vmul.f32 %v4218_v6, %v803_v36  ;;  %v1433_v7 = vmul.f32 %v1417_v27, %v4228_v19  ;;  %v935_v45 = vmul.f32 %v4245_v47, %v750_v42  ;;  %v1191_v20 = vpop.permute.xlu0 %1190 }
 0x17a   : > { %v827_v4 = vrot.slane %v817_v56, 1  ;;  %v4248_v15 = vand.u32 2147483647, %v4247_v61  ;;  %v1329_v59 = vadd.f32 %v1301_v32, %v4249_v11  ;;  %v4252_v43 = vrot.slane %v4251_v2, 1  ;;  %v4255_v32 = vld [vmem:[#allocation76_spill] sm:$0xff]  ;;  %v4256_v61 = vld [vmem:[#allocation77_spill] sm:$0xff] }
 0x17b   : > { %v826_v3 = vrot.slane %v815_v41, 1  ;;  %v828_v14 = vrot.slane %v819_v52, 1  ;;  %v1448_v6 = vadd.f32 %v1447_v17, %v1433_v7  ;;  %v934_v51 = vmul.f32 %v861_v23, %v3594_v63  ;;  %v1193_v23 = vpop.permute.xlu1 %1192  ;;  %v4258_v11 = vld [vmem:[#allocation22_spill] sm:$0xff] }
 0x17c   : > { %v3664_v22 = vmul.f32 %v4248_v15, %v4246_v38  ;;  %v4253_v46 = vmov %v4252_v43  ;;  %v843_v8 = vsel %vm612_vm5, %v827_v4, %v835_v44  ;;  %v851_v26 = vsel %vm612_vm5, %v835_v44, %v827_v4  ;;  %v4257_v4 = vld [vmem:[#allocation111_spill] sm:$0xff]  ;;  %431 = vadd.xlane.f32.xlu1 %v3508_v5  ;;  %v4259_v5 = vld [vmem:[#allocation46_spill] sm:$0xff] }
 0x17d   : > { %v842_v48 = vsel %vm612_vm5, %v826_v3, %v4252_v43  ;;  %v850_v42 = vsel %vm612_vm5, %v4253_v46, %v826_v3  ;;  %v844_v54 = vsel %vm612_vm5, %v828_v14, %v836_v58  ;;  %v852_v36 = vsel %vm612_vm5, %v836_v58, %v828_v14  ;;  %371 = vadd.xlane.f32.xlu0 %v4257_v4 }
 0x17e   : > { %v1402_v29 = vmul.f32 %v1329_v59, %v1217_v31  ;;  %v863_v17 = vadd.f32 %v842_v48, %v815_v41  ;;  %v864_v27 = vadd.f32 %v850_v42, %v4251_v2  ;;  %v865_v16 = vadd.f32 %v843_v8, %v817_v56  ;;  %v4261_v2 = vld [vmem:[#allocation114_spill] sm:$0xff]  ;;  %v1305_v8 = vpop.permute.xlu0 %1304 }
 0x17f   : > { %v866_v7 = vadd.f32 %v851_v26, %v802_v50  ;;  %v867_v3 = vadd.f32 %v844_v54, %v819_v52  ;;  %v868_v18 = vadd.f32 %v852_v36, %v804_v33  ;;  %v1330_v47 = vadd.f32 %v1303_v25, %v4255_v32  ;;  %v1073_v35 = vpop.permute.xlu1 %1072  ;;  %v4262_v26 = vld [vmem:[#allocation78_spill] sm:$0xff] }
 0x180   : > { %v1418_v21 = vand.u32 2147483647, %v1402_v29  ;;  %v1218_v44 = vadd.f32 %v1191_v20, %v4256_v61  ;;  %v936_v1 = vmul.f32 %v863_v17, %v3596_v49  ;;  %v937_v31 = vmul.f32 %v864_v27, %v3600_v10  ;;  %916 = vadd.xlane.f32.xlu1 %v3616_v40  ;;  %v4263_v29 = vld [vmem:[#allocation83_spill] sm:$0xff]  ;;  %v4264_v25 = vld [vmem:[#allocation34_spill] sm:$0xff] }
 0x181   : > { %v938_v41 = vmul.f32 %v865_v16, %v3603_v37  ;;  %v939_v50 = vmul.f32 %v866_v7, %v3605_v13  ;;  %v940_v33 = vmul.f32 %v867_v3, %v3607_v24  ;;  %v941_v52 = vmul.f32 %v868_v18, %v3618_v39  ;;  %385 = vadd.xlane.f32.xlu0 %v4261_v2  ;;  %v4268_v2 = vld [vmem:[#allocation87_spill] sm:$0xff] }
 0x182   : > { %v1434_v63 = vmul.f32 %v1418_v21, %v4228_v19  ;;  %v1403_v56 = vmul.f32 %v1330_v47, %v1218_v44  ;;  %v948_v58 = vand.u32 2147483647, %v932_v30  ;;  %v950_v14 = vand.u32 2147483647, %v934_v51  ;;  %v1071_v18 = vpop.permute.xlu0 %1070  ;;  %v4265_v51 = vld [vmem:[#allocation41_spill] sm:$0xff] }
 0x183   : > { %v951_v15 = vand.u32 2147483647, %v935_v45  ;;  %v952_v49 = vand.u32 2147483647, %v936_v1  ;;  %v4260_v59 = vand.u32 2147483647, %v4259_v5  ;;  %v500_v13 = vadd.f32 %v3613_v12, %v489_v28  ;;  %v1077_v3 = vpop.permute.xlu1 %1076 }
 0x184   : > { %v1449_v60 = vadd.f32 %v1448_v6, %v1434_v63  ;;  %v1419_v37 = vand.u32 2147483647, %v1403_v56  ;;  %v953_v24 = vand.u32 2147483647, %v937_v31  ;;  %v954_v39 = vand.u32 2147483647, %v938_v41 }
 0x185   : > { %v965_v10 = vmul.f32 %v4260_v59, %v4258_v11  ;;  %v955_v30 = vand.u32 2147483647, %v939_v50  ;;  %v956_v43 = vand.u32 2147483647, %v940_v33  ;;  %v964_v45 = vmul.f32 %v948_v58, %v4246_v38  ;;  %501 = vadd.xlane.f32.xlu0 %v500_v13  ;;  %v4266_v58 = vld [vmem:[#allocation93_spill] sm:$0xff] }
 0x186   : > { %v1435_v48 = vmul.f32 %v1419_v37, %v4228_v19  ;;  %v957_v46 = vand.u32 2147483647, %v941_v52  ;;  %v966_v6 = vmul.f32 %v950_v14, %v4246_v38  ;;  %v967_v42 = vmul.f32 %v951_v15, %v4258_v11  ;;  %v1075_v4 = vpop.permute.xlu0 %1074  ;;  %v4267_v14 = vld [vmem:[#allocation94_spill] sm:$0xff] }
 0x187   : > { %v968_v34 = vmul.f32 %v952_v49, %v4246_v38  ;;  %v969_v28 = vmul.f32 %v953_v24, %v4258_v11  ;;  %v970_v12 = vmul.f32 %v954_v39, %v4246_v38  ;;  %v971_v40 = vmul.f32 %v955_v30, %v4258_v11  ;;  %v3722_v44 = vpop.permute.xlu1 %1080 }
 0x188   : > { %v1450_v54 = vadd.f32 %v1449_v60, %v1435_v48  ;;  %v1219_v36 = vadd.f32 %v1193_v23, %v4262_v26  ;;  %v1331_v17 = vadd.f32 %v1305_v8, %v4263_v29  ;;  %v972_v27 = vmul.f32 %v956_v43, %v4246_v38  ;;  %v4271_v8 = vld [vmem:[#allocation95_spill] sm:$0xff] }
 0x189   : > { %v973_v16 = vmul.f32 %v957_v46, %v4258_v11  ;;  %v977_v20 = vadd.f32 %v4264_v25, %v3664_v22  ;;  %v1102_v13 = vadd.f32 %v1071_v18, %v4268_v2  ;;  %v4270_v46 = vld [vmem:[#allocation90_spill] sm:$0xff]  ;;  %v4280_v2 = vld [vmem:[#allocation89_spill] sm:$0xff] }
 0x18a   : > { %v1404_v7 = vmul.f32 %v1331_v17, %v1219_v36  ;;  %v1079_v50 = vpop.permute.xlu0 %1078 }
 0x18b   : > { %v978_v21 = vadd.f32 %v977_v20, %v4265_v51  ;;  %v1307_v41 = vpop.permute.xlu1 %1306  ;;  %v4274_v20 = vld [vmem:[#allocation101_spill] sm:$0xff]  ;;  %v4276_v51 = vld [vmem:[#allocation11_spill] sm:$0xff] }
 0x18c   : > { %v1420_v32 = vand.u32 2147483647, %v1404_v7  ;;  %v1332_v23 = vadd.f32 %v1307_v41, %v4266_v58 }
 0x18d   : > { %v979_v47 = vadd.f32 %v978_v21, %v964_v45  ;;  %v4269_v45 = vld [vmem:[#allocation82_spill] sm:$0xff] }
 0x18e   : > { %v1436_v61 = vmul.f32 %v1420_v32, %v4228_v19  ;;  %v1195_v56 = vpop.permute.xlu0 %1194  ;;  %v1103_v48 = vadd.f32 %v1073_v35, %v4269_v45  ;;  %v4275_v35 = vld [vmem:[#allocation88_spill] sm:$0xff] }
 0x18f   : > { %v980_v1 = vadd.f32 %v979_v47, %v965_v10  ;;  %v1197_v22 = vpop.permute.xlu1 %1196  ;;  %v1220_v15 = vadd.f32 %v1195_v56, %v4267_v14  ;;  %v1105_v18 = vadd.f32 %v1077_v3, %v4275_v35 }
 0x190   : > { %v1451_v31 = vadd.f32 %v1450_v54, %v1436_v61  ;;  %v1343_v29 = vand.u32 2147483647, %v1103_v48 }
 0x191   : > { %v981_v38 = vadd.f32 %v980_v1, %v966_v6  ;;  %v1405_v11 = vmul.f32 %v1332_v23, %v1220_v15  ;;  %v1104_v6 = vadd.f32 %v1075_v4, %v4270_v46  ;;  %v4282_v46 = vld [vmem:[#allocation61_spill] sm:$0xff] }
 0x192   : > { %v1083_v59 = vpop.permute.xlu0 %1082  ;;  %v1359_v1 = vmul.f32 %v1343_v29, %v4276_v51 }
 0x193   : > { %v982_v33 = vadd.f32 %v981_v38, %v967_v42  ;;  %v3726_v5 = vpop.permute.xlu1 %1084  ;;  %v1421_v10 = vand.u32 2147483647, %v1405_v11  ;;  %v1344_v17 = vand.u32 2147483647, %v1104_v6  ;;  %v4277_v38 = vld [vmem:[#allocation92_spill] sm:$0xff] }
 0x194   : > { %v1106_v41 = vadd.f32 %v1079_v50, %v4277_v38  ;;  %v1107_v50 = vadd.f32 %v3722_v44, %v4280_v2  ;;  %v4286_v38 = vld [vmem:[#allocation64_spill] sm:$0xff] }
 0x195   : > { %v983_v63 = vadd.f32 %v982_v33, %v968_v34  ;;  %v1437_v24 = vmul.f32 %v1421_v10, %v4228_v19  ;;  %v1221_v34 = vadd.f32 %v1197_v22, %v4271_v8  ;;  %v1345_v22 = vand.u32 2147483647, %v1105_v18 }
 0x196   : > { %v1309_v30 = vpop.permute.xlu0 %1308  ;;  %v1346_v14 = vand.u32 2147483647, %v1106_v41 }
 0x197   : > { %v984_v52 = vadd.f32 %v983_v63, %v969_v28  ;;  %v1311_v39 = vpop.permute.xlu1 %1310  ;;  %v1452_v42 = vadd.f32 %v1451_v31, %v1437_v24  ;;  %v4272_v28 = vld [vmem:[#allocation98_spill] sm:$0xff]  ;;  %v1360_v31 = vmul.f32 %v1344_v17, %v4276_v51 }
 0x198   : > { %v1362_v48 = vmul.f32 %v1346_v14, %v4276_v51  ;;  %v4285_v17 = vld [vmem:[#allocation102_spill] sm:$0xff] }
 0x199   : > { %v985_v49 = vadd.f32 %v984_v52, %v970_v12  ;;  %v1333_v12 = vadd.f32 %v1309_v30, %v4272_v28  ;;  %v1347_v28 = vand.u32 2147483647, %v1107_v50 }
 0x19a   : > { %v1199_v36 = vpop.permute.xlu0 %1198 }
 0x19b   : > { %v986_v60 = vadd.f32 %v985_v49, %v971_v40  ;;  %v1342_v40 = vand.u32 2147483647, %v1102_v13  ;;  %v1406_v54 = vmul.f32 %v1333_v12, %v1221_v34  ;;  %v1201_v26 = vpop.permute.xlu1 %1200  ;;  %v4278_v49 = vld [vmem:[#allocation100_spill] sm:$0xff]  ;;  %v4281_v13 = vld [vmem:[#allocation97_spill] sm:$0xff] }
 0x19c   : > { %v1223_v11 = vadd.f32 %v1201_v26, %v4278_v49  ;;  %v1108_v24 = vadd.f32 %v1083_v59, %v4281_v13  ;;  %v4284_v59 = vld [vmem:[#allocation96_spill] sm:$0xff]  ;;  %v4290_v49 = vld [vmem:[#allocation107_spill] sm:$0xff] }
 0x19d   : > { %v987_v37 = vadd.f32 %v986_v60, %v972_v27  ;;  %v4273_v27 = vld [vmem:[#allocation99_spill] sm:$0xff]  ;;  %v1422_v7 = vand.u32 2147483647, %v1406_v54  ;;  %v1358_v21 = vmul.f32 %v1342_v40, %v4276_v51  ;;  %v4279_v60 = vld [vmem:[#allocation104_spill] sm:$0xff]  ;;  %v1109_v29 = vadd.f32 %v3726_v5, %v4284_v59 }
 0x19e   : > { %v1334_v25 = vadd.f32 %v1311_v39, %v4273_v27  ;;  %v1087_v4 = vpop.permute.xlu0 %1086  ;;  %v1348_v12 = vand.u32 2147483647, %v1108_v24 }
 0x19f   : > { %v988_v43 = vadd.f32 %v987_v37, %v973_v16  ;;  %v1222_v16 = vadd.f32 %v1199_v36, %v4274_v20  ;;  %v1438_v47 = vmul.f32 %v1422_v7, %v4228_v19  ;;  %v1089_v61 = vpop.permute.xlu1 %1088  ;;  %v1374_v56 = vadd.f32 %v1359_v1, %v1358_v21 }
 0x1a0   : > { %v1361_v37 = vmul.f32 %v1345_v22, %v4276_v51  ;;  %v1110_v27 = vadd.f32 %v1087_v4, %v4285_v17  ;;  %v1364_v7 = vmul.f32 %v1348_v12, %v4276_v51  ;;  %v4288_v4 = vld [vmem:[#allocation103_spill] sm:$0xff] }
 0x1a1   : > { %989 = vadd.xlane.f32.xlu0 %v988_v43  ;;  %v1407_v32 = vmul.f32 %v1334_v25, %v1222_v16  ;;  %v1453_v63 = vadd.f32 %v1452_v42, %v1438_v47  ;;  %v1375_v23 = vadd.f32 %v1374_v56, %v1360_v31  ;;  %v4283_v42 = vld [vmem:[#allocation105_spill] sm:$0xff]  ;;  %v1363_v16 = vmul.f32 %v1347_v28, %v4276_v51  ;;  %v4289_v56 = vld [vmem:[#allocation67_spill] sm:$0xff] }
 0x1a2   : > { %v1313_v58 = vpop.permute.xlu0 %1312  ;;  %v1350_v1 = vand.u32 2147483647, %v1110_v27  ;;  %v1111_v22 = vadd.f32 %v1089_v61, %v4288_v4 }
 0x1a3   : > { %v1423_v33 = vand.u32 2147483647, %v1407_v32  ;;  %v1315_v3 = vpop.permute.xlu1 %1314  ;;  %v1335_v10 = vadd.f32 %v1313_v58, %v4279_v60  ;;  %v1376_v45 = vadd.f32 %v1375_v23, %v1361_v37  ;;  %v1349_v32 = vand.u32 2147483647, %v1109_v29  ;;  %v4291_v60 = vld [vmem:[#allocation108_spill] sm:$0xff] }
 0x1a4   : > { %v1336_v6 = vadd.f32 %v1315_v3, %v4282_v46  ;;  %v1351_v2 = vand.u32 2147483647, %v1111_v22  ;;  %v4293_v29 = vld [vmem:[#allocation112_spill] sm:$0xff]  ;;  %v4296_v22 = vld [vmem:[#allocation118_spill] sm:$0xff] }
 0x1a5   : > { %v1439_v52 = vmul.f32 %v1423_v33, %v4228_v19  ;;  %v1408_v39 = vmul.f32 %v1335_v10, %v1223_v11  ;;  %v1377_v36 = vadd.f32 %v1376_v45, %v1362_v48  ;;  %v4287_v33 = vld [vmem:[#allocation106_spill] sm:$0xff]  ;;  %v1365_v14 = vmul.f32 %v1349_v32, %v4276_v51  ;;  %v4292_v45 = vld [vmem:[#allocation20_spill] sm:$0xff] }
 0x1a6   : > { %v1203_v43 = vpop.permute.xlu0 %1202 }
 0x1a7   : > { %v1454_v15 = vadd.f32 %v1453_v63, %v1439_v52  ;;  %v1205_v30 = vpop.permute.xlu1 %1204  ;;  %v1224_v8 = vadd.f32 %v1203_v43, %v4283_v42  ;;  %v1424_v34 = vand.u32 2147483647, %v1408_v39  ;;  %v1378_v47 = vadd.f32 %v1377_v36, %v1363_v16 }
 0x1a8   : > { %v1225_v41 = vadd.f32 %v1205_v30, %v4286_v38 }
 0x1a9   : > { %v1409_v40 = vmul.f32 %v1336_v6, %v1224_v8  ;;  %v1440_v54 = vmul.f32 %v1424_v34, %v4228_v19  ;;  %v1379_v63 = vadd.f32 %v1378_v47, %v1364_v7  ;;  %v1367_v8 = vmul.f32 %v1351_v2, %v4276_v51 }
 0x1aa   : > { %v1091_v44 = vpop.permute.xlu0 %1090 }
 0x1ab   : > { %v1093_v26 = vpop.permute.xlu1 %1092  ;;  %v1425_v25 = vand.u32 2147483647, %v1409_v40  ;;  %v1455_v20 = vadd.f32 %v1454_v15, %v1440_v54  ;;  %v1112_v52 = vadd.f32 %v1091_v44, %v4289_v56  ;;  %v1366_v15 = vmul.f32 %v1350_v1, %v4276_v51 }
 0x1ac   : > { %v1380_v50 = vadd.f32 %v1379_v63, %v1365_v14  ;;  %v1113_v48 = vadd.f32 %v1093_v26, %v4292_v45  ;;  %v4295_v63 = vld [vmem:[#allocation119_spill] sm:$0xff]  ;;  %v4297_v14 = vld [vmem:[#allocation117_spill] sm:$0xff] }
 0x1ad   : > { %v1441_v35 = vmul.f32 %v1425_v25, %v4228_v19  ;;  %v1352_v13 = vand.u32 2147483647, %v1112_v52 }
 0x1ae   : > { %v1317_v21 = vpop.permute.xlu0 %1316  ;;  %v1381_v43 = vadd.f32 %v1380_v50, %v1366_v15  ;;  %v1353_v54 = vand.u32 2147483647, %v1113_v48 }
 0x1af   : > { %v1319_v18 = vpop.permute.xlu1 %1318  ;;  %v1456_v31 = vadd.f32 %v1455_v20, %v1441_v35  ;;  %v1337_v5 = vadd.f32 %v1317_v21, %v4287_v33  ;;  %v1368_v34 = vmul.f32 %v1352_v13, %v4276_v51  ;;  %v4294_v21 = vld [vmem:[#allocation116_spill] sm:$0xff] }
 0x1b0   : > { %v1338_v11 = vadd.f32 %v1319_v18, %v4290_v49  ;;  %v1382_v44 = vadd.f32 %v1381_v43, %v1367_v8  ;;  %v1369_v7 = vmul.f32 %v1353_v54, %v4276_v51 }
 0x1b1   : > { %v1410_v3 = vmul.f32 %v1337_v5, %v1225_v41 }
 0x1b2   : > { %v1207_v23 = vpop.permute.xlu0 %1206  ;;  %v1383_v27 = vadd.f32 %v1382_v44, %v1368_v34 }
 0x1b3   : > { %v1209_v58 = vpop.permute.xlu1 %1208  ;;  %v1226_v10 = vadd.f32 %v1207_v23, %v4291_v60  ;;  %v1426_v37 = vand.u32 2147483647, %v1410_v3 }
 0x1b4   : > { %v1227_v17 = vadd.f32 %v1209_v58, %v4293_v29 }
 0x1b5   : > { %v1411_v24 = vmul.f32 %v1338_v11, %v1226_v10  ;;  %v1442_v61 = vmul.f32 %v1426_v37, %v4228_v19  ;;  %v4298_v10 = vld [vmem:[#allocation120_spill] sm:$0xff] }
 0x1b6   : > { %v1095_v30 = vpop.permute.xlu0 %1094 }
 0x1b7   : > { %v1097_v39 = vpop.permute.xlu1 %1096  ;;  %v1427_v46 = vand.u32 2147483647, %v1411_v24  ;;  %v1114_v6 = vadd.f32 %v1095_v30, %v3278_v53  ;;  %v1457_v42 = vadd.f32 %v1456_v31, %v1442_v61  ;;  %v1384_v31 = vadd.f32 %v1383_v27, %v1369_v7 }
 0x1b8   : > { %v1115_v53 = vadd.f32 %v1097_v39, %v3306_v57 }
 0x1b9   : > { %v1443_v28 = vmul.f32 %v1427_v46, %v4228_v19  ;;  %v1354_v59 = vand.u32 2147483647, %v1114_v6 }
 0x1ba   : > { %v1321_v40 = vpop.permute.xlu0 %1320  ;;  %v1355_v1 = vand.u32 2147483647, %v1115_v53 }
 0x1bb   : > { %v1323_v12 = vpop.permute.xlu1 %1322  ;;  %v1458_v36 = vadd.f32 %v1457_v42, %v1443_v28  ;;  %v1339_v26 = vadd.f32 %v1321_v40, %v3327_v9  ;;  %v1370_v35 = vmul.f32 %v1354_v59, %v4276_v51 }
 0x1bc   : > { %v1340_v18 = vadd.f32 %v1323_v12, %v3333_v62  ;;  %v1371_v3 = vmul.f32 %v1355_v1, %v4276_v51 }
 0x1bd   : > { %v1412_v25 = vmul.f32 %v1339_v26, %v1227_v17  ;;  %v1385_v57 = vadd.f32 %v1384_v31, %v1370_v35 }
 0x1be   : > { %v1211_v16 = vpop.permute.xlu0 %1210 }
 0x1bf   : > { %v1213_v20 = vpop.permute.xlu1 %1212  ;;  %v1228_v32 = vadd.f32 %v1211_v16, %v4294_v21  ;;  %v1428_v47 = vand.u32 2147483647, %v1412_v25  ;;  %v1386_v11 = vadd.f32 %v1385_v57, %v1371_v3 }
 0x1c0   : > { %v1229_v15 = vadd.f32 %v1213_v20, %v4297_v14 }
 0x1c1   : > { %v1413_v38 = vmul.f32 %v1340_v18, %v1228_v32  ;;  %v1444_v9 = vmul.f32 %v1428_v47, %v4228_v19 }
 0x1c2   : > { %v1099_v33 = vpop.permute.xlu0 %1098 }
 0x1c3   : > { %v1101_v41 = vpop.permute.xlu1 %1100  ;;  %v1429_v5 = vand.u32 2147483647, %v1413_v38  ;;  %v1116_v56 = vadd.f32 %v1099_v33, %v4296_v22  ;;  %v1459_v52 = vadd.f32 %v1458_v36, %v1444_v9 }
 0x1c4   : > { %v1117_v4 = vadd.f32 %v1101_v41, %v4295_v63 }
 0x1c5   : > { %v1445_v62 = vmul.f32 %v1429_v5, %v4228_v19  ;;  %v1356_v23 = vand.u32 2147483647, %v1116_v56 }
 0x1c6   : > { %v1357_v58 = vand.u32 2147483647, %v1117_v4  ;;  %v1325_v49 = vpop.permute.xlu0 %1324 }
 0x1c7   : > { %v1372_v60 = vmul.f32 %v1356_v23, %v4276_v51  ;;  %v1341_v37 = vadd.f32 %v1325_v49, %v4298_v10  ;;  %v1460_v2 = vadd.f32 %v1459_v52, %v1445_v62 }
 0x1c8   : > { %v1373_v50 = vmul.f32 %v1357_v58, %v4276_v51 }
 0x1c9   : > { %v1387_v13 = vadd.f32 %v1386_v11, %v1372_v60  ;;  %v1414_v24 = vmul.f32 %v1341_v37, %v1229_v15 }
 0x1cb   : > { %v1430_v61 = vand.u32 2147483647, %v1414_v24  ;;  %v1388_v39 = vadd.f32 %v1387_v13, %v1373_v50 }
 0x1cd   : > { %v1446_v30 = vmul.f32 %v1430_v61, %v4228_v19  ;;  %1389 = vadd.xlane.f32.xlu1 %v1388_v39 }
 0x1cf   : > { %v1461_v43 = vadd.f32 %v1460_v2, %v1446_v30 }
 0x1d1   : > { %1462 = vadd.xlane.f32.xlu0 %v1461_v43 }
 0x204   : > { %v344_v45 = vpop.xlane.xlu0 %343 }
 0x205   : > { %v345_v48 = vrot.slane %v344_v45, 4  ;;  %v356_v46 = vpop.xlane.xlu1 %355 }
 0x206   : > { %v357_v6 = vrot.slane %v356_v46, 4 }
 0x207   : > { %v346_v42 = vadd.f32 %v345_v48, %v344_v45 }
 0x208   : > { %v358_v8 = vadd.f32 %v357_v6, %v356_v46 }
 0x209   : > { %v347_v28 = vrot.slane %v346_v42, 2  ;;  %v432_v40 = vpop.xlane.xlu1 %431 }
 0x20a   : > { %v372_v34 = vpop.xlane.xlu0 %371  ;;  %v359_v51 = vrot.slane %v358_v8, 2  ;;  %v433_v54 = vrot.slane %v432_v40, 4 }
 0x20b   : > { %v373_v12 = vrot.slane %v372_v34, 4  ;;  %v348_v36 = vadd.f32 %v347_v28, %v346_v42 }
 0x20c   : > { %v434_v59 = vadd.f32 %v433_v54, %v432_v40  ;;  %v360_v19 = vadd.f32 %v359_v51, %v358_v8  ;;  %v4299_v40 = vld [vmem:[#allocation10_spill] sm:$0xff] (!%p1775_p9)  ;;  %v4300_v54 = vld [vmem:[#allocation12_spill] sm:$0xff] (!%p1775_p9) }
 0x20d   : > { %v374_v44 = vadd.f32 %v373_v12, %v372_v34  ;;  %v917_v27 = vpop.xlane.xlu1 %916  ;;  %v349_v53 = vrot.slane %v348_v36, 1  ;;  %v1495_v51 = vmul.f32 (!%p1775_p9), 0.5, %v4299_v40 }
 0x20e   : > { %v386_v29 = vpop.xlane.xlu0 %385  ;;  %v435_v25 = vrot.slane %v434_v59, 2  ;;  %v918_v20 = vrot.slane %v917_v27, 4  ;;  %v361_v16 = vrot.slane %v360_v19, 1 }
 0x20f   : > { %v375_v17 = vrot.slane %v374_v44, 2  ;;  %v387_v26 = vrot.slane %v386_v29, 4  ;;  %v350_v35 = vadd.f32 %v349_v53, %v348_v36  ;;  %v4301_v36 = vld [vmem:[#allocation15_spill] sm:$0xff] (!%p1775_p9)  ;;  %1878 = vtanh.f32 (!%p1775_p9), %v1495_v51  ;;  %v4317_v51 = vld [vmem:[#allocation29_spill] sm:$0xff] (!%p1775_p9) }
 0x210   : > { %v919_v21 = vadd.f32 %v918_v20, %v917_v27  ;;  %v362_v47 = vadd.f32 %v361_v16, %v360_v19  ;;  %v436_v1 = vadd.f32 %v435_v25, %v434_v59  ;;  %v1497_v59 = vmul.f32 (!%p1775_p9), 0.5, %v4301_v36  ;;  %v4304_v27 = vld [vmem:[#allocation26_spill] sm:$0xff] (!%p1775_p9)  ;;  %v4305_v25 = vld [vmem:[#allocation32_spill] sm:$0xff] (!%p1775_p9)  ;;  %v4306_v16 = vld [vmem:[#allocation31_spill] sm:$0xff] (!%p1775_p9) }
 0x211   : > { %v388_v7 = vadd.f32 %v387_v26, %v386_v29  ;;  %v376_v18 = vadd.f32 %v375_v17, %v374_v44  ;;  %1781 = vpush %v350_v35  ;;  %v1496_v44 = vmul.f32 (!%p1775_p9), 0.5, %v4300_v54  ;;  %v4302_v29 = vld [vmem:[#allocation16_spill] sm:$0xff] (!%p1775_p9)  ;;  %v4303_v17 = vld [vmem:[#allocation25_spill] sm:$0xff] (!%p1775_p9)  ;;  %v1500_v53 = vmul.f32 (!%p1775_p9), 0.5, %v4304_v27 }
 0x212   : > { %v502_v32 = vpop.xlane.xlu0 %501  ;;  %v920_v41 = vrot.slane %v919_v21, 2  ;;  %1783 = vpush %v362_v47  ;;  %v437_v33 = vrot.slane %v436_v1, 1  ;;  %v1498_v19 = vmul.f32 (!%p1775_p9), 0.5, %v4302_v29  ;;  %v1499_v26 = vmul.f32 (!%p1775_p9), 0.5, %v4303_v17 }
 0x213   : > { %v389_v31 = vrot.slane %v388_v7, 2  ;;  %v503_v38 = vrot.slane %v502_v32, 4  ;;  %v377_v9 = vrot.slane %v376_v18, 1  ;;  %1880 = vtanh.f32 (!%p1775_p9), %v1496_v44 }
 0x214   : > { %v921_v4 = vadd.f32 %v920_v41, %v919_v21  ;;  %v438_v52 = vadd.f32 %v437_v33, %v436_v1  ;;  %v1501_v20 = vmul.f32 (!%p1775_p9), 0.5, %v4305_v25  ;;  %1882 = vtanh.f32 (!%p1775_p9), %v1497_v59 }
 0x215   : > { %v504_v57 = vadd.f32 %v503_v38, %v502_v32  ;;  %v378_v5 = vadd.f32 %v377_v9, %v376_v18  ;;  %v390_v63 = vadd.f32 %v389_v31, %v388_v7  ;;  %v1502_v7 = vmul.f32 (!%p1775_p9), 0.5, %v4306_v16  ;;  %v4307_v18 = vld [vmem:[#allocation38_spill] sm:$0xff] (!%p1775_p9)  ;;  %v4308_v32 = vld [vmem:[#allocation53_spill] sm:$0xff] (!%p1775_p9) }
 0x216   : > { %v922_v3 = vrot.slane %v921_v4, 1  ;;  %1884 = vtanh.f32 (!%p1775_p9), %v1498_v19  ;;  %v1503_v35 = vmul.f32 (!%p1775_p9), 0.5, %v2564_v0  ;;  %v1504_v21 = vmul.f32 (!%p1775_p9), 0.5, %v4307_v18  ;;  %v4309_v9 = vld [vmem:[#allocation57_spill] sm:$0xff] (!%p1775_p9)  ;;  %v4318_v19 = vld [vmem:[#allocation30_spill] sm:$0xff] (!%p1775_p9) }
 0x217   : > { %v505_v22 = vrot.slane %v504_v57, 2  ;;  %1785 = vpush %v378_v5  ;;  %v391_v56 = vrot.slane %v390_v63, 1  ;;  %1886 = vtanh.f32 (!%p1775_p9), %v1499_v26  ;;  %v1505_v47 = vmul.f32 (!%p1775_p9), 0.5, %v4308_v32  ;;  %v4320_v32 = vld [vmem:[#allocation40_spill] sm:$0xff] (!%p1775_p9) }
 0x218   : > { %v923_v14 = vadd.f32 %v922_v3, %v921_v4  ;;  %1888 = vtanh.f32 (!%p1775_p9), %v1500_v53  ;;  %v1506_v1 = vmul.f32 (!%p1775_p9), 0.5, %v2680_v55  ;;  %v1507_v41 = vmul.f32 (!%p1775_p9), 0.5, %v4309_v9  ;;  %v4311_v3 = vld [vmem:[#allocation62_spill] sm:$0xff] (!%p1775_p9) }
 0x219   : > { %v392_v62 = vadd.f32 %v391_v56, %v390_v63  ;;  %v506_v58 = vadd.f32 %v505_v22, %v504_v57  ;;  %1890 = vtanh.f32 (!%p1775_p9), %v1501_v20  ;;  %v1879_v31 = vpop.eup (!%p1775_p9), %1878  ;;  %v4310_v63 = vld [vmem:[#allocation59_spill] sm:$0xff] (!%p1775_p9) }
 0x21a   : > { %1892 = vtanh.f32 (!%p1775_p9), %v1502_v7  ;;  %v1527_v33 = vmul.f32 (!%p1775_p9), 0.5, %v1879_v31  ;;  %v1508_v4 = vmul.f32 (!%p1775_p9), 0.5, %v4310_v63  ;;  %v4319_v20 = vld [vmem:[#allocation35_spill] sm:$0xff] (!%p1775_p9) }
 0x21b   : > { %1787 = vpush %v392_v62  ;;  %v507_v23 = vrot.slane %v506_v58, 1  ;;  %1894 = vtanh.f32 (!%p1775_p9), %v1503_v35  ;;  %v1509_v62 = vmul.f32 (!%p1775_p9), 0.5, %v4311_v3  ;;  %v4322_v3 = vld [vmem:[#allocation49_spill] sm:$0xff] (!%p1775_p9) }
 0x21c   : > { %1789 = vpush %v438_v52  ;;  %1896 = vtanh.f32 (!%p1775_p9), %v1504_v21  ;;  %v1543_v56 = vadd.f32 (!%p1775_p9), 0.5, %v1527_v33 }
 0x21d   : > { %v508_v15 = vadd.f32 %v507_v23, %v506_v58  ;;  %v1881_v38 = vpop.eup (!%p1775_p9), %1880  ;;  %1898 = vtanh.f32 (!%p1775_p9), %v1505_v47 }
 0x21e   : > { %v1883_v57 = vpop.eup (!%p1775_p9), %1882  ;;  %v1528_v0 = vmul.f32 (!%p1775_p9), 0.5, %v1881_v38  ;;  %1900 = vtanh.f32 (!%p1775_p9), %v1506_v1 }
 0x21f   : > { %1791 = vpush %v508_v15  ;;  %v1529_v22 = vmul.f32 (!%p1775_p9), 0.5, %v1883_v57  ;;  %1902 = vtanh.f32 (!%p1775_p9), %v1507_v41  ;;  %v4321_v57 = vld [vmem:[#allocation47_spill] sm:$0xff] (!%p1775_p9) }
 0x220   : > { %1793 = vpush %v923_v14  ;;  %v1885_v5 = vpop.eup (!%p1775_p9), %1884  ;;  %v1544_v55 = vadd.f32 (!%p1775_p9), 0.5, %v1528_v0  ;;  %1904 = vtanh.f32 (!%p1775_p9), %v1508_v4 }
 0x221   : > { %v1887_v52 = vpop.eup (!%p1775_p9), %1886  ;;  %v1530_v58 = vmul.f32 (!%p1775_p9), 0.5, %v1885_v5  ;;  %v1545_v15 = vadd.f32 (!%p1775_p9), 0.5, %v1529_v22  ;;  %1906 = vtanh.f32 (!%p1775_p9), %v1509_v62 }
 0x222   : > { %v1889_v23 = vpop.eup (!%p1775_p9), %1888  ;;  %v1531_v14 = vmul.f32 (!%p1775_p9), 0.5, %v1887_v52 }
 0x22e   : > { %v990_v49 = vpop.xlane.xlu0 %989 }
 0x22f   : > { %v991_v11 = vrot.slane %v990_v49, 4 }
 0x231   : > { %v992_v60 = vadd.f32 %v991_v11, %v990_v49  ;;  %v4312_v49 = vld [vmem:[#allocation14_spill] sm:$0xff] (!%p1775_p9) }
 0x232   : > { %v1559_v11 = vmul.f32 (!%p1775_p9), %v1543_v56, %v4312_v49  ;;  %v1599_v38 = vadd.f32 (!%p1775_p9), %v1543_v56, %v4312_v49 }
 0x233   : > { %v993_v10 = vrot.slane %v992_v60, 2 }
 0x235   : > { %v994_v37 = vadd.f32 %v993_v10, %v992_v60  ;;  %v1891_v60 = vpop.eup (!%p1775_p9), %1890  ;;  %v4313_v10 = vld [vmem:[#allocation65_spill] sm:$0xff] (!%p1775_p9) }
 0x237   : > { %v995_v2 = vrot.slane %v994_v37, 1 }
 0x239   : > { %v996_v50 = vadd.f32 %v995_v2, %v994_v37  ;;  %v1510_v37 = vmul.f32 (!%p1775_p9), 0.5, %v4313_v10  ;;  %v1532_v2 = vmul.f32 (!%p1775_p9), 0.5, %v1889_v23 }
 0x23b   : > { %1795 = vpush %v996_v50  ;;  %v1546_v50 = vadd.f32 (!%p1775_p9), 0.5, %v1530_v58  ;;  %1908 = vtanh.f32 (!%p1775_p9), %v1510_v37 }
 0x242   : > { %s1782_s11 = spop %1781 }
 0x243   : > { %s1784_s22 = spop %1783 }
 0x244   : > { %s364_s12 = sadd.f32 %s1784_s22, %s1782_s11  ;;  %s3800_s22 = scalar_lea.vmem %s3872_s3, %s4338_s16 }
 0x248   : > { %s1786_s24 = spop %1785 }
 0x24c   : > { %s1788_s23 = spop %1787 }
 0x24d   : > { %s1790_s10 = spop %1789  ;;  %s394_s29 = sadd.f32 %s1788_s23, %s1786_s24 }
 0x24e   : > { %s440_s18 = smul.f32 0.5, %s1790_s10 }
 0x250   : > { %s1792_s7 = spop %1791  ;;  %s441_s19 = sadd.f32 %s440_s18, %s364_s12 }
 0x251   : > { %s510_s4 = smul.f32 0.25, %s1792_s7  ;;  %s1794_s25 = spop %1793 }
 0x252   : > { %s925_s21 = sadd.f32 %s1794_s25, %s441_s19 }
 0x253   : > { %s511_s27 = sadd.f32 %s510_s4, %s394_s29 }
 0x25a   : > { %v1390_v13 = vpop.xlane.xlu1 %1389 }
 0x25b   : > { %v1391_v24 = vrot.slane %v1390_v13, 4 }
 0x25d   : > { %v1392_v61 = vadd.f32 %v1391_v24, %v1390_v13  ;;  %v4314_v13 = vld [vmem:[#allocation13_spill] sm:$0xff] (!%p1775_p9) }
 0x25e   : > { %v1463_v39 = vpop.xlane.xlu0 %1462  ;;  %v1560_v24 = vmul.f32 (!%p1775_p9), %v1544_v55, %v4314_v13  ;;  %v1600_v9 = vadd.f32 (!%p1775_p9), %v1544_v55, %v4314_v13  ;;  %v4323_v55 = vld [vmem:[#allocation54_spill] sm:$0xff] (!%p1775_p9) }
 0x25f   : > { %v1393_v30 = vrot.slane %v1392_v61, 2  ;;  %v1464_v43 = vrot.slane %v1463_v39, 4 }
 0x261   : > { %v1394_v45 = vadd.f32 %v1393_v30, %v1392_v61  ;;  %v1465_v48 = vadd.f32 %v1464_v43, %v1463_v39  ;;  %v1893_v61 = vpop.eup (!%p1775_p9), %1892  ;;  %v1533_v39 = vmul.f32 (!%p1775_p9), 0.5, %v1891_v60  ;;  %v1547_v30 = vadd.f32 (!%p1775_p9), 0.5, %v1531_v14  ;;  %v4315_v43 = vld [vmem:[#allocation18_spill] sm:$0xff] (!%p1775_p9) }
 0x262   : > { %v1601_v4 = vadd.f32 (!%p1775_p9), %v1545_v15, %v4315_v43 }
 0x263   : > { %v1466_v46 = vrot.slane %v1465_v48, 2  ;;  %v1395_v6 = vrot.slane %v1394_v45, 1  ;;  %v1549_v40 = vadd.f32 (!%p1775_p9), 0.5, %v1533_v39  ;;  %v1563_v54 = vmul.f32 (!%p1775_p9), %v1547_v30, %v4317_v51 }
 0x264   : > { %v1603_v37 = vadd.f32 (!%p1775_p9), %v1547_v30, %v4317_v51 }
 0x265   : > { %v1467_v42 = vadd.f32 %v1466_v46, %v1465_v48  ;;  %v1396_v8 = vadd.f32 %v1395_v6, %v1394_v45  ;;  %v1561_v45 = vmul.f32 (!%p1775_p9), %v1545_v15, %v4315_v43  ;;  %v1895_v48 = vpop.eup (!%p1775_p9), %1894  ;;  %v1534_v46 = vmul.f32 (!%p1775_p9), 0.5, %v1893_v61  ;;  %v4324_v15 = vld [vmem:[#allocation55_spill] sm:$0xff] (!%p1775_p9) }
 0x266   : > { %v1548_v6 = vadd.f32 (!%p1775_p9), 0.5, %v1532_v2  ;;  %v1565_v16 = vmul.f32 (!%p1775_p9), %v1549_v40, %v4319_v20 }
 0x267   : > { %1797 = vpush %v1396_v8  ;;  %v1468_v34 = vrot.slane %v1467_v42, 1  ;;  %v1550_v29 = vadd.f32 (!%p1775_p9), 0.5, %v1534_v46  ;;  %v4325_v46 = vld [vmem:[#allocation58_spill] sm:$0xff] (!%p1775_p9) }
 0x268   : > { %v1564_v17 = vmul.f32 (!%p1775_p9), %v1548_v6, %v4318_v19  ;;  %v1604_v43 = vadd.f32 (!%p1775_p9), %v1548_v6, %v4318_v19 }
 0x269   : > { %v1469_v28 = vadd.f32 %v1468_v34, %v1467_v42  ;;  %v4316_v42 = vld [vmem:[#allocation23_spill] sm:$0xff] (!%p1775_p9)  ;;  %v1575_v34 = vadd.f32 (!%p1775_p9), %v1560_v24, %v1559_v11  ;;  %v1566_v47 = vmul.f32 (!%p1775_p9), %v1550_v29, %v4320_v32  ;;  %v1615_v11 = vadd.f32 (!%p1775_p9), %v1600_v9, %v1599_v38 }
 0x26a   : > { %v1562_v8 = vmul.f32 (!%p1775_p9), %v1546_v50, %v4316_v42  ;;  %v1602_v14 = vadd.f32 (!%p1775_p9), %v1546_v50, %v4316_v42  ;;  %v1606_v51 = vadd.f32 (!%p1775_p9), %v1550_v29, %v4320_v32 }
 0x26b   : > { %1799 = vpush %v1469_v28  ;;  %v1897_v28 = vpop.eup (!%p1775_p9), %1896  ;;  %v1576_v44 = vadd.f32 (!%p1775_p9), %v1575_v34, %v1561_v45  ;;  %v1616_v2 = vadd.f32 (!%p1775_p9), %v1615_v11, %v1601_v4 }
 0x26c   : > { %s1796_s5 = spop %1795  ;;  %v1899_v36 = vpop.eup (!%p1775_p9), %1898  ;;  %v1536_v59 = vmul.f32 (!%p1775_p9), 0.5, %v1897_v28 }
 0x26d   : > { %s998_s6 = sadd.f32 %s1796_s5, %s511_s27  ;;  %v1577_v26 = vadd.f32 (!%p1775_p9), %v1576_v44, %v1562_v8  ;;  %v1901_v27 = vpop.eup (!%p1775_p9), %1900  ;;  %v1537_v53 = vmul.f32 (!%p1775_p9), 0.5, %v1899_v36  ;;  %v1617_v45 = vadd.f32 (!%p1775_p9), %v1616_v2, %v1602_v14  ;;  %v1605_v8 = vadd.f32 (!%p1775_p9), %v1549_v40, %v4319_v20  ;;  %v4327_v36 = vld [vmem:[#allocation63_spill] sm:$0xff] (!%p1775_p9) }
 0x26e   : > { %v1903_v35 = vpop.eup (!%p1775_p9), %1902  ;;  %v1538_v18 = vmul.f32 (!%p1775_p9), 0.5, %v1901_v27  ;;  %v1552_v21 = vadd.f32 (!%p1775_p9), 0.5, %v1536_v59 }
 0x26f   : > { %v1578_v7 = vadd.f32 (!%p1775_p9), %v1577_v26, %v1563_v54  ;;  %v1905_v31 = vpop.eup (!%p1775_p9), %1904  ;;  %v1539_v41 = vmul.f32 (!%p1775_p9), 0.5, %v1903_v35  ;;  %v1553_v33 = vadd.f32 (!%p1775_p9), 0.5, %v1537_v53  ;;  %v1618_v34 = vadd.f32 (!%p1775_p9), %v1617_v45, %v1603_v37  ;;  %v4328_v26 = vld [vmem:[#allocation66_spill] sm:$0xff] (!%p1775_p9) }
 0x270   : > { %v1907_v63 = vpop.eup (!%p1775_p9), %1906  ;;  %v1540_v22 = vmul.f32 (!%p1775_p9), 0.5, %v1905_v31  ;;  %v1554_v52 = vadd.f32 (!%p1775_p9), 0.5, %v1538_v18  ;;  %v1568_v62 = vmul.f32 (!%p1775_p9), %v1552_v21, %v4322_v3 }
 0x271   : > { %v1579_v1 = vadd.f32 (!%p1775_p9), %v1578_v7, %v1564_v17  ;;  %v1909_v23 = vpop.eup (!%p1775_p9), %1908  ;;  %v1541_v56 = vmul.f32 (!%p1775_p9), 0.5, %v1907_v63  ;;  %v1555_v49 = vadd.f32 (!%p1775_p9), 0.5, %v1539_v41  ;;  %v1569_v60 = vmul.f32 (!%p1775_p9), %v1553_v33, %v4323_v55 }
 0x272   : > { %v1542_v13 = vmul.f32 (!%p1775_p9), 0.5, %v1909_v23  ;;  %v1556_v24 = vadd.f32 (!%p1775_p9), 0.5, %v1540_v22  ;;  %v1570_v61 = vmul.f32 (!%p1775_p9), %v1554_v52, %v4324_v15  ;;  %v1619_v44 = vadd.f32 (!%p1775_p9), %v1618_v34, %v1604_v43 }
 0x273   : > { %v1580_v5 = vadd.f32 (!%p1775_p9), %v1579_v1, %v1565_v16  ;;  %v1571_v50 = vmul.f32 (!%p1775_p9), %v1555_v49, %v4325_v46  ;;  %v1608_v16 = vadd.f32 (!%p1775_p9), %v1552_v21, %v4322_v3  ;;  %v1609_v7 = vadd.f32 (!%p1775_p9), %v1553_v33, %v4323_v55 }
 0x274   : > { %v1558_v28 = vadd.f32 (!%p1775_p9), 0.5, %v1542_v13  ;;  %v1620_v19 = vadd.f32 (!%p1775_p9), %v1619_v44, %v1605_v8  ;;  %v1610_v29 = vadd.f32 (!%p1775_p9), %v1554_v52, %v4324_v15 }
 0x275   : > { %v1581_v58 = vadd.f32 (!%p1775_p9), %v1580_v5, %v1566_v47  ;;  %v1611_v47 = vadd.f32 (!%p1775_p9), %v1555_v49, %v4325_v46 }
 0x276   : > { %v1574_v27 = vmul.f32 (!%p1775_p9), %v1558_v28, %v4328_v26  ;;  %v1621_v40 = vadd.f32 (!%p1775_p9), %v1620_v19, %v1606_v51  ;;  %v1614_v21 = vadd.f32 (!%p1775_p9), %v1558_v28, %v4328_v26 }
 0x298   : > { %s1798_s28 = spop %1797 }
 0x299   : > { %s1398_s30 = sadd.f32 %s1798_s28, %s925_s21 }
 0x29b   : > { %s1472_s8 = smul.f32 7.6293946e-07, %s1398_s30 }
 0x29c   : > { %s1800_s15 = spop %1799 }
 0x29d   : > { %s1471_s26 = sadd.f32 %s1800_s15, %s998_s6 }
 0x29e   : > { %1494 = sbr.rel (%p1775_p9) target bundleno = 980 (0x3d4), region = 48 }
 0x29f   : > { %s1473_s0 = smul.f32 1.2715658e-06, %s1471_s26 }
 0x2a1   : > { %s1474_s24 = sadd.f32 %s1473_s0, %s1472_s8 }
 0x2a3   : > { %v1475_v12 = vstv %s1474_s24 }
 0x2a4   : > { %1478 = vst.msk [vmem:[%s3800_s22] sm:$0x1] %vm1477_vm7, %v1475_v12  ;;  %v1535_v12 = vmul.f32 (!%p1775_p9), 0.5, %v1895_v48  ;;  %v1557_v48 = vadd.f32 (!%p1775_p9), 0.5, %v1541_v56 }
 0x2a6   : > { %v1551_v25 = vadd.f32 0.5, %v1535_v12  ;;  %v4326_v12 = vld [vmem:[#allocation60_spill] sm:$0xff]  ;;  %v1573_v59 = vmul.f32 %v1557_v48, %v4327_v36  ;;  %v1613_v38 = vadd.f32 %v1557_v48, %v4327_v36 }
 0x2a7   : > { %v1572_v54 = vmul.f32 %v1556_v24, %v4326_v12 }
 0x2a8   : > { %v1567_v0 = vmul.f32 %v1551_v25, %v4321_v57  ;;  %v1607_v6 = vadd.f32 %v1551_v25, %v4321_v57  ;;  %v1612_v25 = vadd.f32 %v1556_v24, %v4326_v12 }
 0x2aa   : > { %v1582_v10 = vadd.f32 %v1581_v58, %v1567_v0  ;;  %v1622_v35 = vadd.f32 %v1621_v40, %v1607_v6 }
 0x2ac   : > { %v1583_v39 = vadd.f32 %v1582_v10, %v1568_v62  ;;  %v1623_v32 = vadd.f32 %v1622_v35, %v1608_v16  ;;  %v1647_v10 = vld [vmem:[%s3800_s22] sm:$0x1] }
 0x2ae   : > { %v1584_v42 = vadd.f32 %v1583_v39, %v1569_v60  ;;  %v1624_v1 = vadd.f32 %v1623_v32, %v1609_v7 }
 0x2b0   : > { %v1585_v30 = vadd.f32 %v1584_v42, %v1570_v61  ;;  %v1625_v31 = vadd.f32 %v1624_v1, %v1610_v29 }
 0x2b2   : > { %v1586_v17 = vadd.f32 %v1585_v30, %v1571_v50  ;;  %v1626_v9 = vadd.f32 %v1625_v31, %v1611_v47 }
 0x2b4   : > { %v1587_v53 = vadd.f32 %v1586_v17, %v1572_v54  ;;  %v1627_v41 = vadd.f32 %v1626_v9, %v1612_v25 }
 0x2b6   : > { %v1588_v20 = vadd.f32 %v1587_v53, %v1573_v59  ;;  %v1628_v57 = vadd.f32 %v1627_v41, %v1613_v38 }
 0x2b8   : > { %v1589_v18 = vadd.f32 %v1588_v20, %v1574_v27  ;;  %v1629_v33 = vadd.f32 %v1628_v57, %v1614_v21 }
 0x2ba   : > { %1590 = vadd.xlane.f32.xlu0 %v1589_v18 }
 0x2be   : > { %1630 = vadd.xlane.f32.xlu0 %v1629_v33 }
 0x347   : > { %v1591_v0 = vpop.xlane.xlu0 %1590 }
 0x348   : > { %v1592_v5 = vrot.slane %v1591_v0, 4 }
 0x34a   : > { %v1593_v63 = vadd.f32 %v1592_v5, %v1591_v0 }
 0x34b   : > { %v1631_v62 = vpop.xlane.xlu0 %1630 }
 0x34c   : > { %v1594_v4 = vrot.slane %v1593_v63, 2  ;;  %v1632_v58 = vrot.slane %v1631_v62, 4 }
 0x34e   : > { %v1595_v22 = vadd.f32 %v1594_v4, %v1593_v63  ;;  %v1633_v23 = vadd.f32 %v1632_v58, %v1631_v62 }
 0x350   : > { %v1596_v52 = vrot.slane %v1595_v22, 1  ;;  %v1634_v14 = vrot.slane %v1633_v23, 2 }
 0x352   : > { %v1597_v3 = vadd.f32 %v1596_v52, %v1595_v22  ;;  %v1635_v11 = vadd.f32 %v1634_v14, %v1633_v23 }
 0x354   : > { %1801 = vpush %v1597_v3  ;;  %v1636_v56 = vrot.slane %v1635_v11, 1 }
 0x356   : > { %v1637_v49 = vadd.f32 %v1636_v56, %v1635_v11 }
 0x358   : > { %1803 = vpush %v1637_v49 }
 0x385   : > { %s1802_s0 = spop %1801 }
 0x386   : > { %s1639_s9 = smul.f32 2.0, %s1802_s0 }
 0x388   : > { %s1640_s23 = sadd.f32 1e-05, %s1639_s9 }
 0x389   : > { %s1804_s1 = spop %1803 }
 0x38a   : > { %s1641_s16 = sadd.f32 1e-05, %s1804_s1 }
 0x38c   : > { %v1642_v55 = vstv %s1641_s16 }
 0x38d   : > { %1910 = vrcp.f32 %v1642_v55 }
 0x397   : > { %v1911_v60 = vpop.eup %1910 }
 0x398   : > { %1805 = vpush %v1911_v60 }
 0x3c9   : > { %s1806_s10 = spop %1805 }
 0x3ca   : > { %s1645_s12 = smul.f32 %s1806_s10, %s1640_s23 }
 0x3cc   : > { %s1646_s18 = ssub.f32 1.0, %s1645_s12 }
 0x3ce   : > { %s1648_s7 = smul.f32 0.16666667, %s1646_s18 }
 0x3d0   : > { %v1649_v37 = vstv %s1648_s7 }
 0x3d1   : > { %v1650_v2 = vadd.f32 %v1649_v37, %v1647_v10 }
 0x3d3   : > { %1651 = vst.msk [vmem:[%s3800_s22] sm:$0x1] %vm1477_vm7, %v1650_v2 }
 0x3d4 PF: > { %p16_p0 = scmp.ge.s32.totalorder %s2093_s17, 10   ;;  %s4329_s12 = smov %s2032_s13 }
 0x3d5   : > { %s4330_s13 = smov %s2036_s14  ;;  %s4331_s14 = smov %s2103_s20 }
 0x3d6   : > { %s4332_s15 = smov %s2093_s17  ;;  %18 = sbr.rel (!%p16_p0) target bundleno = 8 (0x8), region = 100 }
 0x3dd   :  { %1669 = vsyncpa [#allocation3], 1 }
 0x3de   :  { %1671 = vsyncpa [#allocation3 + $0x1], 1 }
 0x3df   :  { %1672 = vsyncpa [#allocation5], 1 }
 0x3e0   :  { %1674 = vsyncpa [#allocation5 + $0x1], 1 }

</bundles_post_ra>
